<compile_context>
chip_gen: v5e
topology: v5e:2x2
jax: 0.10.0
libtpu: 0.0.40
codegen_flags: <defaults>
</compile_context>

<pallas_src>
import functools
import inspect

import jax
import jax.numpy as jnp
from jax.experimental import pallas as pl
from jax.experimental.pallas import tpu as pltpu

LAYERNORM_EPSILON = 1e-12
_MAX_SEQ_TILE = 256  # fills the 256-wide MXU rows on v6e/v7x; on v5e (128-wide MXU)
                     # the extra width only amortizes per-step overhead (harmless).

# pipeline_mode=pl.Buffered(1) (single-buffer grid-invariant weights) is only on
# newer JAX; feature-detect so the script stays portable.
try:
    _HAS_BUFFERED = hasattr(pl, "Buffered") and (
        "pipeline_mode" in inspect.signature(pl.BlockSpec).parameters)
except Exception:  # pragma: no cover
    _HAS_BUFFERED = False


# ------------------------------ small helpers --------------------------------

def _vmem_limit_bytes():
    """Generation-aware scoped-VMEM cap: ~100 MiB on 128-MiB parts (v5e/v6e),
    ~52 MiB on 64-MiB v7x, with headroom for compiler-internal scratch."""
    try:
        cap = int(pltpu.get_tpu_info().vmem_capacity_bytes)
    except Exception:
        cap = 64 * 1024 * 1024
    return max(32 * 1024 * 1024, min(cap - 12 * 1024 * 1024, 100 * 1024 * 1024))


def _pick_seq_tile(seq_len):
    if seq_len <= _MAX_SEQ_TILE:
        return seq_len
    ts = _MAX_SEQ_TILE
    while seq_len % ts and ts > 8:
        ts //= 2
    return ts


def _weight_spec(block_shape, index_map, single_buffer):
    """BlockSpec for a grid-invariant operand; single-buffered when supported."""
    if single_buffer and _HAS_BUFFERED:
        return pl.BlockSpec(block_shape, index_map, pipeline_mode=pl.Buffered(1))
    return pl.BlockSpec(block_shape, index_map)


def _layernorm(x, g, b):
    mu = jnp.mean(x, axis=-1, keepdims=True)
    xc = x - mu
    var = jnp.mean(xc * xc, axis=-1, keepdims=True)
    return xc * jax.lax.rsqrt(var + LAYERNORM_EPSILON) * g + b


def _split_heads(t, num_heads, head_dim):
    """(N, num_heads*head_dim) -> (num_heads, N, head_dim).

    Implemented with static lane slices + a leading-axis stack (robust Mosaic ops);
    the slices are fully tile-aligned when head_dim is a multiple of 128.
    """
    return jnp.stack(
        [t[:, h * head_dim:(h + 1) * head_dim] for h in range(num_heads)], axis=0)


# --------------------------------- kernels ------------------------------------

def qkv_proj_kernel(x_ref, w_ref, b_ref, o_ref):
    """qkv = x @ Wqkv + b for one (batch, seq-tile) block; bf16 store (half writeback)."""
    x = x_ref[0].astype(jnp.bfloat16)                      # (TS, H)
    acc = jnp.dot(x, w_ref[...], preferred_element_type=jnp.float32)  # f32 accumulation
    o_ref[0] = (acc + b_ref[...]).astype(o_ref.dtype)      # bias add in f32, store bf16


def attn_core_kernel(q_ref, k_ref, v_ref, m_ref, x_ref, wo_ref, bo_ref,
                     g_ref, b_ref, o_ref, *, scale, num_heads):
    """Per (batch, q-tile): multi-head attention + out-proj + residual + LayerNorm.

    q_ref/k_ref/v_ref are bf16 column slices of the fused qkv array (no host-side
    head-split pass); heads are split in-VMEM with tile-aligned slices.
    """
    H = q_ref.shape[-1]
    dh = H // num_heads

    # Fold 1/sqrt(dh) into the small (TS, H) q tile (not the (nh,TS,S) scores).
    q = q_ref[0] * scale                                   # bf16
    qh = _split_heads(q, num_heads, dh)                    # (nh, TS, dh) bf16
    kh = _split_heads(k_ref[0], num_heads, dh)             # (nh, S,  dh) bf16
    vh = _split_heads(v_ref[0], num_heads, dh)             # (nh, S,  dh) bf16

    mask_add = m_ref[...]                                  # (1, 1, S) additive mask, f32

    # Batched per-head scores on the MXU, f32 accumulation.
    s = jnp.einsum('hqd,hkd->hqk', qh, kh,
                   preferred_element_type=jnp.float32)     # (nh, TS, S)
    s = s + mask_add                                       # broadcast over heads/query

    # Numerically-stable softmax; normalization deferred until after the PV matmul.
    s = s - jnp.max(s, axis=-1, keepdims=True)
    p = jnp.exp(s)
    l = jnp.sum(p, axis=-1, keepdims=True)                 # (nh, TS, 1)

    ctx = jnp.einsum('hqk,hkd->hqd', p.astype(jnp.bfloat16), vh,
                     preferred_element_type=jnp.float32)   # (nh, TS, dh)
    # Normalize the small context tensor (S/dh fewer multiplies than normalizing p);
    # reciprocal goes to the EUP slot.
    ctx = ctx * pl.reciprocal(l, approx=True)

    # Out-projection: per-head (TS,dh)@(dh,H) accumulated straight into a (TS,H)
    # f32 tile.  Keeps ctx head-major (no h<->q relayout, no lane-crossing reshape,
    # no concat) and never materializes an (nh,TS,H) intermediate.
    ts = ctx.shape[1]
    out_acc = jnp.zeros((ts, H), jnp.float32)
    for h in range(num_heads):
        out_acc = out_acc + jnp.dot(ctx[h].astype(jnp.bfloat16), wo_ref[h],
                                    preferred_element_type=jnp.float32)
    attn_out = out_acc + bo_ref[...]

    # hidden dropout is identity for deterministic=True
    o_ref[0] = _layernorm(attn_out + x_ref[0], g_ref[...], b_ref[...]).astype(o_ref.dtype)


# ------------------------------ host wrapper -----------------------------------

def attention_forward(layer_input, input_mask, params, num_heads,
                      single_buffer_weights=True, out_dtype=jnp.float32):
    """Equivalent of Attention.forward(layer_input, input_mask, deterministic=True)."""
    B, S, H = layer_input.shape
    assert H % num_heads == 0
    # Column-offset q/k/v blocks require lane-dense H (true for real model sizes).
    assert H % 128 == 0, "hidden_size must be a multiple of 128 for lane-dense blocks"
    dh = H // num_heads
    TS = _pick_seq_tile(S)
    assert S % TS == 0
    n_s = S // TS
    vmem_limit = _vmem_limit_bytes()

    wqkv = params["wqkv"]                          # (H, 3H) bf16
    bqkv = params["bqkv"][None, :]                 # (1, 3H) f32
    # Per-head view of Wo: wo[h*dh+d, o] -> wo3[h, d, o]  (tiny one-time host reshape).
    wo3 = params["wo"].reshape(num_heads, dh, H)   # (nh, dh, H) bf16
    bo = params["bo"][None, :]                     # (1, H) f32
    g = params["ln_g"][None, :]
    b = params["ln_b"][None, :]

    # ---- kernel 1: QKV projection, tiled over (batch, seq); bf16 output ----
    qkv = pl.pallas_call(
        qkv_proj_kernel,
        out_shape=jax.ShapeDtypeStruct((B, S, 3 * H), jnp.bfloat16),
        grid=(B, n_s),
        in_specs=[
            pl.BlockSpec((1, TS, H), lambda bi, si: (bi, si, 0)),
            _weight_spec((H, 3 * H), lambda bi, si: (0, 0), single_buffer_weights),
            _weight_spec((1, 3 * H), lambda bi, si: (0, 0), single_buffer_weights),
        ],
        out_specs=pl.BlockSpec((1, TS, 3 * H), lambda bi, si: (bi, si, 0)),
        compiler_params=pltpu.CompilerParams(
            dimension_semantics=("parallel", "parallel"),
            vmem_limit_bytes=vmem_limit),
    )(layer_input, wqkv, bqkv)

    # Additive mask: (1 - input_mask) * -10000, broadcast over heads & query positions.
    mask_add = ((1.0 - input_mask.astype(jnp.float32)) * -10000.0)[:, None, :]  # (B,1,S)

    # ---- kernel 2: attention core + out-proj + residual + LayerNorm ----
    # q/k/v are column-offset views of the same bf16 qkv array (no host transpose).
    kernel = functools.partial(attn_core_kernel, scale=1.0 / (dh ** 0.5),
                               num_heads=num_heads)
    out = pl.pallas_call(
        kernel,
        out_shape=jax.ShapeDtypeStruct((B, S, H), out_dtype),
        grid=(B, n_s),
        in_specs=[
            pl.BlockSpec((1, TS, H), lambda bi, si: (bi, si, 0)),   # Q columns
            pl.BlockSpec((1, S, H), lambda bi, si: (bi, 0, 1)),     # K columns
            pl.BlockSpec((1, S, H), lambda bi, si: (bi, 0, 2)),     # V columns
            pl.BlockSpec((1, 1, S), lambda bi, si: (bi, 0, 0)),     # additive mask
            pl.BlockSpec((1, TS, H), lambda bi, si: (bi, si, 0)),   # residual x
            _weight_spec((num_heads, dh, H), lambda bi, si: (0, 0, 0), single_buffer_weights),
            _weight_spec((1, H), lambda bi, si: (0, 0), single_buffer_weights),
            _weight_spec((1, H), lambda bi, si: (0, 0), single_buffer_weights),
            _weight_spec((1, H), lambda bi, si: (0, 0), single_buffer_weights),
        ],
        out_specs=pl.BlockSpec((1, TS, H), lambda bi, si: (bi, si, 0)),
        compiler_params=pltpu.CompilerParams(
            dimension_semantics=("parallel", "parallel"),
            vmem_limit_bytes=vmem_limit),
    )(qkv, qkv, qkv, mask_add, layer_input, wo3, bo, g, b)
    return out


# ------------------------------ pure-JAX reference ------------------------------

def attention_reference(layer_input, input_mask, params, num_heads):
    B, S, H = layer_input.shape
    dh = H // num_heads
    qkv = layer_input @ params["wqkv"].astype(jnp.float32) + params["bqkv"]
    q, k, v = jnp.split(qkv, 3, axis=-1)

    def heads(t):
        return t.reshape(B, S, num_heads, dh).transpose(0, 2, 1, 3)

    q, k, v = heads(q), heads(k), heads(v)
    mask = (1.0 - input_mask.astype(jnp.float32))[:, None, None, :] * -10000.0
    s = jnp.einsum('bhqd,bhkd->bhqk', q, k) / jnp.sqrt(dh) + mask
    p = jax.nn.softmax(s, axis=-1)
    ctx = jnp.einsum('bhqk,bhkd->bhqd', p, v).transpose(0, 2, 1, 3).reshape(B, S, H)
    attn_out = ctx @ params["wo"].astype(jnp.float32) + params["bo"]
    y = attn_out + layer_input
    mu = jnp.mean(y, axis=-1, keepdims=True)
    var = jnp.mean((y - mu) ** 2, axis=-1, keepdims=True)
    return (y - mu) * jax.lax.rsqrt(var + LAYERNORM_EPSILON) * params["ln_g"] + params["ln_b"]


# ------------------------------ parameter init ---------------------------------

def _trunc_normal(key, shape, std=0.02):
    return std * jax.random.truncated_normal(key, -2.0, 2.0, shape, jnp.float32)


def init_attention_params(key, hidden_size, initializer_range=0.02):
    H = hidden_size
    k1, k2 = jax.random.split(key)
    return {
        # Weights stored pre-transposed (in, out) and in bf16 for MXU throughput /
        # halved HBM+VMEM traffic; biases & LayerNorm params stay f32 (zero-init
        # matching the reference module).
        "wqkv": _trunc_normal(k1, (H, 3 * H), initializer_range).astype(jnp.bfloat16),
        "bqkv": jnp.zeros((3 * H,), jnp.float32),
        "wo": _trunc_normal(k2, (H, H), initializer_range).astype(jnp.bfloat16),
        "bo": jnp.zeros((H,), jnp.float32),
        "ln_g": jnp.ones((H,), jnp.float32),
        "ln_b": jnp.zeros((H,), jnp.float32),
    }


# ----------------------------------- main --------------------------------------

if __name__ == "__main__":
    # Small demo shapes; HIDDEN is a multiple of 128 (and head_dim == 128) so every
    # column/head block is lane-dense and the in-kernel head split is tile-aligned.
    HIDDEN = 256
    HEADS = 2
    BATCH, SEQ = 2, 8

    key = jax.random.PRNGKey(0)
    pkey, xkey = jax.random.split(key)
    params = init_attention_params(pkey, HIDDEN)

    layer_input = 0.02 * jax.random.normal(xkey, (BATCH, SEQ, HIDDEN), jnp.float32)
    # input_mask: 1 = valid token, 0 = padding (exercise the mask path on one token).
    input_mask = jnp.ones((BATCH, SEQ), jnp.float32).at[1, -1].set(0.0)

    fwd = jax.jit(functools.partial(attention_forward, num_heads=HEADS))
    try:
        out = jax.block_until_ready(fwd(layer_input, input_mask, params))
    except Exception:
        # Some JAX/Mosaic versions reject single-buffered (pl.Buffered(1)) operands;
        # retry with default double-buffering.
        fwd = jax.jit(functools.partial(attention_forward, num_heads=HEADS,
                                        single_buffer_weights=False))
        out = jax.block_until_ready(fwd(layer_input, input_mask, params))

    ref = attention_reference(layer_input, input_mask, params, HEADS)
    max_err = float(jnp.max(jnp.abs(out - ref)))

    assert out.shape == (BATCH, SEQ, HIDDEN), out.shape
    assert bool(jnp.all(jnp.isfinite(out)))
    # bf16 weights/activations + approx EUP reciprocal -> loose tolerance vs f32 reference.
    assert max_err < 5e-2, max_err
    print("KERNEL_OK")
</pallas_src>

<mosaic_0001>
module attributes {stable_mosaic.version = 11 : i64} {
  func.func @qkv_proj_kernel(%arg0: i32, %arg1: i32, %arg2: memref<1x8x256xf32, #tpu.memory_space<vmem>>, %arg3: memref<256x768xbf16, #tpu.memory_space<vmem>>, %arg4: memref<1x768xf32, #tpu.memory_space<vmem>>, %arg5: memref<1x8x768xbf16, #tpu.memory_space<vmem>>) attributes {dimension_semantics = [#tpu.dimension_semantics<parallel>, #tpu.dimension_semantics<parallel>], iteration_bounds = array<i64: 2, 1>, scalar_prefetch = 0 : i64, scratch_operands = 0 : i64, tpu.core_type = #tpu.core_type<tc>, window_params = [{transform_indices = @transform_0, window_bounds = array<i64: 1, 8, 256>}, {pipeline_mode = #tpu.pipeline_mode<synchronous>, transform_indices = @transform_1, window_bounds = array<i64: 256, 768>}, {pipeline_mode = #tpu.pipeline_mode<synchronous>, transform_indices = @transform_2, window_bounds = array<i64: 1, 768>}, {transform_indices = @transform_3, window_bounds = array<i64: 1, 8, 768>}]} {
    %c0 = arith.constant 0 : index
    %c0_0 = arith.constant 0 : index
    %c0_1 = arith.constant 0 : index
    %0 = vector.load %arg2[%c0, %c0_0, %c0_1] : memref<1x8x256xf32, #tpu.memory_space<vmem>>, vector<1x8x256xf32>
    %1 = vector.shape_cast %0 : vector<1x8x256xf32> to vector<8x256xf32>
    %2 = arith.truncf %1 : vector<8x256xf32> to vector<8x256xbf16>
    %c0_2 = arith.constant 0 : index
    %c0_3 = arith.constant 0 : index
    %3 = vector.load %arg3[%c0_2, %c0_3] : memref<256x768xbf16, #tpu.memory_space<vmem>>, vector<256x768xbf16>
    %cst = arith.constant dense<0.000000e+00> : vector<8x768xf32>
    %4 = tpu.matmul %2, %3, %cst {dimension_numbers = #tpu.dot_dimension_numbers<[1], [0], [0], [1], [0, 0, 1, 1], [], []>} : vector<8x256xbf16>, vector<256x768xbf16>, vector<8x768xf32> -> vector<8x768xf32>
    %c0_4 = arith.constant 0 : index
    %c0_5 = arith.constant 0 : index
    %5 = vector.load %arg4[%c0_4, %c0_5] : memref<1x768xf32, #tpu.memory_space<vmem>>, vector<1x768xf32>
    %6 = vector.broadcast %5 : vector<1x768xf32> to vector<8x768xf32>
    %7 = arith.addf %4, %6 : vector<8x768xf32>
    %8 = arith.truncf %7 : vector<8x768xf32> to vector<8x768xbf16>
    %c0_6 = arith.constant 0 : index
    %c0_7 = arith.constant 0 : index
    %c0_8 = arith.constant 0 : index
    %9 = vector.load %arg5[%c0_6, %c0_7, %c0_8] : memref<1x8x768xbf16, #tpu.memory_space<vmem>>, vector<1x8x768xbf16>
    %10 = vector.shape_cast %9 : vector<1x8x768xbf16> to vector<8x768xbf16>
    %11 = vector.shape_cast %8 : vector<8x768xbf16> to vector<1x8x768xbf16>
    tpu.vector_store %arg5[%c0_6, %c0_7, %c0_8], %11 {strides = array<i32>} : memref<1x8x768xbf16, #tpu.memory_space<vmem>>, vector<1x8x768xbf16>,
    return
  }
  func.func @transform_0(%arg0: i32, %arg1: i32) -> (i32, i32, i32) {
    %c0_i32 = arith.constant 0 : i32
    %c0_i32_0 = arith.constant 0 : i32
    return %arg0, %arg1, %c0_i32 : i32, i32, i32
  }
  func.func @transform_1(%arg0: i32, %arg1: i32) -> (i32, i32) {
    %c0_i32 = arith.constant 0 : i32
    %c0_i32_0 = arith.constant 0 : i32
    %c0_i32_1 = arith.constant 0 : i32
    return %c0_i32, %c0_i32_0 : i32, i32
  }
  func.func @transform_2(%arg0: i32, %arg1: i32) -> (i32, i32) {
    %c0_i32 = arith.constant 0 : i32
    %c0_i32_0 = arith.constant 0 : i32
    %c0_i32_1 = arith.constant 0 : i32
    return %c0_i32, %c0_i32_0 : i32, i32
  }
  func.func @transform_3(%arg0: i32, %arg1: i32) -> (i32, i32, i32) {
    %c0_i32 = arith.constant 0 : i32
    %c0_i32_0 = arith.constant 0 : i32
    return %arg0, %arg1, %c0_i32 : i32, i32, i32
  }
}

module attributes {stable_mosaic.version = 11 : i64} {
  func.func @attn_core_kernel(%arg0: i32, %arg1: i32, %arg2: memref<1x8x256xbf16, #tpu.memory_space<vmem>>, %arg3: memref<1x8x256xbf16, #tpu.memory_space<vmem>>, %arg4: memref<1x8x256xbf16, #tpu.memory_space<vmem>>, %arg5: memref<1x1x8xf32, #tpu.memory_space<vmem>>, %arg6: memref<1x8x256xf32, #tpu.memory_space<vmem>>, %arg7: memref<2x128x256xbf16, #tpu.memory_space<vmem>>, %arg8: memref<1x256xf32, #tpu.memory_space<vmem>>, %arg9: memref<1x256xf32, #tpu.memory_space<vmem>>, %arg10: memref<1x256xf32, #tpu.memory_space<vmem>>, %arg11: memref<1x8x256xf32, #tpu.memory_space<vmem>>) attributes {dimension_semantics = [#tpu.dimension_semantics<parallel>, #tpu.dimension_semantics<parallel>], iteration_bounds = array<i64: 2, 1>, scalar_prefetch = 0 : i64, scratch_operands = 0 : i64, tpu.core_type = #tpu.core_type<tc>, window_params = [{transform_indices = @transform_0, window_bounds = array<i64: 1, 8, 256>}, {transform_indices = @transform_1, window_bounds = array<i64: 1, 8, 256>}, {transform_indices = @transform_2, window_bounds = array<i64: 1, 8, 256>}, {transform_indices = @transform_3, window_bounds = array<i64: 1, 1, 8>}, {transform_indices = @transform_4, window_bounds = array<i64: 1, 8, 256>}, {pipeline_mode = #tpu.pipeline_mode<synchronous>, transform_indices = @transform_5, window_bounds = array<i64: 2, 128, 256>}, {pipeline_mode = #tpu.pipeline_mode<synchronous>, transform_indices = @transform_6, window_bounds = array<i64: 1, 256>}, {pipeline_mode = #tpu.pipeline_mode<synchronous>, transform_indices = @transform_7, window_bounds = array<i64: 1, 256>}, {pipeline_mode = #tpu.pipeline_mode<synchronous>, transform_indices = @transform_8, window_bounds = array<i64: 1, 256>}, {transform_indices = @transform_9, window_bounds = array<i64: 1, 8, 256>}]} {
    %c0 = arith.constant 0 : index
    %c0_0 = arith.constant 0 : index
    %c0_1 = arith.constant 0 : index
    %0 = vector.load %arg2[%c0, %c0_0, %c0_1] : memref<1x8x256xbf16, #tpu.memory_space<vmem>>, vector<1x8x256xbf16>
    %1 = vector.shape_cast %0 : vector<1x8x256xbf16> to vector<8x256xbf16>
    %cst = arith.constant 8.837890e-02 : bf16
    %2 = vector.broadcast %cst : bf16 to vector<8x256xbf16>
    %3 = arith.mulf %1, %2 : vector<8x256xbf16>
    %4 = vector.extract_strided_slice %3 {offsets = [0, 0], sizes = [8, 128], strides = [1, 1]} : vector<8x256xbf16> to vector<8x128xbf16>
    %5 = vector.extract_strided_slice %3 {offsets = [0, 128], sizes = [8, 128], strides = [1, 1]} : vector<8x256xbf16> to vector<8x128xbf16>
    %6 = vector.shape_cast %4 : vector<8x128xbf16> to vector<1x8x128xbf16>
    %7 = vector.shape_cast %5 : vector<8x128xbf16> to vector<1x8x128xbf16>
    %8 = tpu.concatenate %6, %7 in 0 : vector<1x8x128xbf16>, vector<1x8x128xbf16> -> vector<2x8x128xbf16>
    %c0_2 = arith.constant 0 : index
    %c0_3 = arith.constant 0 : index
    %c0_4 = arith.constant 0 : index
    %9 = vector.load %arg3[%c0_2, %c0_3, %c0_4] : memref<1x8x256xbf16, #tpu.memory_space<vmem>>, vector<1x8x256xbf16>
    %10 = vector.shape_cast %9 : vector<1x8x256xbf16> to vector<8x256xbf16>
    %11 = vector.extract_strided_slice %10 {offsets = [0, 0], sizes = [8, 128], strides = [1, 1]} : vector<8x256xbf16> to vector<8x128xbf16>
    %12 = vector.extract_strided_slice %10 {offsets = [0, 128], sizes = [8, 128], strides = [1, 1]} : vector<8x256xbf16> to vector<8x128xbf16>
    %13 = vector.shape_cast %11 : vector<8x128xbf16> to vector<1x8x128xbf16>
    %14 = vector.shape_cast %12 : vector<8x128xbf16> to vector<1x8x128xbf16>
    %15 = tpu.concatenate %13, %14 in 0 : vector<1x8x128xbf16>, vector<1x8x128xbf16> -> vector<2x8x128xbf16>
    %c0_5 = arith.constant 0 : index
    %c0_6 = arith.constant 0 : index
    %c0_7 = arith.constant 0 : index
    %16 = vector.load %arg4[%c0_5, %c0_6, %c0_7] : memref<1x8x256xbf16, #tpu.memory_space<vmem>>, vector<1x8x256xbf16>
    %17 = vector.shape_cast %16 : vector<1x8x256xbf16> to vector<8x256xbf16>
    %18 = vector.extract_strided_slice %17 {offsets = [0, 0], sizes = [8, 128], strides = [1, 1]} : vector<8x256xbf16> to vector<8x128xbf16>
    %19 = vector.extract_strided_slice %17 {offsets = [0, 128], sizes = [8, 128], strides = [1, 1]} : vector<8x256xbf16> to vector<8x128xbf16>
    %20 = vector.shape_cast %18 : vector<8x128xbf16> to vector<1x8x128xbf16>
    %21 = vector.shape_cast %19 : vector<8x128xbf16> to vector<1x8x128xbf16>
    %22 = tpu.concatenate %20, %21 in 0 : vector<1x8x128xbf16>, vector<1x8x128xbf16> -> vector<2x8x128xbf16>
    %c0_8 = arith.constant 0 : index
    %c0_9 = arith.constant 0 : index
    %c0_10 = arith.constant 0 : index
    %23 = vector.load %arg5[%c0_8, %c0_9, %c0_10] : memref<1x1x8xf32, #tpu.memory_space<vmem>>, vector<1x1x8xf32>
    "tpu.trace_start"() <{level = 10 : i32, message = "hqd,hkd->hqk"}> : () -> ()
    %cst_11 = arith.constant dense<0.000000e+00> : vector<2x8x8xf32>
    %24 = tpu.matmul %8, %15, %cst_11 {dimension_numbers = #tpu.dot_dimension_numbers<[2], [2], [1], [1], [0, 0, 0, 1, 1, 1], [0], [0]>} : vector<2x8x128xbf16>, vector<2x8x128xbf16>, vector<2x8x8xf32> -> vector<2x8x8xf32>
    "tpu.trace_stop"() : () -> ()
    %25 = vector.broadcast %23 : vector<1x1x8xf32> to vector<2x8x8xf32>
    %26 = arith.addf %24, %25 : vector<2x8x8xf32>
    %cst_12 = arith.constant dense<0xFF800000> : vector<2x8xf32>
    %27 = vector.multi_reduction <maximumf>, %26, %cst_12 [2] : vector<2x8x8xf32> to vector<2x8xf32>
    %28 = vector.shape_cast %27 : vector<2x8xf32> to vector<2x8x1xf32>
    %29 = vector.broadcast %28 : vector<2x8x1xf32> to vector<2x8x8xf32>
    %30 = arith.subf %26, %29 : vector<2x8x8xf32>
    %31 = math.exp %30 : vector<2x8x8xf32>
    %cst_13 = arith.constant dense<0.000000e+00> : vector<2x8xf32>
    %32 = vector.multi_reduction <add>, %31, %cst_13 [2] : vector<2x8x8xf32> to vector<2x8xf32>
    %33 = vector.shape_cast %32 : vector<2x8xf32> to vector<2x8x1xf32>
    %34 = arith.truncf %31 : vector<2x8x8xf32> to vector<2x8x8xbf16>
    "tpu.trace_start"() <{level = 10 : i32, message = "hqk,hkd->hqd"}> : () -> ()
    %cst_14 = arith.constant dense<0.000000e+00> : vector<2x8x128xf32>
    %35 = tpu.matmul %34, %22, %cst_14 {dimension_numbers = #tpu.dot_dimension_numbers<[2], [1], [1], [2], [0, 0, 0, 1, 1, 2], [0], [0]>} : vector<2x8x8xbf16>, vector<2x8x128xbf16>, vector<2x8x128xf32> -> vector<2x8x128xf32>
    "tpu.trace_stop"() : () -> ()
    %36 = tpu.reciprocal %33 {approx = true} : vector<2x8x1xf32> -> vector<2x8x1xf32>
    %37 = vector.broadcast %36 : vector<2x8x1xf32> to vector<2x8x128xf32>
    %38 = arith.mulf %35, %37 : vector<2x8x128xf32>
    %cst_15 = arith.constant 0.000000e+00 : f32
    %39 = vector.broadcast %cst_15 : f32 to vector<8x256xf32>
    %40 = vector.extract_strided_slice %38 {offsets = [0, 0, 0], sizes = [1, 8, 128], strides = [1, 1, 1]} : vector<2x8x128xf32> to vector<1x8x128xf32>
    %41 = vector.shape_cast %40 : vector<1x8x128xf32> to vector<8x128xf32>
    %42 = arith.truncf %41 : vector<8x128xf32> to vector<8x128xbf16>
    %c0_16 = arith.constant 0 : index
    %c0_17 = arith.constant 0 : index
    %c0_18 = arith.constant 0 : index
    %43 = vector.load %arg7[%c0_16, %c0_17, %c0_18] : memref<2x128x256xbf16, #tpu.memory_space<vmem>>, vector<1x128x256xbf16>
    %44 = vector.shape_cast %43 : vector<1x128x256xbf16> to vector<128x256xbf16>
    %cst_19 = arith.constant dense<0.000000e+00> : vector<8x256xf32>
    %45 = tpu.matmul %42, %44, %cst_19 {dimension_numbers = #tpu.dot_dimension_numbers<[1], [0], [0], [1], [0, 0, 1, 1], [], []>} : vector<8x128xbf16>, vector<128x256xbf16>, vector<8x256xf32> -> vector<8x256xf32>
    %46 = arith.addf %39, %45 : vector<8x256xf32>
    %47 = vector.extract_strided_slice %38 {offsets = [1, 0, 0], sizes = [1, 8, 128], strides = [1, 1, 1]} : vector<2x8x128xf32> to vector<1x8x128xf32>
    %48 = vector.shape_cast %47 : vector<1x8x128xf32> to vector<8x128xf32>
    %49 = arith.truncf %48 : vector<8x128xf32> to vector<8x128xbf16>
    %c1 = arith.constant 1 : index
    %c0_20 = arith.constant 0 : index
    %c0_21 = arith.constant 0 : index
    %50 = vector.load %arg7[%c1, %c0_20, %c0_21] : memref<2x128x256xbf16, #tpu.memory_space<vmem>>, vector<1x128x256xbf16>
    %51 = vector.shape_cast %50 : vector<1x128x256xbf16> to vector<128x256xbf16>
    %cst_22 = arith.constant dense<0.000000e+00> : vector<8x256xf32>
    %52 = tpu.matmul %49, %51, %cst_22 {dimension_numbers = #tpu.dot_dimension_numbers<[1], [0], [0], [1], [0, 0, 1, 1], [], []>} : vector<8x128xbf16>, vector<128x256xbf16>, vector<8x256xf32> -> vector<8x256xf32>
    %53 = arith.addf %46, %52 : vector<8x256xf32>
    %c0_23 = arith.constant 0 : index
    %c0_24 = arith.constant 0 : index
    %54 = vector.load %arg8[%c0_23, %c0_24] : memref<1x256xf32, #tpu.memory_space<vmem>>, vector<1x256xf32>
    %55 = vector.broadcast %54 : vector<1x256xf32> to vector<8x256xf32>
    %56 = arith.addf %53, %55 : vector<8x256xf32>
    %c0_25 = arith.constant 0 : index
    %c0_26 = arith.constant 0 : index
    %c0_27 = arith.constant 0 : index
    %57 = vector.load %arg6[%c0_25, %c0_26, %c0_27] : memref<1x8x256xf32, #tpu.memory_space<vmem>>, vector<1x8x256xf32>
    %58 = vector.shape_cast %57 : vector<1x8x256xf32> to vector<8x256xf32>
    %59 = arith.addf %56, %58 : vector<8x256xf32>
    %c0_28 = arith.constant 0 : index
    %c0_29 = arith.constant 0 : index
    %60 = vector.load %arg9[%c0_28, %c0_29] : memref<1x256xf32, #tpu.memory_space<vmem>>, vector<1x256xf32>
    %c0_30 = arith.constant 0 : index
    %c0_31 = arith.constant 0 : index
    %61 = vector.load %arg10[%c0_30, %c0_31] : memref<1x256xf32, #tpu.memory_space<vmem>>, vector<1x256xf32>
    %cst_32 = arith.constant dense<0.000000e+00> : vector<8xf32>
    %62 = vector.multi_reduction <add>, %59, %cst_32 [1] : vector<8x256xf32> to vector<8xf32>
    %63 = vector.shape_cast %62 : vector<8xf32> to vector<8x1xf32>
    %cst_33 = arith.constant 2.560000e+02 : f32
    %64 = vector.broadcast %cst_33 : f32 to vector<8x1xf32>
    %65 = arith.divf %63, %64 : vector<8x1xf32>
    %66 = vector.broadcast %65 : vector<8x1xf32> to vector<8x256xf32>
    %67 = arith.subf %59, %66 : vector<8x256xf32>
    %68 = arith.mulf %67, %67 : vector<8x256xf32>
    %cst_34 = arith.constant dense<0.000000e+00> : vector<8xf32>
    %69 = vector.multi_reduction <add>, %68, %cst_34 [1] : vector<8x256xf32> to vector<8xf32>
    %70 = vector.shape_cast %69 : vector<8xf32> to vector<8x1xf32>
    %cst_35 = arith.constant 2.560000e+02 : f32
    %71 = vector.broadcast %cst_35 : f32 to vector<8x1xf32>
    %72 = arith.divf %70, %71 : vector<8x1xf32>
    %cst_36 = arith.constant 9.99999996E-13 : f32
    %73 = vector.broadcast %cst_36 : f32 to vector<8x1xf32>
    %74 = arith.addf %72, %73 : vector<8x1xf32>
    %75 = math.rsqrt %74 : vector<8x1xf32>
    %76 = vector.broadcast %75 : vector<8x1xf32> to vector<8x256xf32>
    %77 = arith.mulf %67, %76 : vector<8x256xf32>
    %78 = vector.broadcast %60 : vector<1x256xf32> to vector<8x256xf32>
    %79 = arith.mulf %77, %78 : vector<8x256xf32>
    %80 = vector.broadcast %61 : vector<1x256xf32> to vector<8x256xf32>
    %81 = arith.addf %79, %80 : vector<8x256xf32>
    %c0_37 = arith.constant 0 : index
    %c0_38 = arith.constant 0 : index
    %c0_39 = arith.constant 0 : index
    %82 = vector.load %arg11[%c0_37, %c0_38, %c0_39] : memref<1x8x256xf32, #tpu.memory_space<vmem>>, vector<1x8x256xf32>
    %83 = vector.shape_cast %82 : vector<1x8x256xf32> to vector<8x256xf32>
    %84 = vector.shape_cast %81 : vector<8x256xf32> to vector<1x8x256xf32>
    tpu.vector_store %arg11[%c0_37, %c0_38, %c0_39], %84 {strides = array<i32>} : memref<1x8x256xf32, #tpu.memory_space<vmem>>, vector<1x8x256xf32>,
    return
  }
  func.func @transform_0(%arg0: i32, %arg1: i32) -> (i32, i32, i32) {
    %c0_i32 = arith.constant 0 : i32
    %c0_i32_0 = arith.constant 0 : i32
    return %arg0, %arg1, %c0_i32 : i32, i32, i32
  }
  func.func @transform_1(%arg0: i32, %arg1: i32) -> (i32, i32, i32) {
    %c0_i32 = arith.constant 0 : i32
    %c1_i32 = arith.constant 1 : i32
    %c0_i32_0 = arith.constant 0 : i32
    return %arg0, %c0_i32, %c1_i32 : i32, i32, i32
  }
  func.func @transform_2(%arg0: i32, %arg1: i32) -> (i32, i32, i32) {
    %c0_i32 = arith.constant 0 : i32
    %c2_i32 = arith.constant 2 : i32
    %c0_i32_0 = arith.constant 0 : i32
    return %arg0, %c0_i32, %c2_i32 : i32, i32, i32
  }
  func.func @transform_3(%arg0: i32, %arg1: i32) -> (i32, i32, i32) {
    %c0_i32 = arith.constant 0 : i32
    %c0_i32_0 = arith.constant 0 : i32
    %c0_i32_1 = arith.constant 0 : i32
    return %arg0, %c0_i32, %c0_i32_0 : i32, i32, i32
  }
  func.func @transform_4(%arg0: i32, %arg1: i32) -> (i32, i32, i32) {
    %c0_i32 = arith.constant 0 : i32
    %c0_i32_0 = arith.constant 0 : i32
    return %arg0, %arg1, %c0_i32 : i32, i32, i32
  }
  func.func @transform_5(%arg0: i32, %arg1: i32) -> (i32, i32, i32) {
    %c0_i32 = arith.constant 0 : i32
    %c0_i32_0 = arith.constant 0 : i32
    %c0_i32_1 = arith.constant 0 : i32
    %c0_i32_2 = arith.constant 0 : i32
    return %c0_i32, %c0_i32_0, %c0_i32_1 : i32, i32, i32
  }
  func.func @transform_6(%arg0: i32, %arg1: i32) -> (i32, i32) {
    %c0_i32 = arith.constant 0 : i32
    %c0_i32_0 = arith.constant 0 : i32
    %c0_i32_1 = arith.constant 0 : i32
    return %c0_i32, %c0_i32_0 : i32, i32
  }
  func.func @transform_7(%arg0: i32, %arg1: i32) -> (i32, i32) {
    %c0_i32 = arith.constant 0 : i32
    %c0_i32_0 = arith.constant 0 : i32
    %c0_i32_1 = arith.constant 0 : i32
    return %c0_i32, %c0_i32_0 : i32, i32
  }
  func.func @transform_8(%arg0: i32, %arg1: i32) -> (i32, i32) {
    %c0_i32 = arith.constant 0 : i32
    %c0_i32_0 = arith.constant 0 : i32
    %c0_i32_1 = arith.constant 0 : i32
    return %c0_i32, %c0_i32_0 : i32, i32
  }
  func.func @transform_9(%arg0: i32, %arg1: i32) -> (i32, i32, i32) {
    %c0_i32 = arith.constant 0 : i32
    %c0_i32_0 = arith.constant 0 : i32
    return %arg0, %arg1, %c0_i32 : i32, i32, i32
  }
}

module attributes {stable_mosaic.version = 11 : i64} {
  func.func @attn_core_kernel(%arg0: i32, %arg1: i32, %arg2: memref<1x8x256xbf16, #tpu.memory_space<vmem>>, %arg3: memref<1x8x256xbf16, #tpu.memory_space<vmem>>, %arg4: memref<1x8x256xbf16, #tpu.memory_space<vmem>>, %arg5: memref<1x1x8xf32, #tpu.memory_space<vmem>>, %arg6: memref<1x8x256xf32, #tpu.memory_space<vmem>>, %arg7: memref<2x128x256xbf16, #tpu.memory_space<vmem>>, %arg8: memref<1x256xf32, #tpu.memory_space<vmem>>, %arg9: memref<1x256xf32, #tpu.memory_space<vmem>>, %arg10: memref<1x256xf32, #tpu.memory_space<vmem>>, %arg11: memref<1x8x256xf32, #tpu.memory_space<vmem>>) attributes {dimension_semantics = [#tpu.dimension_semantics<parallel>, #tpu.dimension_semantics<parallel>], iteration_bounds = array<i64: 2, 1>, scalar_prefetch = 0 : i64, scratch_operands = 0 : i64, tpu.core_type = #tpu.core_type<tc>, window_params = [{transform_indices = @transform_0, window_bounds = array<i64: 1, 8, 256>}, {transform_indices = @transform_1, window_bounds = array<i64: 1, 8, 256>}, {transform_indices = @transform_2, window_bounds = array<i64: 1, 8, 256>}, {transform_indices = @transform_3, window_bounds = array<i64: 1, 1, 8>}, {transform_indices = @transform_4, window_bounds = array<i64: 1, 8, 256>}, {pipeline_mode = #tpu.pipeline_mode<synchronous>, transform_indices = @transform_5, window_bounds = array<i64: 2, 128, 256>}, {pipeline_mode = #tpu.pipeline_mode<synchronous>, transform_indices = @transform_6, window_bounds = array<i64: 1, 256>}, {pipeline_mode = #tpu.pipeline_mode<synchronous>, transform_indices = @transform_7, window_bounds = array<i64: 1, 256>}, {pipeline_mode = #tpu.pipeline_mode<synchronous>, transform_indices = @transform_8, window_bounds = array<i64: 1, 256>}, {transform_indices = @transform_9, window_bounds = array<i64: 1, 8, 256>}]} {
    %c0 = arith.constant 0 : index
    %c0_0 = arith.constant 0 : index
    %c0_1 = arith.constant 0 : index
    %0 = vector.load %arg2[%c0, %c0_0, %c0_1] : memref<1x8x256xbf16, #tpu.memory_space<vmem>>, vector<1x8x256xbf16>
    %1 = vector.shape_cast %0 : vector<1x8x256xbf16> to vector<8x256xbf16>
    %cst = arith.constant 8.837890e-02 : bf16
    %2 = vector.broadcast %cst : bf16 to vector<8x256xbf16>
    %3 = arith.mulf %1, %2 : vector<8x256xbf16>
    %4 = vector.extract_strided_slice %3 {offsets = [0, 0], sizes = [8, 128], strides = [1, 1]} : vector<8x256xbf16> to vector<8x128xbf16>
    %5 = vector.extract_strided_slice %3 {offsets = [0, 128], sizes = [8, 128], strides = [1, 1]} : vector<8x256xbf16> to vector<8x128xbf16>
    %6 = vector.shape_cast %4 : vector<8x128xbf16> to vector<1x8x128xbf16>
    %7 = vector.shape_cast %5 : vector<8x128xbf16> to vector<1x8x128xbf16>
    %8 = tpu.concatenate %6, %7 in 0 : vector<1x8x128xbf16>, vector<1x8x128xbf16> -> vector<2x8x128xbf16>
    %c0_2 = arith.constant 0 : index
    %c0_3 = arith.constant 0 : index
    %c0_4 = arith.constant 0 : index
    %9 = vector.load %arg3[%c0_2, %c0_3, %c0_4] : memref<1x8x256xbf16, #tpu.memory_space<vmem>>, vector<1x8x256xbf16>
    %10 = vector.shape_cast %9 : vector<1x8x256xbf16> to vector<8x256xbf16>
    %11 = vector.extract_strided_slice %10 {offsets = [0, 0], sizes = [8, 128], strides = [1, 1]} : vector<8x256xbf16> to vector<8x128xbf16>
    %12 = vector.extract_strided_slice %10 {offsets = [0, 128], sizes = [8, 128], strides = [1, 1]} : vector<8x256xbf16> to vector<8x128xbf16>
    %13 = vector.shape_cast %11 : vector<8x128xbf16> to vector<1x8x128xbf16>
    %14 = vector.shape_cast %12 : vector<8x128xbf16> to vector<1x8x128xbf16>
    %15 = tpu.concatenate %13, %14 in 0 : vector<1x8x128xbf16>, vector<1x8x128xbf16> -> vector<2x8x128xbf16>
    %c0_5 = arith.constant 0 : index
    %c0_6 = arith.constant 0 : index
    %c0_7 = arith.constant 0 : index
    %16 = vector.load %arg4[%c0_5, %c0_6, %c0_7] : memref<1x8x256xbf16, #tpu.memory_space<vmem>>, vector<1x8x256xbf16>
    %17 = vector.shape_cast %16 : vector<1x8x256xbf16> to vector<8x256xbf16>
    %18 = vector.extract_strided_slice %17 {offsets = [0, 0], sizes = [8, 128], strides = [1, 1]} : vector<8x256xbf16> to vector<8x128xbf16>
    %19 = vector.extract_strided_slice %17 {offsets = [0, 128], sizes = [8, 128], strides = [1, 1]} : vector<8x256xbf16> to vector<8x128xbf16>
    %20 = vector.shape_cast %18 : vector<8x128xbf16> to vector<1x8x128xbf16>
    %21 = vector.shape_cast %19 : vector<8x128xbf16> to vector<1x8x128xbf16>
    %22 = tpu.concatenate %20, %21 in 0 : vector<1x8x128xbf16>, vector<1x8x128xbf16> -> vector<2x8x128xbf16>
    %c0_8 = arith.constant 0 : index
    %c0_9 = arith.constant 0 : index
    %c0_10 = arith.constant 0 : index
    %23 = vector.load %arg5[%c0_8, %c0_9, %c0_10] : memref<1x1x8xf32, #tpu.memory_space<vmem>>, vector<1x1x8xf32>
    "tpu.trace_start"() <{level = 10 : i32, message = "hqd,hkd->hqk"}> : () -> ()
    %cst_11 = arith.constant dense<0.000000e+00> : vector<2x8x8xf32>
    %24 = tpu.matmul %8, %15, %cst_11 {dimension_numbers = #tpu.dot_dimension_numbers<[2], [2], [1], [1], [0, 0, 0, 1, 1, 1], [0], [0]>} : vector<2x8x128xbf16>, vector<2x8x128xbf16>, vector<2x8x8xf32> -> vector<2x8x8xf32>
    "tpu.trace_stop"() : () -> ()
    %25 = vector.broadcast %23 : vector<1x1x8xf32> to vector<2x8x8xf32>
    %26 = arith.addf %24, %25 : vector<2x8x8xf32>
    %cst_12 = arith.constant dense<0xFF800000> : vector<2x8xf32>
    %27 = vector.multi_reduction <maximumf>, %26, %cst_12 [2] : vector<2x8x8xf32> to vector<2x8xf32>
    %28 = vector.shape_cast %27 : vector<2x8xf32> to vector<2x8x1xf32>
    %29 = vector.broadcast %28 : vector<2x8x1xf32> to vector<2x8x8xf32>
    %30 = arith.subf %26, %29 : vector<2x8x8xf32>
    %31 = math.exp %30 : vector<2x8x8xf32>
    %cst_13 = arith.constant dense<0.000000e+00> : vector<2x8xf32>
    %32 = vector.multi_reduction <add>, %31, %cst_13 [2] : vector<2x8x8xf32> to vector<2x8xf32>
    %33 = vector.shape_cast %32 : vector<2x8xf32> to vector<2x8x1xf32>
    %34 = arith.truncf %31 : vector<2x8x8xf32> to vector<2x8x8xbf16>
    "tpu.trace_start"() <{level = 10 : i32, message = "hqk,hkd->hqd"}> : () -> ()
    %cst_14 = arith.constant dense<0.000000e+00> : vector<2x8x128xf32>
    %35 = tpu.matmul %34, %22, %cst_14 {dimension_numbers = #tpu.dot_dimension_numbers<[2], [1], [1], [2], [0, 0, 0, 1, 1, 2], [0], [0]>} : vector<2x8x8xbf16>, vector<2x8x128xbf16>, vector<2x8x128xf32> -> vector<2x8x128xf32>
    "tpu.trace_stop"() : () -> ()
    %36 = tpu.reciprocal %33 {approx = true} : vector<2x8x1xf32> -> vector<2x8x1xf32>
    %37 = vector.broadcast %36 : vector<2x8x1xf32> to vector<2x8x128xf32>
    %38 = arith.mulf %35, %37 : vector<2x8x128xf32>
    %cst_15 = arith.constant 0.000000e+00 : f32
    %39 = vector.broadcast %cst_15 : f32 to vector<8x256xf32>
    %40 = vector.extract_strided_slice %38 {offsets = [0, 0, 0], sizes = [1, 8, 128], strides = [1, 1, 1]} : vector<2x8x128xf32> to vector<1x8x128xf32>
    %41 = vector.shape_cast %40 : vector<1x8x128xf32> to vector<8x128xf32>
    %42 = arith.truncf %41 : vector<8x128xf32> to vector<8x128xbf16>
    %c0_16 = arith.constant 0 : index
    %c0_17 = arith.constant 0 : index
    %c0_18 = arith.constant 0 : index
    %43 = vector.load %arg7[%c0_16, %c0_17, %c0_18] : memref<2x128x256xbf16, #tpu.memory_space<vmem>>, vector<1x128x256xbf16>
    %44 = vector.shape_cast %43 : vector<1x128x256xbf16> to vector<128x256xbf16>
    %cst_19 = arith.constant dense<0.000000e+00> : vector<8x256xf32>
    %45 = tpu.matmul %42, %44, %cst_19 {dimension_numbers = #tpu.dot_dimension_numbers<[1], [0], [0], [1], [0, 0, 1, 1], [], []>} : vector<8x128xbf16>, vector<128x256xbf16>, vector<8x256xf32> -> vector<8x256xf32>
    %46 = arith.addf %39, %45 : vector<8x256xf32>
    %47 = vector.extract_strided_slice %38 {offsets = [1, 0, 0], sizes = [1, 8, 128], strides = [1, 1, 1]} : vector<2x8x128xf32> to vector<1x8x128xf32>
    %48 = vector.shape_cast %47 : vector<1x8x128xf32> to vector<8x128xf32>
    %49 = arith.truncf %48 : vector<8x128xf32> to vector<8x128xbf16>
    %c1 = arith.constant 1 : index
    %c0_20 = arith.constant 0 : index
    %c0_21 = arith.constant 0 : index
    %50 = vector.load %arg7[%c1, %c0_20, %c0_21] : memref<2x128x256xbf16, #tpu.memory_space<vmem>>, vector<1x128x256xbf16>
    %51 = vector.shape_cast %50 : vector<1x128x256xbf16> to vector<128x256xbf16>
    %cst_22 = arith.constant dense<0.000000e+00> : vector<8x256xf32>
    %52 = tpu.matmul %49, %51, %cst_22 {dimension_numbers = #tpu.dot_dimension_numbers<[1], [0], [0], [1], [0, 0, 1, 1], [], []>} : vector<8x128xbf16>, vector<128x256xbf16>, vector<8x256xf32> -> vector<8x256xf32>
    %53 = arith.addf %46, %52 : vector<8x256xf32>
    %c0_23 = arith.constant 0 : index
    %c0_24 = arith.constant 0 : index
    %54 = vector.load %arg8[%c0_23, %c0_24] : memref<1x256xf32, #tpu.memory_space<vmem>>, vector<1x256xf32>
    %55 = vector.broadcast %54 : vector<1x256xf32> to vector<8x256xf32>
    %56 = arith.addf %53, %55 : vector<8x256xf32>
    %c0_25 = arith.constant 0 : index
    %c0_26 = arith.constant 0 : index
    %c0_27 = arith.constant 0 : index
    %57 = vector.load %arg6[%c0_25, %c0_26, %c0_27] : memref<1x8x256xf32, #tpu.memory_space<vmem>>, vector<1x8x256xf32>
    %58 = vector.shape_cast %57 : vector<1x8x256xf32> to vector<8x256xf32>
    %59 = arith.addf %56, %58 : vector<8x256xf32>
    %c0_28 = arith.constant 0 : index
    %c0_29 = arith.constant 0 : index
    %60 = vector.load %arg9[%c0_28, %c0_29] : memref<1x256xf32, #tpu.memory_space<vmem>>, vector<1x256xf32>
    %c0_30 = arith.constant 0 : index
    %c0_31 = arith.constant 0 : index
    %61 = vector.load %arg10[%c0_30, %c0_31] : memref<1x256xf32, #tpu.memory_space<vmem>>, vector<1x256xf32>
    %cst_32 = arith.constant dense<0.000000e+00> : vector<8xf32>
    %62 = vector.multi_reduction <add>, %59, %cst_32 [1] : vector<8x256xf32> to vector<8xf32>
    %63 = vector.shape_cast %62 : vector<8xf32> to vector<8x1xf32>
    %cst_33 = arith.constant 2.560000e+02 : f32
    %64 = vector.broadcast %cst_33 : f32 to vector<8x1xf32>
    %65 = arith.divf %63, %64 : vector<8x1xf32>
    %66 = vector.broadcast %65 : vector<8x1xf32> to vector<8x256xf32>
    %67 = arith.subf %59, %66 : vector<8x256xf32>
    %68 = arith.mulf %67, %67 : vector<8x256xf32>
    %cst_34 = arith.constant dense<0.000000e+00> : vector<8xf32>
    %69 = vector.multi_reduction <add>, %68, %cst_34 [1] : vector<8x256xf32> to vector<8xf32>
    %70 = vector.shape_cast %69 : vector<8xf32> to vector<8x1xf32>
    %cst_35 = arith.constant 2.560000e+02 : f32
    %71 = vector.broadcast %cst_35 : f32 to vector<8x1xf32>
    %72 = arith.divf %70, %71 : vector<8x1xf32>
    %cst_36 = arith.constant 9.99999996E-13 : f32
    %73 = vector.broadcast %cst_36 : f32 to vector<8x1xf32>
    %74 = arith.addf %72, %73 : vector<8x1xf32>
    %75 = math.rsqrt %74 : vector<8x1xf32>
    %76 = vector.broadcast %75 : vector<8x1xf32> to vector<8x256xf32>
    %77 = arith.mulf %67, %76 : vector<8x256xf32>
    %78 = vector.broadcast %60 : vector<1x256xf32> to vector<8x256xf32>
    %79 = arith.mulf %77, %78 : vector<8x256xf32>
    %80 = vector.broadcast %61 : vector<1x256xf32> to vector<8x256xf32>
    %81 = arith.addf %79, %80 : vector<8x256xf32>
    %c0_37 = arith.constant 0 : index
    %c0_38 = arith.constant 0 : index
    %c0_39 = arith.constant 0 : index
    %82 = vector.load %arg11[%c0_37, %c0_38, %c0_39] : memref<1x8x256xf32, #tpu.memory_space<vmem>>, vector<1x8x256xf32>
    %83 = vector.shape_cast %82 : vector<1x8x256xf32> to vector<8x256xf32>
    %84 = vector.shape_cast %81 : vector<8x256xf32> to vector<1x8x256xf32>
    tpu.vector_store %arg11[%c0_37, %c0_38, %c0_39], %84 {strides = array<i32>} : memref<1x8x256xf32, #tpu.memory_space<vmem>>, vector<1x8x256xf32>,
    return
  }
  func.func @transform_0(%arg0: i32, %arg1: i32) -> (i32, i32, i32) {
    %c0_i32 = arith.constant 0 : i32
    %c0_i32_0 = arith.constant 0 : i32
    return %arg0, %arg1, %c0_i32 : i32, i32, i32
  }
  func.func @transform_1(%arg0: i32, %arg1: i32) -> (i32, i32, i32) {
    %c0_i32 = arith.constant 0 : i32
    %c1_i32 = arith.constant 1 : i32
    %c0_i32_0 = arith.constant 0 : i32
    return %arg0, %c0_i32, %c1_i32 : i32, i32, i32
  }
  func.func @transform_2(%arg0: i32, %arg1: i32) -> (i32, i32, i32) {
    %c0_i32 = arith.constant 0 : i32
    %c2_i32 = arith.constant 2 : i32
    %c0_i32_0 = arith.constant 0 : i32
    return %arg0, %c0_i32, %c2_i32 : i32, i32, i32
  }
  func.func @transform_3(%arg0: i32, %arg1: i32) -> (i32, i32, i32) {
    %c0_i32 = arith.constant 0 : i32
    %c0_i32_0 = arith.constant 0 : i32
    %c0_i32_1 = arith.constant 0 : i32
    return %arg0, %c0_i32, %c0_i32_0 : i32, i32, i32
  }
  func.func @transform_4(%arg0: i32, %arg1: i32) -> (i32, i32, i32) {
    %c0_i32 = arith.constant 0 : i32
    %c0_i32_0 = arith.constant 0 : i32
    return %arg0, %arg1, %c0_i32 : i32, i32, i32
  }
  func.func @transform_5(%arg0: i32, %arg1: i32) -> (i32, i32, i32) {
    %c0_i32 = arith.constant 0 : i32
    %c0_i32_0 = arith.constant 0 : i32
    %c0_i32_1 = arith.constant 0 : i32
    %c0_i32_2 = arith.constant 0 : i32
    return %c0_i32, %c0_i32_0, %c0_i32_1 : i32, i32, i32
  }
  func.func @transform_6(%arg0: i32, %arg1: i32) -> (i32, i32) {
    %c0_i32 = arith.constant 0 : i32
    %c0_i32_0 = arith.constant 0 : i32
    %c0_i32_1 = arith.constant 0 : i32
    return %c0_i32, %c0_i32_0 : i32, i32
  }
  func.func @transform_7(%arg0: i32, %arg1: i32) -> (i32, i32) {
    %c0_i32 = arith.constant 0 : i32
    %c0_i32_0 = arith.constant 0 : i32
    %c0_i32_1 = arith.constant 0 : i32
    return %c0_i32, %c0_i32_0 : i32, i32
  }
  func.func @transform_8(%arg0: i32, %arg1: i32) -> (i32, i32) {
    %c0_i32 = arith.constant 0 : i32
    %c0_i32_0 = arith.constant 0 : i32
    %c0_i32_1 = arith.constant 0 : i32
    return %c0_i32, %c0_i32_0 : i32, i32
  }
  func.func @transform_9(%arg0: i32, %arg1: i32) -> (i32, i32, i32) {
    %c0_i32 = arith.constant 0 : i32
    %c0_i32_0 = arith.constant 0 : i32
    return %arg0, %arg1, %c0_i32 : i32, i32, i32
  }
}

module attributes {stable_mosaic.version = 11 : i64} {
  func.func @qkv_proj_kernel(%arg0: i32, %arg1: i32, %arg2: memref<1x8x256xf32, #tpu.memory_space<vmem>>, %arg3: memref<256x768xbf16, #tpu.memory_space<vmem>>, %arg4: memref<1x768xf32, #tpu.memory_space<vmem>>, %arg5: memref<1x8x768xbf16, #tpu.memory_space<vmem>>) attributes {dimension_semantics = [#tpu.dimension_semantics<parallel>, #tpu.dimension_semantics<parallel>], iteration_bounds = array<i64: 2, 1>, scalar_prefetch = 0 : i64, scratch_operands = 0 : i64, tpu.core_type = #tpu.core_type<tc>, window_params = [{transform_indices = @transform_0, window_bounds = array<i64: 1, 8, 256>}, {pipeline_mode = #tpu.pipeline_mode<synchronous>, transform_indices = @transform_1, window_bounds = array<i64: 256, 768>}, {pipeline_mode = #tpu.pipeline_mode<synchronous>, transform_indices = @transform_2, window_bounds = array<i64: 1, 768>}, {transform_indices = @transform_3, window_bounds = array<i64: 1, 8, 768>}]} {
    %c0 = arith.constant 0 : index
    %c0_0 = arith.constant 0 : index
    %c0_1 = arith.constant 0 : index
    %0 = vector.load %arg2[%c0, %c0_0, %c0_1] : memref<1x8x256xf32, #tpu.memory_space<vmem>>, vector<1x8x256xf32>
    %1 = vector.shape_cast %0 : vector<1x8x256xf32> to vector<8x256xf32>
    %2 = arith.truncf %1 : vector<8x256xf32> to vector<8x256xbf16>
    %c0_2 = arith.constant 0 : index
    %c0_3 = arith.constant 0 : index
    %3 = vector.load %arg3[%c0_2, %c0_3] : memref<256x768xbf16, #tpu.memory_space<vmem>>, vector<256x768xbf16>
    %cst = arith.constant dense<0.000000e+00> : vector<8x768xf32>
    %4 = tpu.matmul %2, %3, %cst {dimension_numbers = #tpu.dot_dimension_numbers<[1], [0], [0], [1], [0, 0, 1, 1], [], []>} : vector<8x256xbf16>, vector<256x768xbf16>, vector<8x768xf32> -> vector<8x768xf32>
    %c0_4 = arith.constant 0 : index
    %c0_5 = arith.constant 0 : index
    %5 = vector.load %arg4[%c0_4, %c0_5] : memref<1x768xf32, #tpu.memory_space<vmem>>, vector<1x768xf32>
    %6 = vector.broadcast %5 : vector<1x768xf32> to vector<8x768xf32>
    %7 = arith.addf %4, %6 : vector<8x768xf32>
    %8 = arith.truncf %7 : vector<8x768xf32> to vector<8x768xbf16>
    %c0_6 = arith.constant 0 : index
    %c0_7 = arith.constant 0 : index
    %c0_8 = arith.constant 0 : index
    %9 = vector.load %arg5[%c0_6, %c0_7, %c0_8] : memref<1x8x768xbf16, #tpu.memory_space<vmem>>, vector<1x8x768xbf16>
    %10 = vector.shape_cast %9 : vector<1x8x768xbf16> to vector<8x768xbf16>
    %11 = vector.shape_cast %8 : vector<8x768xbf16> to vector<1x8x768xbf16>
    tpu.vector_store %arg5[%c0_6, %c0_7, %c0_8], %11 {strides = array<i32>} : memref<1x8x768xbf16, #tpu.memory_space<vmem>>, vector<1x8x768xbf16>,
    return
  }
  func.func @transform_0(%arg0: i32, %arg1: i32) -> (i32, i32, i32) {
    %c0_i32 = arith.constant 0 : i32
    %c0_i32_0 = arith.constant 0 : i32
    return %arg0, %arg1, %c0_i32 : i32, i32, i32
  }
  func.func @transform_1(%arg0: i32, %arg1: i32) -> (i32, i32) {
    %c0_i32 = arith.constant 0 : i32
    %c0_i32_0 = arith.constant 0 : i32
    %c0_i32_1 = arith.constant 0 : i32
    return %c0_i32, %c0_i32_0 : i32, i32
  }
  func.func @transform_2(%arg0: i32, %arg1: i32) -> (i32, i32) {
    %c0_i32 = arith.constant 0 : i32
    %c0_i32_0 = arith.constant 0 : i32
    %c0_i32_1 = arith.constant 0 : i32
    return %c0_i32, %c0_i32_0 : i32, i32
  }
  func.func @transform_3(%arg0: i32, %arg1: i32) -> (i32, i32, i32) {
    %c0_i32 = arith.constant 0 : i32
    %c0_i32_0 = arith.constant 0 : i32
    return %arg0, %arg1, %c0_i32 : i32, i32, i32
  }
}

</mosaic_0001>

<bundles_post_ra>
// kernel: attention_forward.3
= control target key start
LH: loop header
LB: loop body
LE: loop exit
PB: predicated region body
PF: predicated region fallthrough
CT: control target
= control target key end

     0   :  { %s1742_s0 = inlined_call_operand.vmem [shape: bf16[2,8,768], index: 0, kind: input, shape index: {}, may-alias: {0,1,2}]   ;;  %s1743_s1 = inlined_call_operand.vmem [shape: bf16[2,8,768], index: 1, kind: input, shape index: {}, may-alias: {0,1,2}]   ;;  %s1744_s2 = inlined_call_operand.vmem [shape: bf16[2,8,768], index: 2, kind: input, shape index: {}, may-alias: {0,1,2}]   ;;  %s1745_s3 = inlined_call_operand.vmem [shape: f32[2,1,8], index: 3, kind: input, shape index: {}]   ;;  %s1746_s4 = inlined_call_operand.hbm [shape: f32[2,8,256], index: 4, kind: input, shape index: {}]   ;;  %s1747_s5 = inlined_call_operand.hbm [shape: bf16[2,128,256], index: 5, kind: input, shape index: {}]   ;;  %s1748_s6 = inlined_call_operand.vmem [shape: f32[1,256], index: 6, kind: input, shape index: {}]   ;;  %s1749_s7 = inlined_call_operand.vmem [shape: f32[1,256], index: 7, kind: input, shape index: {}]   ;;  %s1750_s8 = inlined_call_operand.vmem [shape: f32[1,256], index: 8, kind: input, shape index: {}]   ;;  %s1751_s9 = inlined_call_operand.hbm [shape: f32[2,8,256], index: 9, kind: output, shape index: {}]  }
   0x1   :  { %1754 = sst [smem:[#allocation14_spill]] %s1747_s5 }
   0x2   :  { %14 = vsyncpa [#allocation3], 0 }
   0x3   :  { %16 = vsyncpa [#allocation3 + $0x1], 0 }
   0x4   :  { %17 = vsyncpa [#allocation6], 0 }
   0x5   :  { %18 = vsyncpa [#allocation4], 0 }
   0x6   :  { %20 = vsyncpa [#allocation4 + $0x1], 0  ;;  %s1557_s30 = smov 0   ;;  %s1559_s10 = smov 0  }
   0x7   :  { %s1561_s11 = smov 0   ;;  %s1563_s12 = smov 0  }
   0x8   :  { %s1565_s13 = smov 0   ;;  %s1567_s14 = smov 0  }
   0x9 LB: > { %1755 = sst [smem:[#allocation11_spill]] %s1481_s30  ;;  %s1079_s15 = sadd.s32 4294967295, %s1501_s14   ;;  %s1501_s14 = sphi %s1567_s14, %s26_s14   ;;  %s1497_s13 = sphi %s1565_s13, %s1772_s13   ;;  %s1493_s12 = sphi %s1563_s12, %s1771_s12   ;;  %s1489_s11 = sphi %s1561_s11, %s1770_s11   ;;  %s1485_s10 = sphi %s1559_s10, %s1769_s10   ;;  %s1481_s30 = sphi %s1557_s30, %s1768_s30  }
   0xa   : > { %p1081_p0 = scmp.ge.s32.totalorder %s1501_s14, 1  ;;  %p1589_p1 = scmp.eq.s32.totalorder %s1079_s15, 0 }
   0xb   : > { %p289_p2 = scmp.lt.s32.totalorder %s1501_s14, 3  ;;  %s1757_s5 = sld [smem:[#allocation14_spill]] }
   0xc   : > { %s1503_s21 = smov [#allocation5]   ;;  %p1083_p6 = scmp.ge.s32.totalorder %s1501_s14, 2 }
   0xd   : > { %p1597_p3 = pnand %p1081_p0, %p289_p2  ;;  %s302_s22 = sshll.u32 %s1503_s21, 4  ;;  %s303_s22 = int_to_ptr.vmem [resolvable:$true] %s302_s22 }
   0xe   : > { %s1504_s23 = smov 128   ;;  %s1505_s24 = smov 8  }
   0xf   : > { %p1274_p4 = pneg %p1597_p3  ;;  %s1080_s25 = sadd.s32 4294967294, %s1501_s14  }
  0x10   : > { %s38_s26 = sadd.s32 1, %s1497_s13  ;;  %s153_s27 = sadd.s32 1, %s1489_s11 }
  0x11   : > { %s300_s19 = sshll.u32 %s1757_s5, 4  ;;  %p1275_p5 = pnand %p1274_p4, %p1589_p1  ;;  %s301_s19 = int_to_ptr.hbm [resolvable:$true] %s300_s19 }
  0x12   : > { %p40_p7 = scmp.ge.s32.totalorder %s38_s26, 2  ;;  %p160_p8 = scmp.ne.s32.totalorder %s1489_s11, %s1485_s10 }
  0x13   : > { %1277 = dma.hbm_to_vmem [thread:$0]  (!%p1275_p5), %s301_s19, 4096, %s303_s22, [#allocation6], %s1504_s23, %s1504_s23, %s1505_s24  }
  0x14   : > { %p161_p9 = scmp.eq.s32.totalorder %s1501_s14, 0  ;;  %p166_p10 = scmp.ne.s32.totalorder %s1485_s10, %s1481_s30 }
  0x15   : > { %s1774_s26 = smov (%p40_p7, %s38_s26), 0  ;;  %p276_p13 = scmp.eq.s32.totalorder %s1079_s15, 1 }
  0x16   : > { %1759 = sst [smem:[#allocation12_spill]] %s1774_s26  ;;  %p1616_p11 = por %p161_p9, %p160_p8 }
  0x17   : > { %p1622_p12 = por %p1589_p1, %p166_p10  ;;  %s148_s17 = ssub.s32 %s1497_s13, %s1774_s26 }
  0x18   : > { %p151_p0 = scmp.eq.s32.totalorder %s148_s17, 0  ;;  %p282_p2 = scmp.eq.s32.totalorder %s1080_s25, 1 }
  0x19   : > { %p1628_p4 = por %p276_p13, %p160_p8  ;;  %p1287_p5 = scmp.lt.s32.totalorder %s1501_s14, 2 }
  0x1a   : > { %s1634_s19 = scalar_select %p151_p0, %s1489_s11, %s153_s27  }
  0x1b   : > { %p1636_p7 = por %p282_p2, %p166_p10  ;;  %s361_s22 = sand.u32 1, %s1489_s11  }
  0x1c   : > { %1763 = sst [smem:[#allocation13_spill]] %s1634_s19  ;;  %s1084_s23 = sshll.u32 %s361_s22, 4 }
  0x1d   : > { %s1231_s24 = sshll.u32 %s1497_s13, 4  ;;  %s365_s17 = scalar_lea.vmem [#allocation2], %s1084_s23 }
  0x1e   : > { %s372_s15 = scalar_lea.hbm %s1746_s4, %s1231_s24  ;;  %s376_s25 = sshll.u32 %s365_s17, 4  ;;  %s377_s25 = int_to_ptr.vmem [resolvable:$true] %s376_s25 }
  0x1f   : > { %s374_s30 = sshll.u32 %s372_s15, 4  ;;  %p1279_p8 = pnand %p1287_p5, %p1616_p11  ;;  %s375_s30 = int_to_ptr.hbm [resolvable:$true] %s374_s30 }
  0x20   : > { %s362_s27 = scalar_lea.sflag [#allocation3], %s361_s22  ;;  %385 = sbr.rel (%p1597_p3) target bundleno = 865 (0x361), region = 56 }
  0x21   : > { %1281 = dma.hbm_to_vmem [thread:$0]  (!%p1279_p8), %s375_s30, 256, %s377_s25, %s362_s27  }
  0x22   : > { %s1650_s19 = sand.u32 (!%p1597_p3), 1, %s1485_s10  }
  0x23   : > { %s1088_s5 = sshll.u32 (!%p1597_p3), %s1650_s19, 4  ;;  %s388_s26 = scalar_lea.sflag (!%p1597_p3), [#allocation3], %s1650_s19 }
  0x24   : > { %s1656_s23 = scalar_lea.vmem (!%p1597_p3), [#allocation2], %s1088_s5 }
  0x25   : > { %1468 = dma.done.wait (%p1622_p12), %s388_s26, 256  }
  0x26   : > { %1470 = vsyncadd (%p1622_p12), %s388_s26, 4294967040 }
  0x27   : > { %1472 = dma.done.wait (%p1589_p1), [#allocation6], 4096  }
  0x28   : > { %1474 = vsyncadd (%p1589_p1), [#allocation6], 4294963200  ;;  %p456_p3 = scmp.lt.s32.totalorder %s1493_s12, 1  ;;  %vm527_vm0 = vcmask 64512   ;;  %vm551_vm1 = vcmask 1043456   ;;  %s1264_s29 = sshll.u32 %s1493_s12, 4 }
  0x29   : > { %v1156_v22 = vld [vmem:[#allocation5 + $0xf0] sm:$0xf]  ;;  %v1263_v23 = vld [vmem:[#allocation5 + $0xf4] sm:$0xf0]  ;;  %v1262_v24 = vld [vmem:[#allocation5 + $0xf4] sm:$0xf] }
  0x2a   : > { %s457_s30 = scalar_select %p456_p3, %s1493_s12, 1  ;;  %v1157_v25 = vor.u32 %v1263_v23, %v1156_v22  ;;  %v1158_v26 = vld [vmem:[#allocation5 + $0xf8] sm:$0xf0]  ;;  %v1148_v27 = vld [vmem:[#allocation5 + $0xe0] sm:$0xf] }
  0x2b   : > { %v1261_v28 = vld [vmem:[#allocation5 + $0xe4] sm:$0xf0]  ;;  %v1161_v29 = vor.u32 %v1262_v24, %v1158_v26  ;;  %v1260_v30 = vld [vmem:[#allocation5 + $0xe4] sm:$0xf]  ;;  %v1150_v31 = vld [vmem:[#allocation5 + $0xe8] sm:$0xf0] }
  0x2c   : > { %s1668_s20 = smul.u32 24, %s457_s30  ;;  %s479_s24 = scalar_lea.vmem %s1745_s3, %s457_s30  ;;  %v1149_v32 = vor.u32 %v1261_v28, %v1148_v27  ;;  %v1140_v33 = vld [vmem:[#allocation5 + $0xd0] sm:$0xf]  ;;  %v1259_v34 = vld [vmem:[#allocation5 + $0xd4] sm:$0xf0]  ;;  %v1153_v35 = vor.u32 %v1260_v30, %v1150_v31 }
  0x2d   : > { %v1342_v9 = vld [vmem:[%s479_s24] ss:$0 sm:$0xff]  ;;  %v1220_v36 = vld [vmem:[#allocation5 + $0x70] sm:$0xf]  ;;  %v1247_v37 = vld [vmem:[#allocation5 + $0x74] sm:$0xf0]  ;;  %v1141_v44 = vor.u32 %v1259_v34, %v1140_v33 }
  0x2e   : > { %s996_s17 = scalar_lea.vmem %s1743_s1, %s1668_s20  ;;  %s464_s16 = scalar_lea.vmem %s1742_s0, %s1668_s20  ;;  %v1246_v38 = vld [vmem:[#allocation5 + $0x74] sm:$0xf]  ;;  %v1142_v40 = vld [vmem:[#allocation5 + $0xd8] sm:$0xf0]  ;;  %v1221_v41 = vor.u32 %v1247_v37, %v1220_v36  ;;  %v1132_v58 = vld [vmem:[#allocation5 + $0xc0] sm:$0xf] }
  0x2f   : > { %v1094_v0 = vld [vmem:[%s996_s17 + $0x8] sm:$0xff]  ;;  %v481_v1 = vld [vmem:[%s464_s16] sm:$0xff]  ;;  %s1000_s28 = scalar_lea.vmem %s1744_s2, %s1668_s20  ;;  %v1258_v39 = vld [vmem:[#allocation5 + $0xd4] sm:$0xf]  ;;  %s914_s16 = scalar_lea.hbm %s1751_s9, %s1264_s29 }
  0x30   : > { %508 = vmatpush.bf16.xpose.msra.mxu0 %v1094_v0  ;;  %v492_v2 = vrot.slane %v1094_v0, 4  ;;  %v482_v3 = vunpack.c.l.bf16 %v481_v1  ;;  %v483_v4 = vunpack.c.h.bf16 %v481_v1  ;;  %v1095_v18 = vld [vmem:[%s1000_s28 + $0x10] sm:$0xff]  ;;  %v1222_v42 = vld [vmem:[#allocation5 + $0x78] sm:$0xf0]  ;;  %v1145_v45 = vor.u32 %v1258_v39, %v1142_v40  ;;  %v1257_v59 = vld [vmem:[#allocation5 + $0xc4] sm:$0xf0] }
  0x31   : > { %v496_v19 = vrot.slane %v1095_v18, 4  ;;  %v553_v21 = vsel %vm551_vm1, %v1095_v18, 0  ;;  %v1225_v43 = vor.u32 %v1246_v38, %v1222_v42  ;;  %v1256_v60 = vld [vmem:[#allocation5 + $0xc4] sm:$0xf]  ;;  %v1133_v61 = vor.u32 %v1257_v59, %v1132_v58  ;;  %v1134_v62 = vld [vmem:[#allocation5 + $0xc8] sm:$0xf0] }
  0x32   : > { %521 = vmatpush.bf16.xpose.msra.mxu1 %v492_v2  ;;  %v484_v5 = vmul.f32 0.088378906, %v482_v3  ;;  %v485_v6 = vmul.f32 0.088378906, %v483_v4  ;;  %562 = vmatpush.bf16.msra.mxu2 %v553_v21  ;;  %v1212_v63 = vld [vmem:[#allocation5 + $0x60] sm:$0xf]  ;;  %v1245_v0 = vld [vmem:[#allocation5 + $0x64] sm:$0xf0]  ;;  %v1137_v1 = vor.u32 %v1256_v60, %v1134_v62 }
  0x33   : > { %v572_v20 = vsel %vm551_vm1, %v496_v19, 0  ;;  %v1213_v2 = vor.u32 %v1245_v0, %v1212_v63  ;;  %v1244_v3 = vld [vmem:[#allocation5 + $0x64] sm:$0xf]  ;;  %v1214_v4 = vld [vmem:[#allocation5 + $0x68] sm:$0xf0]  ;;  %s455_s12 = scalar_lea.vmem [#allocation7], %s1088_s5 }
  0x34   : > { %v486_v7 = vpack.c.bf16 %v485_v6, %v484_v5  ;;  %581 = vmatpush.bf16.msra.mxu3 %v572_v20  ;;  %v1124_v5 = vld [vmem:[#allocation5 + $0xb0] sm:$0xf]  ;;  %v1217_v6 = vor.u32 %v1244_v3, %v1214_v4  ;;  %v1116_v18 = vld [vmem:[#allocation5 + $0xa0] sm:$0xf]  ;;  %v1253_v19 = vld [vmem:[#allocation5 + $0xa4] sm:$0xf0] }
  0x35   : > { %v1252_v20 = vld [vmem:[#allocation5 + $0xa4] sm:$0xf]  ;;  %v1117_v21 = vor.u32 %v1253_v19, %v1116_v18  ;;  %v1118_v22 = vld [vmem:[#allocation5 + $0xa8] sm:$0xf0]  ;;  %v1196_v23 = vld [vmem:[#allocation5 + $0x40] sm:$0xf] }
  0x36   : > { %v488_v8 = vrot.slane %v486_v7, 4  ;;  %706 = vmatpush.bf16.msrb.mxu2 %v1157_v25  ;;  %v1241_v24 = vld [vmem:[#allocation5 + $0x44] sm:$0xf0]  ;;  %v1121_v25 = vor.u32 %v1252_v20, %v1118_v22  ;;  %v1240_v27 = vld [vmem:[#allocation5 + $0x44] sm:$0xf]  ;;  %s916_s26 = sshll.u32 %s455_s12, 4  ;;  %s917_s26 = int_to_ptr.vmem [resolvable:$true] %s916_s26 }
  0x37   : > { %509 = vmatmul.bf16.vlgmr.msra.gmra.mxu0 %v486_v7  ;;  %v1255_v7 = vld [vmem:[#allocation5 + $0xb4] sm:$0xf0]  ;;  %v1197_v26 = vor.u32 %v1241_v24, %v1196_v23  ;;  %v1198_v28 = vld [vmem:[#allocation5 + $0x48] sm:$0xf0]  ;;  %v1110_v33 = vld [vmem:[#allocation5 + $0x98] sm:$0xf0] }
  0x38   : > { %719 = vmatpush.bf16.msrb.mxu3 %v1161_v29  ;;  %812 = vmatpush.bf16.msrb.mxu0 %v1221_v41  ;;  %v1108_v29 = vld [vmem:[#allocation5 + $0x90] sm:$0xf]  ;;  %v1201_v30 = vor.u32 %v1240_v27, %v1198_v28  ;;  %v1251_v31 = vld [vmem:[#allocation5 + $0x94] sm:$0xf0]  ;;  %v1238_v38 = vld [vmem:[#allocation5 + $0x34] sm:$0xf] }
  0x39   : > { %522 = vmatmul.bf16.vlgmr.msra.gmra.mxu1 %v488_v8  ;;  %v1254_v8 = vld [vmem:[#allocation5 + $0xb4] sm:$0xf]  ;;  %v1109_v34 = vor.u32 %v1251_v31, %v1108_v29  ;;  %v1188_v36 = vld [vmem:[#allocation5 + $0x30] sm:$0xf]  ;;  %v1239_v37 = vld [vmem:[#allocation5 + $0x34] sm:$0xf0] }
  0x3a   : > { %707 = vmatpush.bf16.msrb.mxu2 %v1149_v32  ;;  %825 = vmatpush.bf16.msrb.mxu1 %v1225_v43  ;;  %v1250_v32 = vld [vmem:[#allocation5 + $0x94] sm:$0xf]  ;;  %v1189_v39 = vor.u32 %v1239_v37, %v1188_v36  ;;  %v1190_v40 = vld [vmem:[#allocation5 + $0x38] sm:$0xf0]  ;;  %v1100_v42 = vld [vmem:[#allocation5 + $0x80] sm:$0xf] }
  0x3b   : > { %v1193_v41 = vor.u32 %v1238_v38, %v1190_v40  ;;  %v1249_v43 = vld [vmem:[#allocation5 + $0x84] sm:$0xf0]  ;;  %v1174_v58 = vld [vmem:[#allocation5 + $0x18] sm:$0xf0]  ;;  %v1164_v60 = vld [vmem:[#allocation5] sm:$0xf] }
  0x3c   : > { %720 = vmatpush.bf16.msrb.mxu3 %v1153_v35  ;;  %813 = vmatpush.bf16.msrb.mxu0 %v1213_v2  ;;  %v1113_v35 = vor.u32 %v1250_v32, %v1110_v33  ;;  %v1232_v62 = vld [vmem:[#allocation5 + $0x4] sm:$0xf]  ;;  %v1166_v0 = vld [vmem:[#allocation5 + $0x8] sm:$0xf0]  ;;  %s918_s30 = sshll.u32 %s914_s16, 4  ;;  %s901_s28 = scalar_lea.sflag [#allocation4], %s1650_s19  ;;  %s919_s30 = int_to_ptr.hbm [resolvable:$true] %s918_s30 }
  0x3d   : > { %v846_v23 = vld [vmem:[%s1656_s23] sm:$0xff]  ;;  %v847_v24 = vld [vmem:[%s1656_s23 + $0x8] sm:$0xff]  ;;  %s1429_s20 = sshra.s32 %s919_s30, 4  ;;  %s1435_s5 = scalar_lea.hbm %s1751_s9, 32  ;;  %s1430_s20 = int_to_ptr.hbm [resolvable:$true] %s1429_s20 }
  0x3e   : > { %708 = vmatpush.bf16.msrb.mxu2 %v1141_v44  ;;  %826 = vmatpush.bf16.msrb.mxu1 %v1217_v6  ;;  %v1248_v44 = vld [vmem:[#allocation5 + $0x84] sm:$0xf]  ;;  %s1431_s22 = scalar_lea.hbm %s1430_s20, 16  ;;  %p1436_p11 = scmp.lt.s32.totalorder %s1430_s20, %s1751_s9 }
  0x3f   : > { %p1432_p1 = scmp.ne.s32.totalorder %s1430_s20, %s1431_s22  ;;  %p1437_p12 = scmp.lt.s32.totalorder %s1435_s5, %s1431_s22 }
  0x40   : > { %721 = vmatpush.bf16.msrb.mxu3 %v1145_v45  ;;  %v1101_v45 = vor.u32 %v1249_v43, %v1100_v42 }
  0x41   : > { %p1433_p9 = pnand %p1432_p1, %p1628_p4  ;;  %p1438_p13 = por %p1437_p12, %p1436_p11 }
  0x42   : > { %709 = vmatpush.bf16.msrb.mxu2 %v1133_v61  ;;  %v1233_v61 = vld [vmem:[#allocation5 + $0x4] sm:$0xf0] }
  0x43   : > { %v1165_v63 = vor.u32 %v1233_v61, %v1164_v60  ;;  %p1434_p10 = pneg %p1433_p9 }
  0x44   : > { %722 = vmatpush.bf16.msrb.mxu3 %v1137_v1  ;;  %v1169_v1 = vor.u32 %v1232_v62, %v1166_v0 }
  0x45   : > { %p1439_p0 = pnand %p1438_p13, %p1434_p10 }
  0xb4   : > { %v510_v10 = vpop.f32.mrf.mxu0 }
  0xb5   : > { %v511_v14 = vadd.f32 %v1342_v9, %v510_v10  ;;  %v1125_v10 = vor.u32 %v1255_v7, %v1124_v5 }
  0xb6   : > { %v523_v11 = vpop.f32.mrf.mxu1 }
  0xb7   : > { %v524_v12 = vadd.f32 %v1342_v9, %v523_v11  ;;  %v528_v17 = vsel %vm527_vm0, %v511_v14, -inf  ;;  %v1126_v9 = vld [vmem:[#allocation5 + $0xb8] sm:$0xf0]  ;;  %710 = vmatpush.bf16.msrb.mxu2 %v1125_v10 }
  0xb8   : > { %v1129_v11 = vor.u32 %v1254_v8, %v1126_v9 }
  0xb9   : > { %v531_v13 = vsel %vm527_vm0, %v524_v12, -inf }
  0xba   : > { %532 = vmax.xlane.f32.xlu0 %v531_v13  ;;  %v1243_v13 = vld [vmem:[#allocation5 + $0x54] sm:$0xf0]  ;;  %723 = vmatpush.bf16.msrb.mxu3 %v1129_v11 }
  0xbb   : > { %711 = vmatpush.bf16.msrb.mxu2 %v1117_v21 }
  0xbc   : > { %v512_v15 = vpop.f32.mrf.mxu0 }
  0xbe   : > { %v525_v16 = vpop.f32.mrf.mxu1  ;;  %724 = vmatpush.bf16.msrb.mxu3 %v1121_v25 }
  0xbf   : > { %v1206_v16 = vld [vmem:[#allocation5 + $0x58] sm:$0xf0]  ;;  %712 = vmatpush.bf16.msrb.mxu2 %v1109_v34  ;;  %v1506_v34 = vmov 256.0  }
  0xc2   : > { %529 = vmax.xlane.f32.xlu0 %v528_v17  ;;  %725 = vmatpush.bf16.msrb.mxu3 %v1113_v35 }
  0xc3   : > { %713 = vmatpush.bf16.msrb.mxu2 %v1101_v45 }
 0x12d   : > { %v533_v46 = vpop.xlane.xlu0 %532 }
 0x12e   : > { %v535_v47 = vsub.f32 %v524_v12, %v533_v46  ;;  %v1204_v12 = vld [vmem:[#allocation5 + $0x50] sm:$0xf]  ;;  %v1102_v46 = vld [vmem:[#allocation5 + $0x88] sm:$0xf0] }
 0x12f   : > { %v1205_v15 = vor.u32 %v1243_v13, %v1204_v12 }
 0x130   : > { %v538_v48 = vmul.f32 1.442695, %v535_v47  ;;  %v1180_v47 = vld [vmem:[#allocation5 + $0x20] sm:$0xf] }
 0x131   : > { %814 = vmatpush.bf16.msrb.mxu0 %v1205_v15 }
 0x132   : > { %1343 = vpow2.f32 %v538_v48  ;;  %v1237_v48 = vld [vmem:[#allocation5 + $0x24] sm:$0xf0] }
 0x135   : > { %v530_v49 = vpop.xlane.xlu0 %529  ;;  %815 = vmatpush.bf16.msrb.mxu0 %v1197_v26 }
 0x136   : > { %v534_v50 = vsub.f32 %v511_v14, %v530_v49  ;;  %v1242_v14 = vld [vmem:[#allocation5 + $0x54] sm:$0xf]  ;;  %v1105_v49 = vor.u32 %v1248_v44, %v1102_v46 }
 0x137   : > { %v1209_v17 = vor.u32 %v1242_v14, %v1206_v16  ;;  %v838_v14 = vld [vmem:[%s1748_s6] sm:$0x3] }
 0x138   : > { %v1344_v51 = vpop.eup %1343  ;;  %v536_v52 = vmul.f32 1.442695, %v534_v50  ;;  %v1181_v50 = vor.u32 %v1237_v48, %v1180_v47  ;;  %726 = vmatpush.bf16.msrb.mxu3 %v1105_v49  ;;  %v841_v18 = vperm.slane %v838_v14, 1 }
 0x139   : > { %v543_v53 = vsel %vm527_vm0, %v1344_v51, 0.0  ;;  %v547_v54 = vpack.c.bf16 %v1344_v51, %v1344_v51  ;;  %827 = vmatpush.bf16.msrb.mxu1 %v1209_v17  ;;  %816 = vmatpush.bf16.msrb.mxu0 %v1189_v39  ;;  %v1236_v51 = vld [vmem:[#allocation5 + $0x24] sm:$0xf]  ;;  %v840_v17 = vperm.slane %v838_v14, 0 }
 0x13a   : > { %1345 = vpow2.f32 %v536_v52  ;;  %544 = vadd.xlane.f32.xlu1 %v543_v53  ;;  %v1182_v52 = vld [vmem:[#allocation5 + $0x28] sm:$0xf0] }
 0x13b   : > { %1097 = vmatmul.msk.bf16.vlgmr.msra.gmra.mxu3 %vm527_vm0, %v547_v54  ;;  %v1185_v53 = vor.u32 %v1236_v51, %v1182_v52  ;;  %v1172_v54 = vld [vmem:[#allocation5 + $0x10] sm:$0xf] }
 0x13d   : > { %828 = vmatpush.bf16.msrb.mxu1 %v1201_v30  ;;  %817 = vmatpush.bf16.msrb.mxu0 %v1181_v50 }
 0x140   : > { %v1346_v55 = vpop.eup %1345 }
 0x141   : > { %v540_v56 = vsel %vm527_vm0, %v1346_v55, 0.0  ;;  %v546_v57 = vpack.c.bf16 %v1346_v55, %v1346_v55  ;;  %829 = vmatpush.bf16.msrb.mxu1 %v1193_v41  ;;  %v1235_v55 = vld [vmem:[#allocation5 + $0x14] sm:$0xf0] }
 0x142   : > { %541 = vadd.xlane.f32.xlu1 %v540_v56  ;;  %v1234_v56 = vld [vmem:[#allocation5 + $0x14] sm:$0xf] }
 0x143   : > { %1096 = vmatmul.msk.bf16.vlgmr.msra.gmra.mxu2 %vm527_vm0, %v546_v57  ;;  %v1173_v57 = vor.u32 %v1235_v55, %v1172_v54  ;;  %v1177_v59 = vor.u32 %v1234_v56, %v1174_v58  ;;  %v850_v55 = vld [vmem:[%s1749_s7] sm:$0x3] }
 0x144   : > { %v851_v58 = vld [vmem:[%s1750_s8] sm:$0x3]  ;;  %v886_v60 = vperm.slane %v850_v55, 1 }
 0x145   : > { %830 = vmatpush.bf16.msrb.mxu1 %v1185_v53  ;;  %818 = vmatpush.bf16.msrb.mxu0 %v1173_v57  ;;  %v892_v0 = vperm.slane %v851_v58, 0 }
 0x149   : > { %831 = vmatpush.bf16.msrb.mxu1 %v1177_v59  ;;  %819 = vmatpush.bf16.msrb.mxu0 %v1165_v63  ;;  %v885_v59 = vperm.slane %v850_v55, 0 }
 0x14d   : > { %832 = vmatpush.bf16.msrb.mxu1 %v1169_v1  ;;  %v893_v1 = vperm.slane %v851_v58, 1 }
 0x1ad   : > { %v545_v2 = vpop.xlane.xlu1 %544 }
 0x1ae   : > { %1347 = vrcp.f32 %v545_v2 }
 0x1b4   : > { %v1348_v4 = vpop.eup %1347 }
 0x1b5   : > { %v542_v3 = vpop.xlane.xlu1 %541 }
 0x1b6   : > { %1349 = vrcp.f32 %v542_v3 }
 0x1b7   : > { %1351 = vrcp.f32 %v1506_v34 }
 0x1bc   : > { %v1350_v8 = vpop.eup %1349 }
 0x1bd   : > { %v1352_v35 = vpop.eup %1351 }
 0x1be   : > { %v583_v5 = vpop.f32.mrf.mxu3  ;;  %v856_v36 = vmul.f32 256.0, %v1352_v35  ;;  %vm860_vm2 = vweird.f32 %v1352_v35 }
 0x1bf   : > { %v590_v6 = vmul.f32 %v1348_v4, %v583_v5 }
 0x1c0   : > { %v857_v37 = vsub.f32 1.0, %v856_v36 }
 0x1c1   : > { %v608_v7 = vpack.c.bf16 %v590_v6, %v590_v6 }
 0x1c2   : > { %v858_v38 = vmul.f32 %v1352_v35, %v857_v37 }
 0x1c3   : > { %714 = vmatmul.bf16.vlgmr.msrb.gmra.mxu2 %v608_v7  ;;  %727 = vmatmul.bf16.vlgmr.msrb.gmra.mxu3 %v608_v7 }
 0x1c4   : > { %v859_v39 = vadd.f32 %v1352_v35, %v858_v38 }
 0x1c6   : > { %v564_v9 = vpop.f32.mrf.mxu2  ;;  %v585_v10 = vpop.f32.mrf.mxu3  ;;  %v861_v40 = vsel %vm860_vm2, %v1352_v35, %v859_v39 }
 0x1c7   : > { %v589_v11 = vmul.f32 %v1350_v8, %v564_v9 }
 0x1c9   : > { %v591_v12 = vpack.c.bf16 %v589_v11, %v589_v11 }
 0x1cb   : > { %820 = vmatmul.bf16.vlgmr.msrb.gmra.mxu0 %v591_v12  ;;  %833 = vmatmul.bf16.vlgmr.msrb.gmra.mxu1 %v591_v12 }
 0x1ce   : > { %v566_v13 = vpop.f32.mrf.mxu2 }
 0x246   : > { %v715_v15 = vpop.f32.mrf.mxu2  ;;  %v728_v16 = vpop.f32.mrf.mxu3 }
 0x248   : > { %v821_v19 = vpop.f32.mrf.mxu0  ;;  %v834_v20 = vpop.f32.mrf.mxu1 }
 0x249   : > { %v822_v21 = vadd.f32 %v821_v19, %v715_v15  ;;  %v835_v22 = vadd.f32 %v834_v20, %v728_v16 }
 0x24b   : > { %v844_v25 = vadd.f32 %v840_v17, %v822_v21  ;;  %v845_v26 = vadd.f32 %v841_v18, %v835_v22 }
 0x24d   : > { %v848_v27 = vadd.f32 %v846_v23, %v844_v25  ;;  %v849_v28 = vadd.f32 %v847_v24, %v845_v26 }
 0x24e   : > { %v717_v29 = vpop.f32.mrf.mxu2  ;;  %v730_v30 = vpop.f32.mrf.mxu3 }
 0x24f   : > { %v852_v31 = vadd.f32 %v849_v28, %v848_v27 }
 0x250   : > { %v823_v32 = vpop.f32.mrf.mxu0  ;;  %v836_v33 = vpop.f32.mrf.mxu1 }
 0x251   : > { %853 = vadd.xlane.f32.xlu2 %v852_v31 }
 0x2c4   : > { %v854_v41 = vpop.xlane.xlu2 %853 }
 0x2c5   : > { %v862_v42 = vmul.f32 %v861_v40, %v854_v41 }
 0x2c7   : > { %v863_v43 = vsub.f32 %v848_v27, %v862_v42  ;;  %v864_v44 = vsub.f32 %v849_v28, %v862_v42 }
 0x2c9   : > { %v865_v45 = vmul.f32 %v863_v43, %v863_v43  ;;  %v866_v46 = vmul.f32 %v864_v44, %v864_v44 }
 0x2cb   : > { %v867_v47 = vadd.f32 %v866_v46, %v865_v45 }
 0x2cd   : > { %868 = vadd.xlane.f32.xlu2 %v867_v47 }
 0x340   : > { %v869_v48 = vpop.xlane.xlu2 %868 }
 0x341   : > { %v870_v49 = vmul.f32 %v869_v48, %v861_v40 }
 0x343   : > { %v871_v50 = vadd.f32 1e-12, %v870_v49 }
 0x345   : > { %1353 = vrsqrt.f32 %v871_v50  ;;  %vm878_vm4 = vweird.f32 %v871_v50 }
 0x34b   : > { %v1354_v51 = vpop.eup %1353 }
 0x34c   : > { %v873_v52 = vmul.f32 %v1354_v51, %v871_v50  ;;  %vm879_vm3 = vweird.f32 %v1354_v51 }
 0x34d   : > { %vm880_vm5 = vmor %vm878_vm4, %vm879_vm3 }
 0x34e   : > { %v874_v53 = vmul.f32 %v1354_v51, %v873_v52 }
 0x350   : > { %v875_v54 = vmul.f32 0.5, %v874_v53 }
 0x352   : > { %v876_v56 = vsub.f32 1.5, %v875_v54 }
 0x354   : > { %v877_v57 = vmul.f32 %v1354_v51, %v876_v56 }
 0x356   : > { %v881_v61 = vsel %vm880_vm5, %v1354_v51, %v877_v57 }
 0x357   : > { %v882_v62 = vmul.f32 %v881_v61, %v863_v43  ;;  %v883_v63 = vmul.f32 %v881_v61, %v864_v44 }
 0x359   : > { %v889_v2 = vmul.f32 %v885_v59, %v882_v62  ;;  %v890_v3 = vmul.f32 %v886_v60, %v883_v63 }
 0x35b   : > { %v896_v4 = vadd.f32 %v892_v0, %v889_v2  ;;  %v897_v5 = vadd.f32 %v893_v1, %v890_v3 }
 0x35d   : > { %898 = vst [vmem:[%s455_s12] sm:$0xff] %v896_v4 }
 0x35e   : > { %899 = vst [vmem:[%s455_s12 + $0x8] sm:$0xff] %v897_v5 }
 0x35f   : > { %1442 = shalt.err (!%p1439_p0)
}
 0x360   : > { %1272 = dma.vmem_to_hbm [thread:$0]  (%p1628_p4), %s917_s26, 256, %s919_s30, %s901_s28  }
 0x361 PF: > { %s1765_s19 = sld [smem:[#allocation11_spill]]  ;;  %p1283_p2 = pnand %p1083_p6, %p1636_p7 }
 0x363   : > { %p1284_p5 = pneg %p1283_p2 }
 0x367   : > { %s930_s17 = sand.u32 1, %s1765_s19  }
 0x368   : > { %s931_s25 = scalar_lea.sflag [#allocation4], %s930_s17 }
 0x369   : > { %1476 = dma.done.wait (%p1284_p5), %s931_s25, 256  }
 0x36a   : > { %1478 = vsyncadd (%p1284_p5), %s931_s25, 4294967040  ;;  %s26_s14 = sadd.s32 1, %s1501_s14   ;;  %s1766_s27 = sld [smem:[#allocation13_spill]] }
 0x36b   : > { %p23_p8 = scmp.ge.s32.totalorder %s26_s14, 4   ;;  %s1767_s18 = sld [smem:[#allocation12_spill]] }
 0x36c   : > { %s1768_s30 = smov %s1485_s10  ;;  %s1769_s10 = smov %s1489_s11 }
 0x36d   : > { %s1771_s12 = smov %s1497_s13  ;;  %25 = sbr.rel (!%p23_p8) target bundleno = 9 (0x9), region = 118 }
 0x370   : > { %s1770_s11 = smov %s1766_s27 }
 0x371   : > { %s1772_s13 = smov %s1767_s18 }
 0x372   :  { %937 = vsyncpa [#allocation3], 1 }
 0x373   :  { %939 = vsyncpa [#allocation3 + $0x1], 1 }
 0x374   :  { %940 = vsyncpa [#allocation6], 1 }
 0x375   :  { %941 = vsyncpa [#allocation4], 1 }
 0x376   :  { %943 = vsyncpa [#allocation4 + $0x1], 1 }

// kernel: attention_forward.2
= control target key start
LH: loop header
LB: loop body
LE: loop exit
PB: predicated region body
PF: predicated region fallthrough
CT: control target
= control target key end

     0   :  { %8 = vsyncpa [#allocation3], 0  ;;  %s1946_s0 = inlined_call_operand.hbm [shape: f32[2,8,256], index: 0, kind: input, shape index: {}]   ;;  %s1947_s1 = inlined_call_operand.hbm [shape: bf16[256,768], index: 1, kind: input, shape index: {}]   ;;  %s1948_s2 = inlined_call_operand.vmem [shape: f32[1,768], index: 2, kind: input, shape index: {}]   ;;  %s1949_s3 = inlined_call_operand.vmem [shape: bf16[2,8,768], index: 3, kind: output, shape index: {}]  }
   0x1   :  { %10 = vsyncpa [#allocation3 + $0x1], 0 }
   0x2   :  { %11 = vsyncpa [#allocation5], 0  ;;  %s1801_s12 = smov 0   ;;  %s1803_s13 = smov 0  }
   0x3   :  { %s1805_s14 = smov 0   ;;  %s1807_s15 = smov 0  }
   0x4   :  { %s1809_s16 = smov 0   ;;  %s1811_s17 = smov 0  }
   0x5 LB: > { %s1098_s18 = sadd.s32 4294967295, %s1776_s17   ;;  %p1100_p0 = scmp.ge.s32.totalorder %s1776_s17, 1  ;;  %s1776_s17 = sphi %s1811_s17, %s17_s17   ;;  %s1772_s16 = sphi %s1809_s16, %s1958_s16   ;;  %s1768_s15 = sphi %s1807_s15, %s1957_s15   ;;  %s1764_s14 = sphi %s1805_s14, %s1956_s14   ;;  %s1760_s13 = sphi %s1803_s13, %s1955_s13   ;;  %s1756_s12 = sphi %s1801_s12, %s1954_s12  }
   0x6   : > { %p1833_p1 = scmp.eq.s32.totalorder %s1098_s18, 0  ;;  %p132_p2 = scmp.lt.s32.totalorder %s1776_s17, 3 }
   0x7   : > { %s143_s22 = sshll.u32 %s1947_s1, 4  ;;  %s1778_s24 = smov [#allocation4]   ;;  %s144_s22 = int_to_ptr.hbm [resolvable:$true] %s143_s22 }
   0x8   : > { %p1841_p3 = pnand %p1100_p0, %p132_p2  ;;  %s145_s25 = sshll.u32 %s1778_s24, 4  ;;  %s146_s25 = int_to_ptr.vmem [resolvable:$true] %s145_s25 }
   0x9   : > { %s1779_s26 = smov 384   ;;  %s1780_s27 = smov 24  }
   0xa   : > { %p1600_p4 = pneg %p1841_p3  ;;  %s29_s28 = sadd.s32 1, %s1772_s16 }
   0xb   : > { %p31_p6 = scmp.ge.s32.totalorder %s29_s28, 2  ;;  %p45_p7 = scmp.ne.s32.totalorder %s1764_s14, %s1760_s13 }
   0xc   : > { %p1601_p5 = pnand %p1600_p4, %p1833_p1  ;;  %p46_p8 = scmp.eq.s32.totalorder %s1776_s17, 0 }
   0xd   : > { %s1960_s28 = smov (%p31_p6, %s29_s28), 0  ;;  %s38_s29 = sadd.s32 1, %s1764_s14 }
   0xe   : > { %1603 = dma.hbm_to_vmem [thread:$0]  (!%p1601_p5), %s144_s22, 12288, %s146_s25, [#allocation5], %s1779_s26, %s1779_s26, %s1780_s27  }
   0xf   : > { %p51_p9 = scmp.ne.s32.totalorder %s1760_s13, %s1756_s12  ;;  %s33_s30 = ssub.s32 %s1772_s16, %s1960_s28 }
  0x10   : > { %p1860_p10 = por %p46_p8, %p45_p7  ;;  %p36_p11 = scmp.eq.s32.totalorder %s33_s30, 0 }
  0x11   : > { %p1866_p12 = por %p1833_p1, %p51_p9  ;;  %s162_s6 = sand.u32 1, %s1764_s14  }
  0x12   : > { %s1496_s7 = sshll.u32 %s1772_s16, 4  ;;  %p1609_p13 = scmp.lt.s32.totalorder %s1776_s17, 2 }
  0x13   : > { %s1873_s8 = scalar_select %p36_p11, %s1764_s14, %s38_s29  }
  0x14   : > { %s1103_s9 = sshll.u32 %s162_s6, 4  ;;  %s173_s12 = scalar_lea.hbm %s1946_s0, %s1496_s7 }
  0x15   : > { %s175_s18 = sshll.u32 %s173_s12, 4  ;;  %s166_s20 = scalar_lea.vmem [#allocation2], %s1103_s9  ;;  %s176_s18 = int_to_ptr.hbm [resolvable:$true] %s175_s18 }
  0x16   : > { %s177_s21 = sshll.u32 %s166_s20, 4  ;;  %p1605_p0 = pnand %p1609_p13, %p1860_p10  ;;  %s178_s21 = int_to_ptr.vmem [resolvable:$true] %s177_s21 }
  0x17   : > { %s163_s22 = scalar_lea.sflag [#allocation3], %s162_s6  ;;  %186 = sbr.rel (%p1841_p3) target bundleno = 272 (0x110), region = 32 }
  0x18   : > { %1607 = dma.hbm_to_vmem [thread:$0]  (!%p1605_p0), %s176_s18, 256, %s178_s21, %s163_s22  }
  0x19   : > { %s188_s24 = sand.u32 (!%p1841_p3), 1, %s1760_s13  }
  0x1a   : > { %s1884_s25 = sshll.u32 (!%p1841_p3), %s188_s24, 4  ;;  %s189_s26 = scalar_lea.sflag (!%p1841_p3), [#allocation3], %s188_s24 }
  0x1b   : > { %s192_s27 = scalar_lea.vmem (!%p1841_p3), [#allocation2], %s1884_s25 }
  0x1c   : > { %1747 = dma.done.wait (%p1866_p12), %s189_s26, 256  }
  0x1d   : > { %1749 = vsyncadd (%p1866_p12), %s189_s26, 4294967040 }
  0x1e   : > { %1751 = dma.done.wait (%p1833_p1), [#allocation5], 12288  }
  0x1f   : > { %1753 = vsyncadd (%p1833_p1), [#allocation5], 4294955008  ;;  %v1280_v0 = vld [vmem:[#allocation4 + $0x150] sm:$0xf]  ;;  %v1542_v1 = vld [vmem:[#allocation4 + $0x164] sm:$0xf0] }
  0x20   : > { %v1472_v2 = vld [vmem:[#allocation4 + $0x2d0] sm:$0xf]  ;;  %v1281_v3 = vor.u32 %v1542_v1, %v1280_v0  ;;  %v1590_v4 = vld [vmem:[#allocation4 + $0x2e4] sm:$0xf0]  ;;  %v1539_v5 = vld [vmem:[#allocation4 + $0x154] sm:$0xf] }
  0x21   : > { %v1282_v6 = vld [vmem:[#allocation4 + $0x168] sm:$0xf0]  ;;  %v1473_v7 = vor.u32 %v1590_v4, %v1472_v2  ;;  %v1587_v9 = vld [vmem:[#allocation4 + $0x2d4] sm:$0xf]  ;;  %v1256_v11 = vld [vmem:[#allocation4 + $0x120] sm:$0xf] }
  0x22   : > { %v1285_v8 = vor.u32 %v1539_v5, %v1282_v6  ;;  %v1474_v10 = vld [vmem:[#allocation4 + $0x2e8] sm:$0xf0]  ;;  %828 = vmatpush.bf16.msra.mxu0 %v1281_v3  ;;  %v1536_v13 = vld [vmem:[#allocation4 + $0x134] sm:$0xf0]  ;;  %v1448_v14 = vld [vmem:[#allocation4 + $0x2a0] sm:$0xf] }
  0x23   : > { %v1477_v12 = vor.u32 %v1587_v9, %v1474_v10  ;;  %v1584_v15 = vld [vmem:[#allocation4 + $0x2b4] sm:$0xf0]  ;;  %841 = vmatpush.bf16.msra.mxu1 %v1473_v7  ;;  %v1257_v16 = vor.u32 %v1536_v13, %v1256_v11  ;;  %v1533_v18 = vld [vmem:[#allocation4 + $0x124] sm:$0xf]  ;;  %v1258_v19 = vld [vmem:[#allocation4 + $0x138] sm:$0xf0] }
  0x24   : > { %854 = vmatpush.bf16.msra.mxu2 %v1285_v8  ;;  %v1449_v17 = vor.u32 %v1584_v15, %v1448_v14  ;;  %v1581_v20 = vld [vmem:[#allocation4 + $0x2a4] sm:$0xf]  ;;  %v1261_v21 = vor.u32 %v1533_v18, %v1258_v19  ;;  %v1450_v22 = vld [vmem:[#allocation4 + $0x2b8] sm:$0xf0]  ;;  %v1232_v23 = vld [vmem:[#allocation4 + $0xf0] sm:$0xf] }
  0x25   : > { %867 = vmatpush.bf16.msra.mxu3 %v1477_v12  ;;  %v1530_v24 = vld [vmem:[#allocation4 + $0x104] sm:$0xf0]  ;;  %v1453_v25 = vor.u32 %v1581_v20, %v1450_v22  ;;  %v1424_v26 = vld [vmem:[#allocation4 + $0x270] sm:$0xf]  ;;  %v1527_v28 = vld [vmem:[#allocation4 + $0xf4] sm:$0xf] }
  0x26   : > { %v1578_v27 = vld [vmem:[#allocation4 + $0x284] sm:$0xf0]  ;;  %829 = vmatpush.bf16.msra.mxu0 %v1257_v16  ;;  %v1233_v29 = vor.u32 %v1530_v24, %v1232_v23  ;;  %v1234_v30 = vld [vmem:[#allocation4 + $0x108] sm:$0xf0]  ;;  %v1575_v31 = vld [vmem:[#allocation4 + $0x274] sm:$0xf] }
  0x27   : > { %v1426_v32 = vld [vmem:[#allocation4 + $0x288] sm:$0xf0]  ;;  %842 = vmatpush.bf16.msra.mxu1 %v1449_v17  ;;  %v1425_v33 = vor.u32 %v1578_v27, %v1424_v26  ;;  %v1237_v34 = vor.u32 %v1527_v28, %v1234_v30  ;;  %v1208_v35 = vld [vmem:[#allocation4 + $0xc0] sm:$0xf]  ;;  %v1524_v36 = vld [vmem:[#allocation4 + $0xd4] sm:$0xf0] }
  0x28   : > { %855 = vmatpush.bf16.msra.mxu2 %v1261_v21  ;;  %v1400_v37 = vld [vmem:[#allocation4 + $0x240] sm:$0xf]  ;;  %v1429_v38 = vor.u32 %v1575_v31, %v1426_v32  ;;  %v1572_v39 = vld [vmem:[#allocation4 + $0x254] sm:$0xf0]  ;;  %v1521_v40 = vld [vmem:[#allocation4 + $0xc4] sm:$0xf]  ;;  %v1209_v44 = vor.u32 %v1524_v36, %v1208_v35 }
  0x29   : > { %868 = vmatpush.bf16.msra.mxu3 %v1453_v25  ;;  %v1210_v41 = vld [vmem:[#allocation4 + $0xd8] sm:$0xf0]  ;;  %v1569_v42 = vld [vmem:[#allocation4 + $0x244] sm:$0xf]  ;;  %v1401_v45 = vor.u32 %v1572_v39, %v1400_v37  ;;  %v1184_v47 = vld [vmem:[#allocation4 + $0x90] sm:$0xf] }
  0x2a   : > { %v1402_v43 = vld [vmem:[#allocation4 + $0x258] sm:$0xf0]  ;;  %830 = vmatpush.bf16.msra.mxu0 %v1233_v29  ;;  %v1213_v46 = vor.u32 %v1521_v40, %v1210_v41  ;;  %v1518_v48 = vld [vmem:[#allocation4 + $0xa4] sm:$0xf0]  ;;  %v1376_v49 = vld [vmem:[#allocation4 + $0x210] sm:$0xf] }
  0x2b   : > { %843 = vmatpush.bf16.msra.mxu1 %v1425_v33  ;;  %v1405_v50 = vor.u32 %v1569_v42, %v1402_v43  ;;  %v1566_v51 = vld [vmem:[#allocation4 + $0x224] sm:$0xf0]  ;;  %v1515_v52 = vld [vmem:[#allocation4 + $0x94] sm:$0xf]  ;;  %v1186_v53 = vld [vmem:[#allocation4 + $0xa8] sm:$0xf0]  ;;  %v1185_v56 = vor.u32 %v1518_v48, %v1184_v47 }
  0x2c   : > { %856 = vmatpush.bf16.msra.mxu2 %v1237_v34  ;;  %v1563_v54 = vld [vmem:[#allocation4 + $0x214] sm:$0xf]  ;;  %v1378_v55 = vld [vmem:[#allocation4 + $0x228] sm:$0xf0]  ;;  %v1377_v57 = vor.u32 %v1566_v51, %v1376_v49  ;;  %v1189_v58 = vor.u32 %v1515_v52, %v1186_v53  ;;  %v1160_v59 = vld [vmem:[#allocation4 + $0x60] sm:$0xf] }
  0x2d   : > { %869 = vmatpush.bf16.msra.mxu3 %v1429_v38  ;;  %v1512_v60 = vld [vmem:[#allocation4 + $0x74] sm:$0xf0]  ;;  %v1352_v61 = vld [vmem:[#allocation4 + $0x1e0] sm:$0xf]  ;;  %v1381_v62 = vor.u32 %v1563_v54, %v1378_v55  ;;  %v1509_v0 = vld [vmem:[#allocation4 + $0x64] sm:$0xf] }
  0x2e   : > { %831 = vmatpush.bf16.msra.mxu0 %v1209_v44  ;;  %v1560_v63 = vld [vmem:[#allocation4 + $0x1f4] sm:$0xf0]  ;;  %v1162_v1 = vld [vmem:[#allocation4 + $0x78] sm:$0xf0]  ;;  %v1557_v2 = vld [vmem:[#allocation4 + $0x1e4] sm:$0xf]  ;;  %v1161_v4 = vor.u32 %v1512_v60, %v1160_v59 }
  0x2f   : > { %844 = vmatpush.bf16.msra.mxu1 %v1401_v45  ;;  %v1354_v3 = vld [vmem:[#allocation4 + $0x1f8] sm:$0xf0]  ;;  %v1353_v5 = vor.u32 %v1560_v63, %v1352_v61  ;;  %v1165_v6 = vor.u32 %v1509_v0, %v1162_v1  ;;  %v1136_v7 = vld [vmem:[#allocation4 + $0x30] sm:$0xf]  ;;  %v1506_v8 = vld [vmem:[#allocation4 + $0x44] sm:$0xf0] }
  0x30   : > { %857 = vmatpush.bf16.msra.mxu2 %v1213_v46  ;;  %v1328_v9 = vld [vmem:[#allocation4 + $0x1b0] sm:$0xf]  ;;  %v1357_v10 = vor.u32 %v1557_v2, %v1354_v3  ;;  %v1554_v11 = vld [vmem:[#allocation4 + $0x1c4] sm:$0xf0]  ;;  %v1503_v12 = vld [vmem:[#allocation4 + $0x34] sm:$0xf]  ;;  %v1137_v16 = vor.u32 %v1506_v8, %v1136_v7 }
  0x31   : > { %870 = vmatpush.bf16.msra.mxu3 %v1405_v50  ;;  %v1138_v13 = vld [vmem:[#allocation4 + $0x48] sm:$0xf0]  ;;  %v1551_v14 = vld [vmem:[#allocation4 + $0x1b4] sm:$0xf]  ;;  %v1112_v17 = vld [vmem:[#allocation4] sm:$0xf]  ;;  %v1329_v19 = vor.u32 %v1554_v11, %v1328_v9 }
  0x32   : > { %832 = vmatpush.bf16.msra.mxu0 %v1185_v56  ;;  %v1330_v15 = vld [vmem:[#allocation4 + $0x1c8] sm:$0xf0]  ;;  %v1500_v18 = vld [vmem:[#allocation4 + $0x14] sm:$0xf0]  ;;  %v1141_v20 = vor.u32 %v1503_v12, %v1138_v13  ;;  %v1304_v21 = vld [vmem:[#allocation4 + $0x180] sm:$0xf] }
  0x33   : > { %845 = vmatpush.bf16.msra.mxu1 %v1377_v57  ;;  %v1548_v22 = vld [vmem:[#allocation4 + $0x194] sm:$0xf0]  ;;  %v1497_v23 = vld [vmem:[#allocation4 + $0x4] sm:$0xf]  ;;  %v1333_v24 = vor.u32 %v1551_v14, %v1330_v15  ;;  %v1114_v25 = vld [vmem:[#allocation4 + $0x18] sm:$0xf0]  ;;  %v1113_v31 = vor.u32 %v1500_v18, %v1112_v17 }
  0x34   : > { %858 = vmatpush.bf16.msra.mxu2 %v1189_v58  ;;  %v1545_v26 = vld [vmem:[#allocation4 + $0x184] sm:$0xf]  ;;  %v1306_v27 = vld [vmem:[#allocation4 + $0x198] sm:$0xf0]  ;;  %v1288_v28 = vld [vmem:[#allocation4 + $0x158] sm:$0xf]  ;;  %v1305_v35 = vor.u32 %v1548_v22, %v1304_v21  ;;  %v1117_v36 = vor.u32 %v1497_v23, %v1114_v25 }
  0x35   : > { %871 = vmatpush.bf16.msra.mxu3 %v1381_v62  ;;  %v1543_v29 = vld [vmem:[#allocation4 + $0x16c] sm:$0xf0]  ;;  %v1480_v30 = vld [vmem:[#allocation4 + $0x2d8] sm:$0xf]  ;;  %v1540_v33 = vld [vmem:[#allocation4 + $0x15c] sm:$0xf]  ;;  %v1309_v39 = vor.u32 %v1545_v26, %v1306_v27 }
  0x36   : > { %833 = vmatpush.bf16.msra.mxu0 %v1161_v4  ;;  %v1591_v32 = vld [vmem:[#allocation4 + $0x2ec] sm:$0xf0]  ;;  %v1290_v34 = vld [vmem:[#allocation4 + $0x170] sm:$0xf0]  ;;  %v1588_v37 = vld [vmem:[#allocation4 + $0x2dc] sm:$0xf]  ;;  %v1289_v40 = vor.u32 %v1543_v29, %v1288_v28 }
  0x37   : > { %846 = vmatpush.bf16.msra.mxu1 %v1353_v5  ;;  %v1482_v38 = vld [vmem:[#allocation4 + $0x2f0] sm:$0xf0]  ;;  %v1481_v41 = vor.u32 %v1591_v32, %v1480_v30  ;;  %v1293_v42 = vor.u32 %v1540_v33, %v1290_v34  ;;  %v1264_v43 = vld [vmem:[#allocation4 + $0x128] sm:$0xf]  ;;  %v1537_v44 = vld [vmem:[#allocation4 + $0x13c] sm:$0xf0] }
  0x38   : > { %859 = vmatpush.bf16.msra.mxu2 %v1165_v6  ;;  %v1456_v45 = vld [vmem:[#allocation4 + $0x2a8] sm:$0xf]  ;;  %v1485_v46 = vor.u32 %v1588_v37, %v1482_v38  ;;  %v1585_v47 = vld [vmem:[#allocation4 + $0x2bc] sm:$0xf0]  ;;  %v1534_v48 = vld [vmem:[#allocation4 + $0x12c] sm:$0xf]  ;;  %v1265_v52 = vor.u32 %v1537_v44, %v1264_v43 }
  0x39   : > { %872 = vmatpush.bf16.msra.mxu3 %v1357_v10  ;;  %v1266_v49 = vld [vmem:[#allocation4 + $0x140] sm:$0xf0]  ;;  %v1582_v50 = vld [vmem:[#allocation4 + $0x2ac] sm:$0xf]  ;;  %v1240_v53 = vld [vmem:[#allocation4 + $0xf8] sm:$0xf]  ;;  %v1457_v55 = vor.u32 %v1585_v47, %v1456_v45 }
  0x3a   : > { %834 = vmatpush.bf16.msra.mxu0 %v1137_v16  ;;  %v1458_v51 = vld [vmem:[#allocation4 + $0x2c0] sm:$0xf0]  ;;  %v1531_v54 = vld [vmem:[#allocation4 + $0x10c] sm:$0xf0]  ;;  %v1269_v56 = vor.u32 %v1534_v48, %v1266_v49  ;;  %v1432_v57 = vld [vmem:[#allocation4 + $0x278] sm:$0xf] }
  0x3b   : > { %847 = vmatpush.bf16.msra.mxu1 %v1329_v19  ;;  %v1579_v58 = vld [vmem:[#allocation4 + $0x28c] sm:$0xf0]  ;;  %v1461_v60 = vor.u32 %v1582_v50, %v1458_v51  ;;  %v1528_v61 = vld [vmem:[#allocation4 + $0xfc] sm:$0xf]  ;;  %v1242_v62 = vld [vmem:[#allocation4 + $0x110] sm:$0xf0]  ;;  %v1241_v4 = vor.u32 %v1531_v54, %v1240_v53 }
  0x3c   : > { %860 = vmatpush.bf16.msra.mxu2 %v1141_v20  ;;  %v234_v59 = vld [vmem:[%s192_s27] sm:$0xff]  ;;  %v235_v0 = vld [vmem:[%s192_s27 + $0x8] sm:$0xff]  ;;  %v1433_v5 = vor.u32 %v1579_v58, %v1432_v57  ;;  %v1245_v6 = vor.u32 %v1528_v61, %v1242_v62  ;;  %p225_p1 = scmp.lt.s32.totalorder %s1768_s15, 1 }
  0x3d   : > { %873 = vmatpush.bf16.msra.mxu3 %v1333_v24  ;;  %v1897_v63 = vpack.c.bf16 %v234_v59, %v234_v59  ;;  %v1576_v1 = vld [vmem:[#allocation4 + $0x27c] sm:$0xf]  ;;  %v1434_v2 = vld [vmem:[#allocation4 + $0x290] sm:$0xf0]  ;;  %v1901_v3 = vpack.c.bf16 %v235_v0, %v235_v0  ;;  %v1216_v7 = vld [vmem:[#allocation4 + $0xc8] sm:$0xf] }
  0x3e   : > { %835 = vmatpush.bf16.msra.mxu0 %v1113_v31  ;;  %v1525_v8 = vld [vmem:[#allocation4 + $0xdc] sm:$0xf0]  ;;  %v1408_v9 = vld [vmem:[#allocation4 + $0x248] sm:$0xf]  ;;  %v1437_v10 = vor.u32 %v1576_v1, %v1434_v2  ;;  %v1522_v12 = vld [vmem:[#allocation4 + $0xcc] sm:$0xf] }
  0x3f   : > { %848 = vmatpush.bf16.msra.mxu1 %v1305_v35  ;;  %v1573_v11 = vld [vmem:[#allocation4 + $0x25c] sm:$0xf0]  ;;  %v1218_v13 = vld [vmem:[#allocation4 + $0xe0] sm:$0xf0]  ;;  %v1570_v14 = vld [vmem:[#allocation4 + $0x24c] sm:$0xf]  ;;  %v1217_v16 = vor.u32 %v1525_v8, %v1216_v7 }
  0x40   : > { %861 = vmatpush.bf16.msra.mxu2 %v1117_v36  ;;  %v1410_v15 = vld [vmem:[#allocation4 + $0x260] sm:$0xf0]  ;;  %v1409_v17 = vor.u32 %v1573_v11, %v1408_v9  ;;  %v1221_v18 = vor.u32 %v1522_v12, %v1218_v13  ;;  %v1192_v19 = vld [vmem:[#allocation4 + $0x98] sm:$0xf]  ;;  %v1519_v20 = vld [vmem:[#allocation4 + $0xac] sm:$0xf0] }
  0x41   : > { %874 = vmatpush.bf16.msra.mxu3 %v1309_v39  ;;  %836 = vmatmul.bf16.vlgmr.msra.gmra.mxu0 %v1897_v63  ;;  %v1384_v21 = vld [vmem:[#allocation4 + $0x218] sm:$0xf]  ;;  %v1413_v22 = vor.u32 %v1570_v14, %v1410_v15  ;;  %v1567_v23 = vld [vmem:[#allocation4 + $0x22c] sm:$0xf0]  ;;  %v1516_v24 = vld [vmem:[#allocation4 + $0x9c] sm:$0xf]  ;;  %v1193_v28 = vor.u32 %v1519_v20, %v1192_v19 }
  0x42   : > { %880 = vmatpush.bf16.msrb.mxu0 %v1289_v40  ;;  %849 = vmatmul.bf16.vlgmr.msra.gmra.mxu1 %v1901_v3  ;;  %v1194_v25 = vld [vmem:[#allocation4 + $0xb0] sm:$0xf0]  ;;  %v1564_v26 = vld [vmem:[#allocation4 + $0x21c] sm:$0xf]  ;;  %v1385_v29 = vor.u32 %v1567_v23, %v1384_v21  ;;  %v1168_v31 = vld [vmem:[#allocation4 + $0x68] sm:$0xf] }
  0x43   : > { %893 = vmatpush.bf16.msrb.mxu1 %v1481_v41  ;;  %862 = vmatmul.bf16.vlgmr.msra.gmra.mxu2 %v1897_v63  ;;  %v1386_v27 = vld [vmem:[#allocation4 + $0x230] sm:$0xf0]  ;;  %v1197_v30 = vor.u32 %v1516_v24, %v1194_v25  ;;  %v1513_v32 = vld [vmem:[#allocation4 + $0x7c] sm:$0xf0]  ;;  %v1360_v33 = vld [vmem:[#allocation4 + $0x1e8] sm:$0xf] }
  0x44   : > { %906 = vmatpush.bf16.msrb.mxu2 %v1293_v42  ;;  %875 = vmatmul.bf16.vlgmr.msra.gmra.mxu3 %v1901_v3  ;;  %v1389_v34 = vor.u32 %v1564_v26, %v1386_v27  ;;  %v1561_v35 = vld [vmem:[#allocation4 + $0x1fc] sm:$0xf0]  ;;  %v1510_v36 = vld [vmem:[#allocation4 + $0x6c] sm:$0xf]  ;;  %v1170_v37 = vld [vmem:[#allocation4 + $0x80] sm:$0xf0]  ;;  %v1169_v40 = vor.u32 %v1513_v32, %v1168_v31 }
  0x45   : > { %919 = vmatpush.bf16.msrb.mxu3 %v1485_v46  ;;  %v1558_v38 = vld [vmem:[#allocation4 + $0x1ec] sm:$0xf]  ;;  %v1362_v39 = vld [vmem:[#allocation4 + $0x200] sm:$0xf0]  ;;  %v1361_v41 = vor.u32 %v1561_v35, %v1360_v33  ;;  %v1173_v42 = vor.u32 %v1510_v36, %v1170_v37  ;;  %v1144_v43 = vld [vmem:[#allocation4 + $0x38] sm:$0xf] }
  0x46   : > { %881 = vmatpush.bf16.msrb.mxu0 %v1265_v52  ;;  %v1507_v44 = vld [vmem:[#allocation4 + $0x4c] sm:$0xf0]  ;;  %v1336_v45 = vld [vmem:[#allocation4 + $0x1b8] sm:$0xf]  ;;  %v1365_v46 = vor.u32 %v1558_v38, %v1362_v39  ;;  %v1504_v48 = vld [vmem:[#allocation4 + $0x3c] sm:$0xf] }
  0x47   : > { %894 = vmatpush.bf16.msrb.mxu1 %v1457_v55  ;;  %v1555_v47 = vld [vmem:[#allocation4 + $0x1cc] sm:$0xf0]  ;;  %v1146_v49 = vld [vmem:[#allocation4 + $0x50] sm:$0xf0]  ;;  %v1552_v50 = vld [vmem:[#allocation4 + $0x1bc] sm:$0xf]  ;;  %v1145_v52 = vor.u32 %v1507_v44, %v1144_v43 }
  0x48   : > { %907 = vmatpush.bf16.msrb.mxu2 %v1269_v56  ;;  %v1338_v51 = vld [vmem:[#allocation4 + $0x1d0] sm:$0xf0]  ;;  %v1120_v53 = vld [vmem:[#allocation4 + $0x8] sm:$0xf]  ;;  %v1501_v54 = vld [vmem:[#allocation4 + $0x1c] sm:$0xf0]  ;;  %v1337_v55 = vor.u32 %v1555_v47, %v1336_v45  ;;  %v1149_v56 = vor.u32 %v1504_v48, %v1146_v49 }
  0x49   : > { %920 = vmatpush.bf16.msrb.mxu3 %v1461_v60  ;;  %v1312_v57 = vld [vmem:[#allocation4 + $0x188] sm:$0xf]  ;;  %v1549_v58 = vld [vmem:[#allocation4 + $0x19c] sm:$0xf0]  ;;  %v1498_v59 = vld [vmem:[#allocation4 + $0xc] sm:$0xf]  ;;  %v1341_v60 = vor.u32 %v1552_v50, %v1338_v51 }
  0x4a   : > { %882 = vmatpush.bf16.msrb.mxu0 %v1241_v4  ;;  %v1122_v61 = vld [vmem:[#allocation4 + $0x20] sm:$0xf0]  ;;  %v1546_v62 = vld [vmem:[#allocation4 + $0x18c] sm:$0xf]  ;;  %v1296_v1 = vld [vmem:[#allocation4 + $0x160] sm:$0xf]  ;;  %v1313_v9 = vor.u32 %v1549_v58, %v1312_v57 }
  0x4b   : > { %895 = vmatpush.bf16.msrb.mxu1 %v1433_v5  ;;  %v1314_v0 = vld [vmem:[#allocation4 + $0x1a0] sm:$0xf0]  ;;  %v1544_v2 = vld [vmem:[#allocation4 + $0x174] sm:$0xf0]  ;;  %v1488_v4 = vld [vmem:[#allocation4 + $0x2e0] sm:$0xf]  ;;  %v1121_v5 = vor.u32 %v1501_v54, %v1120_v53 }
  0x4c   : > { %908 = vmatpush.bf16.msrb.mxu2 %v1245_v6  ;;  %v1592_v6 = vld [vmem:[#allocation4 + $0x2f4] sm:$0xf0]  ;;  %v1541_v7 = vld [vmem:[#allocation4 + $0x164] sm:$0xf]  ;;  %v1298_v8 = vld [vmem:[#allocation4 + $0x178] sm:$0xf0]  ;;  %v1317_v13 = vor.u32 %v1546_v62, %v1314_v0  ;;  %v1297_v14 = vor.u32 %v1544_v2, %v1296_v1 }
  0x4d   : > { %921 = vmatpush.bf16.msrb.mxu3 %v1437_v10  ;;  %v1125_v10 = vor.u32 %v1498_v59, %v1122_v61  ;;  %v1589_v11 = vld [vmem:[#allocation4 + $0x2e4] sm:$0xf]  ;;  %v1490_v12 = vld [vmem:[#allocation4 + $0x2f8] sm:$0xf0]  ;;  %v1489_v15 = vor.u32 %v1592_v6, %v1488_v4  ;;  %v1464_v19 = vld [vmem:[#allocation4 + $0x2b0] sm:$0xf] }
  0x4e   : > { %883 = vmatpush.bf16.msrb.mxu0 %v1217_v16  ;;  %v1301_v16 = vor.u32 %v1541_v7, %v1298_v8  ;;  %v1493_v20 = vor.u32 %v1589_v11, %v1490_v12  ;;  %v1586_v21 = vld [vmem:[#allocation4 + $0x2c4] sm:$0xf0]  ;;  %v1274_v23 = vld [vmem:[#allocation4 + $0x148] sm:$0xf0]  ;;  %v1583_v24 = vld [vmem:[#allocation4 + $0x2b4] sm:$0xf] }
  0x4f   : > { %896 = vmatpush.bf16.msrb.mxu1 %v1409_v17  ;;  %v1272_v17 = vld [vmem:[#allocation4 + $0x130] sm:$0xf]  ;;  %v1466_v25 = vld [vmem:[#allocation4 + $0x2c8] sm:$0xf0]  ;;  %v1465_v27 = vor.u32 %v1586_v21, %v1464_v19  ;;  %v1440_v31 = vld [vmem:[#allocation4 + $0x280] sm:$0xf] }
  0x50   : > { %909 = vmatpush.bf16.msrb.mxu2 %v1221_v18  ;;  %v1538_v18 = vld [vmem:[#allocation4 + $0x144] sm:$0xf0]  ;;  %v1469_v32 = vor.u32 %v1583_v24, %v1466_v25  ;;  %v1580_v33 = vld [vmem:[#allocation4 + $0x294] sm:$0xf0]  ;;  %v1250_v35 = vld [vmem:[#allocation4 + $0x118] sm:$0xf0] }
  0x51   : > { %922 = vmatpush.bf16.msrb.mxu3 %v1413_v22  ;;  %v1535_v22 = vld [vmem:[#allocation4 + $0x134] sm:$0xf]  ;;  %v1273_v26 = vor.u32 %v1538_v18, %v1272_v17  ;;  %v1577_v36 = vld [vmem:[#allocation4 + $0x284] sm:$0xf]  ;;  %v1442_v37 = vld [vmem:[#allocation4 + $0x298] sm:$0xf0]  ;;  %v1441_v39 = vor.u32 %v1580_v33, %v1440_v31 }
  0x52   : > { %884 = vmatpush.bf16.msrb.mxu0 %v1193_v28  ;;  %v1277_v28 = vor.u32 %v1535_v22, %v1274_v23  ;;  %v1416_v43 = vld [vmem:[#allocation4 + $0x250] sm:$0xf]  ;;  %v1445_v44 = vor.u32 %v1577_v36, %v1442_v37  ;;  %v1574_v45 = vld [vmem:[#allocation4 + $0x264] sm:$0xf0]  ;;  %v1226_v47 = vld [vmem:[#allocation4 + $0xe8] sm:$0xf0] }
  0x53   : > { %897 = vmatpush.bf16.msrb.mxu1 %v1385_v29  ;;  %v1248_v29 = vld [vmem:[#allocation4 + $0x100] sm:$0xf]  ;;  %v1571_v48 = vld [vmem:[#allocation4 + $0x254] sm:$0xf]  ;;  %v1418_v49 = vld [vmem:[#allocation4 + $0x268] sm:$0xf0]  ;;  %v1417_v51 = vor.u32 %v1574_v45, %v1416_v43 }
  0x54   : > { %910 = vmatpush.bf16.msrb.mxu2 %v1197_v30  ;;  %v1532_v30 = vld [vmem:[#allocation4 + $0x114] sm:$0xf0]  ;;  %v1200_v53 = vld [vmem:[#allocation4 + $0xa0] sm:$0xf]  ;;  %v1517_v58 = vld [vmem:[#allocation4 + $0xa4] sm:$0xf] }
  0x55   : > { %923 = vmatpush.bf16.msrb.mxu3 %v1389_v34  ;;  %v1529_v34 = vld [vmem:[#allocation4 + $0x104] sm:$0xf]  ;;  %v1249_v38 = vor.u32 %v1532_v30, %v1248_v29  ;;  %v1520_v54 = vld [vmem:[#allocation4 + $0xb4] sm:$0xf0]  ;;  %v1202_v59 = vld [vmem:[#allocation4 + $0xb8] sm:$0xf0] }
  0x56   : > { %885 = vmatpush.bf16.msrb.mxu0 %v1169_v40  ;;  %v1253_v40 = vor.u32 %v1529_v34, %v1250_v35  ;;  %v1568_v57 = vld [vmem:[#allocation4 + $0x234] sm:$0xf0]  ;;  %v1394_v61 = vld [vmem:[#allocation4 + $0x238] sm:$0xf0]  ;;  %v1201_v62 = vor.u32 %v1520_v54, %v1200_v53  ;;  %v1205_v1 = vor.u32 %v1517_v58, %v1202_v59  ;;  %v1176_v2 = vld [vmem:[#allocation4 + $0x70] sm:$0xf] }
  0x57   : > { %898 = vmatpush.bf16.msrb.mxu1 %v1361_v41  ;;  %v1224_v41 = vld [vmem:[#allocation4 + $0xd0] sm:$0xf]  ;;  %v1514_v4 = vld [vmem:[#allocation4 + $0x84] sm:$0xf0]  ;;  %v1511_v8 = vld [vmem:[#allocation4 + $0x74] sm:$0xf] }
  0x58   : > { %911 = vmatpush.bf16.msrb.mxu2 %v1173_v42  ;;  %v1526_v42 = vld [vmem:[#allocation4 + $0xe4] sm:$0xf0]  ;;  %v1370_v11 = vld [vmem:[#allocation4 + $0x208] sm:$0xf0]  ;;  %v1177_v12 = vor.u32 %v1514_v4, %v1176_v2  ;;  %v1344_v17 = vld [vmem:[#allocation4 + $0x1c0] sm:$0xf] }
  0x59   : > { %924 = vmatpush.bf16.msrb.mxu3 %v1365_v46  ;;  %v1523_v46 = vld [vmem:[#allocation4 + $0xd4] sm:$0xf]  ;;  %v1225_v50 = vor.u32 %v1526_v42, %v1224_v41  ;;  %v1562_v7 = vld [vmem:[#allocation4 + $0x204] sm:$0xf0]  ;;  %v1556_v19 = vld [vmem:[#allocation4 + $0x1d4] sm:$0xf0] }
  0x5a   : > { %886 = vmatpush.bf16.msrb.mxu0 %v1145_v52  ;;  %v1229_v52 = vor.u32 %v1523_v46, %v1226_v47  ;;  %v1154_v21 = vld [vmem:[#allocation4 + $0x58] sm:$0xf0]  ;;  %v1553_v22 = vld [vmem:[#allocation4 + $0x1c4] sm:$0xf]  ;;  %v1345_v25 = vor.u32 %v1556_v19, %v1344_v17  ;;  %v1320_v29 = vld [vmem:[#allocation4 + $0x190] sm:$0xf] }
  0x5b   : > { %899 = vmatpush.bf16.msrb.mxu1 %v1337_v55  ;;  %v1392_v55 = vld [vmem:[#allocation4 + $0x220] sm:$0xf]  ;;  %v1346_v23 = vld [vmem:[#allocation4 + $0x1d8] sm:$0xf0]  ;;  %v1550_v31 = vld [vmem:[#allocation4 + $0x1a4] sm:$0xf0] }
  0x5c   : > { %912 = vmatpush.bf16.msrb.mxu2 %v1149_v56  ;;  %v1421_v56 = vor.u32 %v1571_v48, %v1418_v49  ;;  %v1393_v0 = vor.u32 %v1568_v57, %v1392_v55  ;;  %v1349_v30 = vor.u32 %v1553_v22, %v1346_v23  ;;  %v1130_v33 = vld [vmem:[#allocation4 + $0x28] sm:$0xf0]  ;;  %v1547_v34 = vld [vmem:[#allocation4 + $0x194] sm:$0xf]  ;;  %v1321_v37 = vor.u32 %v1550_v31, %v1320_v29  ;;  %s1962_s15 = smov (!%p225_p1, %s1768_s15), 1 }
  0x5d   : > { %925 = vmatpush.bf16.msrb.mxu3 %v1341_v60  ;;  %v1565_v60 = vld [vmem:[#allocation4 + $0x224] sm:$0xf]  ;;  %v1322_v35 = vld [vmem:[#allocation4 + $0x1a8] sm:$0xf0]  ;;  %s1593_s29 = smul.u32 24, %s1962_s15 }
  0x5e   : > { %887 = vmatpush.bf16.msrb.mxu0 %v1121_v5  ;;  %v1368_v5 = vld [vmem:[#allocation4 + $0x1f0] sm:$0xf]  ;;  %v1397_v6 = vor.u32 %v1565_v60, %v1394_v61 }
  0x5f   : > { %900 = vmatpush.bf16.msrb.mxu1 %v1313_v9  ;;  %v1178_v9 = vld [vmem:[#allocation4 + $0x88] sm:$0xf0]  ;;  %s1923_s5 = scalar_lea.vmem %s1949_s3, %s1593_s29 }
  0x60   : > { %913 = vmatpush.bf16.msrb.mxu2 %v1125_v10  ;;  %v1559_v10 = vld [vmem:[#allocation4 + $0x1f4] sm:$0xf] }
  0x61   : > { %926 = vmatpush.bf16.msrb.mxu3 %v1317_v13  ;;  %888 = vmatmul.bf16.vlgmr.msrb.gmra.mxu0 %v1897_v63  ;;  %v1369_v13 = vor.u32 %v1562_v7, %v1368_v5  ;;  %v1373_v18 = vor.u32 %v1559_v10, %v1370_v11 }
  0x62   : > { %932 = vmatpush.bf16.msra.mxu0 %v1297_v14  ;;  %901 = vmatmul.bf16.vlgmr.msrb.gmra.mxu1 %v1901_v3  ;;  %v1181_v14 = vor.u32 %v1511_v8, %v1178_v9 }
  0x63   : > { %945 = vmatpush.bf16.msra.mxu1 %v1489_v15  ;;  %914 = vmatmul.bf16.vlgmr.msrb.gmra.mxu2 %v1897_v63  ;;  %v1152_v15 = vld [vmem:[#allocation4 + $0x40] sm:$0xf] }
  0x64   : > { %958 = vmatpush.bf16.msra.mxu2 %v1301_v16  ;;  %927 = vmatmul.bf16.vlgmr.msrb.gmra.mxu3 %v1901_v3  ;;  %v1508_v16 = vld [vmem:[#allocation4 + $0x54] sm:$0xf0] }
  0x65   : > { %971 = vmatpush.bf16.msra.mxu3 %v1493_v20  ;;  %v1505_v20 = vld [vmem:[#allocation4 + $0x44] sm:$0xf]  ;;  %v1153_v24 = vor.u32 %v1508_v16, %v1152_v15 }
  0x66   : > { %933 = vmatpush.bf16.msra.mxu0 %v1273_v26  ;;  %v1157_v26 = vor.u32 %v1505_v20, %v1154_v21 }
  0x67   : > { %946 = vmatpush.bf16.msra.mxu1 %v1465_v27  ;;  %v1128_v27 = vld [vmem:[#allocation4 + $0x10] sm:$0xf] }
  0x68   : > { %959 = vmatpush.bf16.msra.mxu2 %v1277_v28  ;;  %v1502_v28 = vld [vmem:[#allocation4 + $0x24] sm:$0xf0] }
  0x69   : > { %972 = vmatpush.bf16.msra.mxu3 %v1469_v32  ;;  %v1499_v32 = vld [vmem:[#allocation4 + $0x14] sm:$0xf]  ;;  %v1129_v36 = vor.u32 %v1502_v28, %v1128_v27 }
  0x6a   : > { %934 = vmatpush.bf16.msra.mxu0 %v1249_v38  ;;  %v1133_v38 = vor.u32 %v1499_v32, %v1130_v33 }
  0x6b   : > { %947 = vmatpush.bf16.msra.mxu1 %v1441_v39  ;;  %v1325_v39 = vor.u32 %v1547_v34, %v1322_v35 }
  0x6c   : > { %960 = vmatpush.bf16.msra.mxu2 %v1253_v40  ;;  %v334_v40 = vld [vmem:[%s1948_s2] sm:$0x3f] }
  0x6d   : > { %973 = vmatpush.bf16.msra.mxu3 %v1445_v44  ;;  %v336_v41 = vperm.slane %v334_v40, 0  ;;  %v337_v44 = vperm.slane %v334_v40, 1  ;;  %v338_v54 = vperm.slane %v334_v40, 2  ;;  %v339_v58 = vperm.slane %v334_v40, 3 }
  0x6e   : > { %935 = vmatpush.bf16.msra.mxu0 %v1225_v50  ;;  %v340_v9 = vperm.slane %v334_v40, 4  ;;  %v341_v10 = vperm.slane %v334_v40, 5 }
  0x6f   : > { %948 = vmatpush.bf16.msra.mxu1 %v1417_v51 }
  0x70   : > { %961 = vmatpush.bf16.msra.mxu2 %v1229_v52 }
  0x71   : > { %974 = vmatpush.bf16.msra.mxu3 %v1421_v56 }
  0x72   : > { %936 = vmatpush.bf16.msra.mxu0 %v1201_v62 }
  0x73   : > { %949 = vmatpush.bf16.msra.mxu1 %v1393_v0 }
  0x74   : > { %962 = vmatpush.bf16.msra.mxu2 %v1205_v1 }
  0x75   : > { %975 = vmatpush.bf16.msra.mxu3 %v1397_v6 }
  0x76   : > { %937 = vmatpush.bf16.msra.mxu0 %v1177_v12 }
  0x77   : > { %950 = vmatpush.bf16.msra.mxu1 %v1369_v13 }
  0x78   : > { %963 = vmatpush.bf16.msra.mxu2 %v1181_v14 }
  0x79   : > { %976 = vmatpush.bf16.msra.mxu3 %v1373_v18 }
  0x7a   : > { %938 = vmatpush.bf16.msra.mxu0 %v1153_v24 }
  0x7b   : > { %951 = vmatpush.bf16.msra.mxu1 %v1345_v25 }
  0x7c   : > { %964 = vmatpush.bf16.msra.mxu2 %v1157_v26 }
  0x7d   : > { %977 = vmatpush.bf16.msra.mxu3 %v1349_v30 }
  0x7e   : > { %939 = vmatpush.bf16.msra.mxu0 %v1129_v36 }
  0x7f   : > { %952 = vmatpush.bf16.msra.mxu1 %v1321_v37 }
  0x80   : > { %965 = vmatpush.bf16.msra.mxu2 %v1133_v38 }
  0x81   : > { %978 = vmatpush.bf16.msra.mxu3 %v1325_v39  ;;  %940 = vmatmul.bf16.vlgmr.msra.gmra.mxu0 %v1897_v63 }
  0x82   : > { %953 = vmatmul.bf16.vlgmr.msra.gmra.mxu1 %v1901_v3 }
  0x83   : > { %966 = vmatmul.bf16.vlgmr.msra.gmra.mxu2 %v1897_v63 }
  0x84   : > { %979 = vmatmul.bf16.vlgmr.msra.gmra.mxu3 %v1901_v3 }
  0xbe   : > { %v837_v42 = vpop.f32.mrf.mxu0 }
  0xbf   : > { %v850_v43 = vpop.f32.mrf.mxu1  ;;  %v838_v45 = vadd.f32 %v837_v42, %v336_v41 }
  0xc1   : > { %v851_v48 = vadd.f32 %v850_v43, %v838_v45 }
  0xc6   : > { %v863_v46 = vpop.f32.mrf.mxu2  ;;  %v839_v63 = vpop.f32.mrf.mxu0 }
  0xc7   : > { %v864_v47 = vadd.f32 %v863_v46, %v337_v44  ;;  %v876_v49 = vpop.f32.mrf.mxu3  ;;  %v852_v3 = vpop.f32.mrf.mxu1 }
  0xc9   : > { %v877_v50 = vadd.f32 %v876_v49, %v864_v47 }
  0xcb   : > { %v984_v51 = vpack.c.bf16 %v877_v50, %v851_v48 }
  0xcd   : > { %987 = vst [vmem:[%s1923_s5] sm:$0xff] %v984_v51 }
  0xce   : > { %v865_v52 = vpop.f32.mrf.mxu2 }
  0xcf   : > { %v878_v53 = vpop.f32.mrf.mxu3 }
  0xde   : > { %v889_v55 = vpop.f32.mrf.mxu0 }
  0xdf   : > { %v902_v56 = vpop.f32.mrf.mxu1  ;;  %v890_v57 = vadd.f32 %v889_v55, %v338_v54 }
  0xe1   : > { %v903_v60 = vadd.f32 %v902_v56, %v890_v57 }
  0xe6   : > { %v915_v59 = vpop.f32.mrf.mxu2  ;;  %v891_v1 = vpop.f32.mrf.mxu0 }
  0xe7   : > { %v916_v61 = vadd.f32 %v915_v59, %v339_v58  ;;  %v928_v62 = vpop.f32.mrf.mxu3  ;;  %v904_v2 = vpop.f32.mrf.mxu1 }
  0xe9   : > { %v929_v0 = vadd.f32 %v928_v62, %v916_v61 }
  0xeb   : > { %v985_v4 = vpack.c.bf16 %v929_v0, %v903_v60 }
  0xed   : > { %988 = vst [vmem:[%s1923_s5 + $0x8] sm:$0xff] %v985_v4 }
  0xee   : > { %v917_v5 = vpop.f32.mrf.mxu2 }
  0xef   : > { %v930_v6 = vpop.f32.mrf.mxu3 }
  0xfe   : > { %v941_v7 = vpop.f32.mrf.mxu0 }
  0xff   : > { %v954_v8 = vpop.f32.mrf.mxu1  ;;  %v942_v11 = vadd.f32 %v941_v7, %v340_v9 }
 0x101   : > { %v955_v17 = vadd.f32 %v954_v8, %v942_v11 }
 0x106   : > { %v967_v12 = vpop.f32.mrf.mxu2  ;;  %v943_v15 = vpop.f32.mrf.mxu0 }
 0x107   : > { %v968_v13 = vadd.f32 %v967_v12, %v341_v10  ;;  %v980_v14 = vpop.f32.mrf.mxu3  ;;  %v956_v16 = vpop.f32.mrf.mxu1 }
 0x109   : > { %v981_v18 = vadd.f32 %v980_v14, %v968_v13 }
 0x10b   : > { %v986_v19 = vpack.c.bf16 %v981_v18, %v955_v17 }
 0x10d   : > { %989 = vst [vmem:[%s1923_s5 + $0x10] sm:$0xff] %v986_v19 }
 0x10e   : > { %v969_v20 = vpop.f32.mrf.mxu2 }
 0x10f   : > { %v982_v21 = vpop.f32.mrf.mxu3 }
 0x110 PF: > { %s17_s17 = sadd.s32 1, %s1776_s17   ;;  %s1954_s12 = smov %s1760_s13 }
 0x111   : > { %p14_p2 = scmp.ge.s32.totalorder %s17_s17, 4   ;;  %s1955_s13 = smov %s1764_s14 }
 0x112   : > { %s1956_s14 = smov %s1873_s8  ;;  %s1957_s15 = smov %s1772_s16 }
 0x113   : > { %s1958_s16 = smov %s1960_s28  ;;  %16 = sbr.rel (!%p14_p2) target bundleno = 5 (0x5), region = 76 }
 0x118   :  { %1019 = vsyncpa [#allocation3], 1 }
 0x119   :  { %1021 = vsyncpa [#allocation3 + $0x1], 1 }
 0x11a   :  { %1022 = vsyncpa [#allocation5], 1 }

// kernel: attention_forward.3
= control target key start
LH: loop header
LB: loop body
LE: loop exit
PB: predicated region body
PF: predicated region fallthrough
CT: control target
= control target key end

     0   :  { %s1742_s0 = inlined_call_operand.vmem [shape: bf16[2,8,768], index: 0, kind: input, shape index: {}, may-alias: {0,1,2}]   ;;  %s1743_s1 = inlined_call_operand.vmem [shape: bf16[2,8,768], index: 1, kind: input, shape index: {}, may-alias: {0,1,2}]   ;;  %s1744_s2 = inlined_call_operand.vmem [shape: bf16[2,8,768], index: 2, kind: input, shape index: {}, may-alias: {0,1,2}]   ;;  %s1745_s3 = inlined_call_operand.vmem [shape: f32[2,1,8], index: 3, kind: input, shape index: {}]   ;;  %s1746_s4 = inlined_call_operand.hbm [shape: f32[2,8,256], index: 4, kind: input, shape index: {}]   ;;  %s1747_s5 = inlined_call_operand.hbm [shape: bf16[2,128,256], index: 5, kind: input, shape index: {}]   ;;  %s1748_s6 = inlined_call_operand.vmem [shape: f32[1,256], index: 6, kind: input, shape index: {}]   ;;  %s1749_s7 = inlined_call_operand.vmem [shape: f32[1,256], index: 7, kind: input, shape index: {}]   ;;  %s1750_s8 = inlined_call_operand.vmem [shape: f32[1,256], index: 8, kind: input, shape index: {}]   ;;  %s1751_s9 = inlined_call_operand.hbm [shape: f32[2,8,256], index: 9, kind: output, shape index: {}]  }
   0x1   :  { %1754 = sst [smem:[#allocation14_spill]] %s1747_s5 }
   0x2   :  { %14 = vsyncpa [#allocation3], 0 }
   0x3   :  { %16 = vsyncpa [#allocation3 + $0x1], 0 }
   0x4   :  { %17 = vsyncpa [#allocation6], 0 }
   0x5   :  { %18 = vsyncpa [#allocation4], 0 }
   0x6   :  { %20 = vsyncpa [#allocation4 + $0x1], 0  ;;  %s1557_s30 = smov 0   ;;  %s1559_s10 = smov 0  }
   0x7   :  { %s1561_s11 = smov 0   ;;  %s1563_s12 = smov 0  }
   0x8   :  { %s1565_s13 = smov 0   ;;  %s1567_s14 = smov 0  }
   0x9 LB: > { %1755 = sst [smem:[#allocation11_spill]] %s1481_s30  ;;  %s1079_s15 = sadd.s32 4294967295, %s1501_s14   ;;  %s1501_s14 = sphi %s1567_s14, %s26_s14   ;;  %s1497_s13 = sphi %s1565_s13, %s1772_s13   ;;  %s1493_s12 = sphi %s1563_s12, %s1771_s12   ;;  %s1489_s11 = sphi %s1561_s11, %s1770_s11   ;;  %s1485_s10 = sphi %s1559_s10, %s1769_s10   ;;  %s1481_s30 = sphi %s1557_s30, %s1768_s30  }
   0xa   : > { %p1081_p0 = scmp.ge.s32.totalorder %s1501_s14, 1  ;;  %p1589_p1 = scmp.eq.s32.totalorder %s1079_s15, 0 }
   0xb   : > { %p289_p2 = scmp.lt.s32.totalorder %s1501_s14, 3  ;;  %s1757_s5 = sld [smem:[#allocation14_spill]] }
   0xc   : > { %s1503_s21 = smov [#allocation5]   ;;  %p1083_p6 = scmp.ge.s32.totalorder %s1501_s14, 2 }
   0xd   : > { %p1597_p3 = pnand %p1081_p0, %p289_p2  ;;  %s302_s22 = sshll.u32 %s1503_s21, 4  ;;  %s303_s22 = int_to_ptr.vmem [resolvable:$true] %s302_s22 }
   0xe   : > { %s1504_s23 = smov 128   ;;  %s1505_s24 = smov 8  }
   0xf   : > { %p1274_p4 = pneg %p1597_p3  ;;  %s1080_s25 = sadd.s32 4294967294, %s1501_s14  }
  0x10   : > { %s38_s26 = sadd.s32 1, %s1497_s13  ;;  %s153_s27 = sadd.s32 1, %s1489_s11 }
  0x11   : > { %s300_s19 = sshll.u32 %s1757_s5, 4  ;;  %p1275_p5 = pnand %p1274_p4, %p1589_p1  ;;  %s301_s19 = int_to_ptr.hbm [resolvable:$true] %s300_s19 }
  0x12   : > { %p40_p7 = scmp.ge.s32.totalorder %s38_s26, 2  ;;  %p160_p8 = scmp.ne.s32.totalorder %s1489_s11, %s1485_s10 }
  0x13   : > { %1277 = dma.hbm_to_vmem [thread:$0]  (!%p1275_p5), %s301_s19, 4096, %s303_s22, [#allocation6], %s1504_s23, %s1504_s23, %s1505_s24  }
  0x14   : > { %p161_p9 = scmp.eq.s32.totalorder %s1501_s14, 0  ;;  %p166_p10 = scmp.ne.s32.totalorder %s1485_s10, %s1481_s30 }
  0x15   : > { %s1774_s26 = smov (%p40_p7, %s38_s26), 0  ;;  %p276_p13 = scmp.eq.s32.totalorder %s1079_s15, 1 }
  0x16   : > { %1759 = sst [smem:[#allocation12_spill]] %s1774_s26  ;;  %p1616_p11 = por %p161_p9, %p160_p8 }
  0x17   : > { %p1622_p12 = por %p1589_p1, %p166_p10  ;;  %s148_s17 = ssub.s32 %s1497_s13, %s1774_s26 }
  0x18   : > { %p151_p0 = scmp.eq.s32.totalorder %s148_s17, 0  ;;  %p282_p2 = scmp.eq.s32.totalorder %s1080_s25, 1 }
  0x19   : > { %p1628_p4 = por %p276_p13, %p160_p8  ;;  %p1287_p5 = scmp.lt.s32.totalorder %s1501_s14, 2 }
  0x1a   : > { %s1634_s19 = scalar_select %p151_p0, %s1489_s11, %s153_s27  }
  0x1b   : > { %p1636_p7 = por %p282_p2, %p166_p10  ;;  %s361_s22 = sand.u32 1, %s1489_s11  }
  0x1c   : > { %1763 = sst [smem:[#allocation13_spill]] %s1634_s19  ;;  %s1084_s23 = sshll.u32 %s361_s22, 4 }
  0x1d   : > { %s1231_s24 = sshll.u32 %s1497_s13, 4  ;;  %s365_s17 = scalar_lea.vmem [#allocation2], %s1084_s23 }
  0x1e   : > { %s372_s15 = scalar_lea.hbm %s1746_s4, %s1231_s24  ;;  %s376_s25 = sshll.u32 %s365_s17, 4  ;;  %s377_s25 = int_to_ptr.vmem [resolvable:$true] %s376_s25 }
  0x1f   : > { %s374_s30 = sshll.u32 %s372_s15, 4  ;;  %p1279_p8 = pnand %p1287_p5, %p1616_p11  ;;  %s375_s30 = int_to_ptr.hbm [resolvable:$true] %s374_s30 }
  0x20   : > { %s362_s27 = scalar_lea.sflag [#allocation3], %s361_s22  ;;  %385 = sbr.rel (%p1597_p3) target bundleno = 865 (0x361), region = 56 }
  0x21   : > { %1281 = dma.hbm_to_vmem [thread:$0]  (!%p1279_p8), %s375_s30, 256, %s377_s25, %s362_s27  }
  0x22   : > { %s1650_s19 = sand.u32 (!%p1597_p3), 1, %s1485_s10  }
  0x23   : > { %s1088_s5 = sshll.u32 (!%p1597_p3), %s1650_s19, 4  ;;  %s388_s26 = scalar_lea.sflag (!%p1597_p3), [#allocation3], %s1650_s19 }
  0x24   : > { %s1656_s23 = scalar_lea.vmem (!%p1597_p3), [#allocation2], %s1088_s5 }
  0x25   : > { %1468 = dma.done.wait (%p1622_p12), %s388_s26, 256  }
  0x26   : > { %1470 = vsyncadd (%p1622_p12), %s388_s26, 4294967040 }
  0x27   : > { %1472 = dma.done.wait (%p1589_p1), [#allocation6], 4096  }
  0x28   : > { %1474 = vsyncadd (%p1589_p1), [#allocation6], 4294963200  ;;  %p456_p3 = scmp.lt.s32.totalorder %s1493_s12, 1  ;;  %vm527_vm0 = vcmask 64512   ;;  %vm551_vm1 = vcmask 1043456   ;;  %s1264_s29 = sshll.u32 %s1493_s12, 4 }
  0x29   : > { %v1156_v22 = vld [vmem:[#allocation5 + $0xf0] sm:$0xf]  ;;  %v1263_v23 = vld [vmem:[#allocation5 + $0xf4] sm:$0xf0]  ;;  %v1262_v24 = vld [vmem:[#allocation5 + $0xf4] sm:$0xf] }
  0x2a   : > { %s457_s30 = scalar_select %p456_p3, %s1493_s12, 1  ;;  %v1157_v25 = vor.u32 %v1263_v23, %v1156_v22  ;;  %v1158_v26 = vld [vmem:[#allocation5 + $0xf8] sm:$0xf0]  ;;  %v1148_v27 = vld [vmem:[#allocation5 + $0xe0] sm:$0xf] }
  0x2b   : > { %v1261_v28 = vld [vmem:[#allocation5 + $0xe4] sm:$0xf0]  ;;  %v1161_v29 = vor.u32 %v1262_v24, %v1158_v26  ;;  %v1260_v30 = vld [vmem:[#allocation5 + $0xe4] sm:$0xf]  ;;  %v1150_v31 = vld [vmem:[#allocation5 + $0xe8] sm:$0xf0] }
  0x2c   : > { %s1668_s20 = smul.u32 24, %s457_s30  ;;  %s479_s24 = scalar_lea.vmem %s1745_s3, %s457_s30  ;;  %v1149_v32 = vor.u32 %v1261_v28, %v1148_v27  ;;  %v1140_v33 = vld [vmem:[#allocation5 + $0xd0] sm:$0xf]  ;;  %v1259_v34 = vld [vmem:[#allocation5 + $0xd4] sm:$0xf0]  ;;  %v1153_v35 = vor.u32 %v1260_v30, %v1150_v31 }
  0x2d   : > { %v1342_v9 = vld [vmem:[%s479_s24] ss:$0 sm:$0xff]  ;;  %v1220_v36 = vld [vmem:[#allocation5 + $0x70] sm:$0xf]  ;;  %v1247_v37 = vld [vmem:[#allocation5 + $0x74] sm:$0xf0]  ;;  %v1141_v44 = vor.u32 %v1259_v34, %v1140_v33 }
  0x2e   : > { %s996_s17 = scalar_lea.vmem %s1743_s1, %s1668_s20  ;;  %s464_s16 = scalar_lea.vmem %s1742_s0, %s1668_s20  ;;  %v1246_v38 = vld [vmem:[#allocation5 + $0x74] sm:$0xf]  ;;  %v1142_v40 = vld [vmem:[#allocation5 + $0xd8] sm:$0xf0]  ;;  %v1221_v41 = vor.u32 %v1247_v37, %v1220_v36  ;;  %v1132_v58 = vld [vmem:[#allocation5 + $0xc0] sm:$0xf] }
  0x2f   : > { %v1094_v0 = vld [vmem:[%s996_s17 + $0x8] sm:$0xff]  ;;  %v481_v1 = vld [vmem:[%s464_s16] sm:$0xff]  ;;  %s1000_s28 = scalar_lea.vmem %s1744_s2, %s1668_s20  ;;  %v1258_v39 = vld [vmem:[#allocation5 + $0xd4] sm:$0xf]  ;;  %s914_s16 = scalar_lea.hbm %s1751_s9, %s1264_s29 }
  0x30   : > { %508 = vmatpush.bf16.xpose.msra.mxu0 %v1094_v0  ;;  %v492_v2 = vrot.slane %v1094_v0, 4  ;;  %v482_v3 = vunpack.c.l.bf16 %v481_v1  ;;  %v483_v4 = vunpack.c.h.bf16 %v481_v1  ;;  %v1095_v18 = vld [vmem:[%s1000_s28 + $0x10] sm:$0xff]  ;;  %v1222_v42 = vld [vmem:[#allocation5 + $0x78] sm:$0xf0]  ;;  %v1145_v45 = vor.u32 %v1258_v39, %v1142_v40  ;;  %v1257_v59 = vld [vmem:[#allocation5 + $0xc4] sm:$0xf0] }
  0x31   : > { %v496_v19 = vrot.slane %v1095_v18, 4  ;;  %v553_v21 = vsel %vm551_vm1, %v1095_v18, 0  ;;  %v1225_v43 = vor.u32 %v1246_v38, %v1222_v42  ;;  %v1256_v60 = vld [vmem:[#allocation5 + $0xc4] sm:$0xf]  ;;  %v1133_v61 = vor.u32 %v1257_v59, %v1132_v58  ;;  %v1134_v62 = vld [vmem:[#allocation5 + $0xc8] sm:$0xf0] }
  0x32   : > { %521 = vmatpush.bf16.xpose.msra.mxu1 %v492_v2  ;;  %v484_v5 = vmul.f32 0.088378906, %v482_v3  ;;  %v485_v6 = vmul.f32 0.088378906, %v483_v4  ;;  %562 = vmatpush.bf16.msra.mxu2 %v553_v21  ;;  %v1212_v63 = vld [vmem:[#allocation5 + $0x60] sm:$0xf]  ;;  %v1245_v0 = vld [vmem:[#allocation5 + $0x64] sm:$0xf0]  ;;  %v1137_v1 = vor.u32 %v1256_v60, %v1134_v62 }
  0x33   : > { %v572_v20 = vsel %vm551_vm1, %v496_v19, 0  ;;  %v1213_v2 = vor.u32 %v1245_v0, %v1212_v63  ;;  %v1244_v3 = vld [vmem:[#allocation5 + $0x64] sm:$0xf]  ;;  %v1214_v4 = vld [vmem:[#allocation5 + $0x68] sm:$0xf0]  ;;  %s455_s12 = scalar_lea.vmem [#allocation7], %s1088_s5 }
  0x34   : > { %v486_v7 = vpack.c.bf16 %v485_v6, %v484_v5  ;;  %581 = vmatpush.bf16.msra.mxu3 %v572_v20  ;;  %v1124_v5 = vld [vmem:[#allocation5 + $0xb0] sm:$0xf]  ;;  %v1217_v6 = vor.u32 %v1244_v3, %v1214_v4  ;;  %v1116_v18 = vld [vmem:[#allocation5 + $0xa0] sm:$0xf]  ;;  %v1253_v19 = vld [vmem:[#allocation5 + $0xa4] sm:$0xf0] }
  0x35   : > { %v1252_v20 = vld [vmem:[#allocation5 + $0xa4] sm:$0xf]  ;;  %v1117_v21 = vor.u32 %v1253_v19, %v1116_v18  ;;  %v1118_v22 = vld [vmem:[#allocation5 + $0xa8] sm:$0xf0]  ;;  %v1196_v23 = vld [vmem:[#allocation5 + $0x40] sm:$0xf] }
  0x36   : > { %v488_v8 = vrot.slane %v486_v7, 4  ;;  %706 = vmatpush.bf16.msrb.mxu2 %v1157_v25  ;;  %v1241_v24 = vld [vmem:[#allocation5 + $0x44] sm:$0xf0]  ;;  %v1121_v25 = vor.u32 %v1252_v20, %v1118_v22  ;;  %v1240_v27 = vld [vmem:[#allocation5 + $0x44] sm:$0xf]  ;;  %s916_s26 = sshll.u32 %s455_s12, 4  ;;  %s917_s26 = int_to_ptr.vmem [resolvable:$true] %s916_s26 }
  0x37   : > { %509 = vmatmul.bf16.vlgmr.msra.gmra.mxu0 %v486_v7  ;;  %v1255_v7 = vld [vmem:[#allocation5 + $0xb4] sm:$0xf0]  ;;  %v1197_v26 = vor.u32 %v1241_v24, %v1196_v23  ;;  %v1198_v28 = vld [vmem:[#allocation5 + $0x48] sm:$0xf0]  ;;  %v1110_v33 = vld [vmem:[#allocation5 + $0x98] sm:$0xf0] }
  0x38   : > { %719 = vmatpush.bf16.msrb.mxu3 %v1161_v29  ;;  %812 = vmatpush.bf16.msrb.mxu0 %v1221_v41  ;;  %v1108_v29 = vld [vmem:[#allocation5 + $0x90] sm:$0xf]  ;;  %v1201_v30 = vor.u32 %v1240_v27, %v1198_v28  ;;  %v1251_v31 = vld [vmem:[#allocation5 + $0x94] sm:$0xf0]  ;;  %v1238_v38 = vld [vmem:[#allocation5 + $0x34] sm:$0xf] }
  0x39   : > { %522 = vmatmul.bf16.vlgmr.msra.gmra.mxu1 %v488_v8  ;;  %v1254_v8 = vld [vmem:[#allocation5 + $0xb4] sm:$0xf]  ;;  %v1109_v34 = vor.u32 %v1251_v31, %v1108_v29  ;;  %v1188_v36 = vld [vmem:[#allocation5 + $0x30] sm:$0xf]  ;;  %v1239_v37 = vld [vmem:[#allocation5 + $0x34] sm:$0xf0] }
  0x3a   : > { %707 = vmatpush.bf16.msrb.mxu2 %v1149_v32  ;;  %825 = vmatpush.bf16.msrb.mxu1 %v1225_v43  ;;  %v1250_v32 = vld [vmem:[#allocation5 + $0x94] sm:$0xf]  ;;  %v1189_v39 = vor.u32 %v1239_v37, %v1188_v36  ;;  %v1190_v40 = vld [vmem:[#allocation5 + $0x38] sm:$0xf0]  ;;  %v1100_v42 = vld [vmem:[#allocation5 + $0x80] sm:$0xf] }
  0x3b   : > { %v1193_v41 = vor.u32 %v1238_v38, %v1190_v40  ;;  %v1249_v43 = vld [vmem:[#allocation5 + $0x84] sm:$0xf0]  ;;  %v1174_v58 = vld [vmem:[#allocation5 + $0x18] sm:$0xf0]  ;;  %v1164_v60 = vld [vmem:[#allocation5] sm:$0xf] }
  0x3c   : > { %720 = vmatpush.bf16.msrb.mxu3 %v1153_v35  ;;  %813 = vmatpush.bf16.msrb.mxu0 %v1213_v2  ;;  %v1113_v35 = vor.u32 %v1250_v32, %v1110_v33  ;;  %v1232_v62 = vld [vmem:[#allocation5 + $0x4] sm:$0xf]  ;;  %v1166_v0 = vld [vmem:[#allocation5 + $0x8] sm:$0xf0]  ;;  %s918_s30 = sshll.u32 %s914_s16, 4  ;;  %s901_s28 = scalar_lea.sflag [#allocation4], %s1650_s19  ;;  %s919_s30 = int_to_ptr.hbm [resolvable:$true] %s918_s30 }
  0x3d   : > { %v846_v23 = vld [vmem:[%s1656_s23] sm:$0xff]  ;;  %v847_v24 = vld [vmem:[%s1656_s23 + $0x8] sm:$0xff]  ;;  %s1429_s20 = sshra.s32 %s919_s30, 4  ;;  %s1435_s5 = scalar_lea.hbm %s1751_s9, 32  ;;  %s1430_s20 = int_to_ptr.hbm [resolvable:$true] %s1429_s20 }
  0x3e   : > { %708 = vmatpush.bf16.msrb.mxu2 %v1141_v44  ;;  %826 = vmatpush.bf16.msrb.mxu1 %v1217_v6  ;;  %v1248_v44 = vld [vmem:[#allocation5 + $0x84] sm:$0xf]  ;;  %s1431_s22 = scalar_lea.hbm %s1430_s20, 16  ;;  %p1436_p11 = scmp.lt.s32.totalorder %s1430_s20, %s1751_s9 }
  0x3f   : > { %p1432_p1 = scmp.ne.s32.totalorder %s1430_s20, %s1431_s22  ;;  %p1437_p12 = scmp.lt.s32.totalorder %s1435_s5, %s1431_s22 }
  0x40   : > { %721 = vmatpush.bf16.msrb.mxu3 %v1145_v45  ;;  %v1101_v45 = vor.u32 %v1249_v43, %v1100_v42 }
  0x41   : > { %p1433_p9 = pnand %p1432_p1, %p1628_p4  ;;  %p1438_p13 = por %p1437_p12, %p1436_p11 }
  0x42   : > { %709 = vmatpush.bf16.msrb.mxu2 %v1133_v61  ;;  %v1233_v61 = vld [vmem:[#allocation5 + $0x4] sm:$0xf0] }
  0x43   : > { %v1165_v63 = vor.u32 %v1233_v61, %v1164_v60  ;;  %p1434_p10 = pneg %p1433_p9 }
  0x44   : > { %722 = vmatpush.bf16.msrb.mxu3 %v1137_v1  ;;  %v1169_v1 = vor.u32 %v1232_v62, %v1166_v0 }
  0x45   : > { %p1439_p0 = pnand %p1438_p13, %p1434_p10 }
  0xb4   : > { %v510_v10 = vpop.f32.mrf.mxu0 }
  0xb5   : > { %v511_v14 = vadd.f32 %v1342_v9, %v510_v10  ;;  %v1125_v10 = vor.u32 %v1255_v7, %v1124_v5 }
  0xb6   : > { %v523_v11 = vpop.f32.mrf.mxu1 }
  0xb7   : > { %v524_v12 = vadd.f32 %v1342_v9, %v523_v11  ;;  %v528_v17 = vsel %vm527_vm0, %v511_v14, -inf  ;;  %v1126_v9 = vld [vmem:[#allocation5 + $0xb8] sm:$0xf0]  ;;  %710 = vmatpush.bf16.msrb.mxu2 %v1125_v10 }
  0xb8   : > { %v1129_v11 = vor.u32 %v1254_v8, %v1126_v9 }
  0xb9   : > { %v531_v13 = vsel %vm527_vm0, %v524_v12, -inf }
  0xba   : > { %532 = vmax.xlane.f32.xlu0 %v531_v13  ;;  %v1243_v13 = vld [vmem:[#allocation5 + $0x54] sm:$0xf0]  ;;  %723 = vmatpush.bf16.msrb.mxu3 %v1129_v11 }
  0xbb   : > { %711 = vmatpush.bf16.msrb.mxu2 %v1117_v21 }
  0xbc   : > { %v512_v15 = vpop.f32.mrf.mxu0 }
  0xbe   : > { %v525_v16 = vpop.f32.mrf.mxu1  ;;  %724 = vmatpush.bf16.msrb.mxu3 %v1121_v25 }
  0xbf   : > { %v1206_v16 = vld [vmem:[#allocation5 + $0x58] sm:$0xf0]  ;;  %712 = vmatpush.bf16.msrb.mxu2 %v1109_v34  ;;  %v1506_v34 = vmov 256.0  }
  0xc2   : > { %529 = vmax.xlane.f32.xlu0 %v528_v17  ;;  %725 = vmatpush.bf16.msrb.mxu3 %v1113_v35 }
  0xc3   : > { %713 = vmatpush.bf16.msrb.mxu2 %v1101_v45 }
 0x12d   : > { %v533_v46 = vpop.xlane.xlu0 %532 }
 0x12e   : > { %v535_v47 = vsub.f32 %v524_v12, %v533_v46  ;;  %v1204_v12 = vld [vmem:[#allocation5 + $0x50] sm:$0xf]  ;;  %v1102_v46 = vld [vmem:[#allocation5 + $0x88] sm:$0xf0] }
 0x12f   : > { %v1205_v15 = vor.u32 %v1243_v13, %v1204_v12 }
 0x130   : > { %v538_v48 = vmul.f32 1.442695, %v535_v47  ;;  %v1180_v47 = vld [vmem:[#allocation5 + $0x20] sm:$0xf] }
 0x131   : > { %814 = vmatpush.bf16.msrb.mxu0 %v1205_v15 }
 0x132   : > { %1343 = vpow2.f32 %v538_v48  ;;  %v1237_v48 = vld [vmem:[#allocation5 + $0x24] sm:$0xf0] }
 0x135   : > { %v530_v49 = vpop.xlane.xlu0 %529  ;;  %815 = vmatpush.bf16.msrb.mxu0 %v1197_v26 }
 0x136   : > { %v534_v50 = vsub.f32 %v511_v14, %v530_v49  ;;  %v1242_v14 = vld [vmem:[#allocation5 + $0x54] sm:$0xf]  ;;  %v1105_v49 = vor.u32 %v1248_v44, %v1102_v46 }
 0x137   : > { %v1209_v17 = vor.u32 %v1242_v14, %v1206_v16  ;;  %v838_v14 = vld [vmem:[%s1748_s6] sm:$0x3] }
 0x138   : > { %v1344_v51 = vpop.eup %1343  ;;  %v536_v52 = vmul.f32 1.442695, %v534_v50  ;;  %v1181_v50 = vor.u32 %v1237_v48, %v1180_v47  ;;  %726 = vmatpush.bf16.msrb.mxu3 %v1105_v49  ;;  %v841_v18 = vperm.slane %v838_v14, 1 }
 0x139   : > { %v543_v53 = vsel %vm527_vm0, %v1344_v51, 0.0  ;;  %v547_v54 = vpack.c.bf16 %v1344_v51, %v1344_v51  ;;  %827 = vmatpush.bf16.msrb.mxu1 %v1209_v17  ;;  %816 = vmatpush.bf16.msrb.mxu0 %v1189_v39  ;;  %v1236_v51 = vld [vmem:[#allocation5 + $0x24] sm:$0xf]  ;;  %v840_v17 = vperm.slane %v838_v14, 0 }
 0x13a   : > { %1345 = vpow2.f32 %v536_v52  ;;  %544 = vadd.xlane.f32.xlu1 %v543_v53  ;;  %v1182_v52 = vld [vmem:[#allocation5 + $0x28] sm:$0xf0] }
 0x13b   : > { %1097 = vmatmul.msk.bf16.vlgmr.msra.gmra.mxu3 %vm527_vm0, %v547_v54  ;;  %v1185_v53 = vor.u32 %v1236_v51, %v1182_v52  ;;  %v1172_v54 = vld [vmem:[#allocation5 + $0x10] sm:$0xf] }
 0x13d   : > { %828 = vmatpush.bf16.msrb.mxu1 %v1201_v30  ;;  %817 = vmatpush.bf16.msrb.mxu0 %v1181_v50 }
 0x140   : > { %v1346_v55 = vpop.eup %1345 }
 0x141   : > { %v540_v56 = vsel %vm527_vm0, %v1346_v55, 0.0  ;;  %v546_v57 = vpack.c.bf16 %v1346_v55, %v1346_v55  ;;  %829 = vmatpush.bf16.msrb.mxu1 %v1193_v41  ;;  %v1235_v55 = vld [vmem:[#allocation5 + $0x14] sm:$0xf0] }
 0x142   : > { %541 = vadd.xlane.f32.xlu1 %v540_v56  ;;  %v1234_v56 = vld [vmem:[#allocation5 + $0x14] sm:$0xf] }
 0x143   : > { %1096 = vmatmul.msk.bf16.vlgmr.msra.gmra.mxu2 %vm527_vm0, %v546_v57  ;;  %v1173_v57 = vor.u32 %v1235_v55, %v1172_v54  ;;  %v1177_v59 = vor.u32 %v1234_v56, %v1174_v58  ;;  %v850_v55 = vld [vmem:[%s1749_s7] sm:$0x3] }
 0x144   : > { %v851_v58 = vld [vmem:[%s1750_s8] sm:$0x3]  ;;  %v886_v60 = vperm.slane %v850_v55, 1 }
 0x145   : > { %830 = vmatpush.bf16.msrb.mxu1 %v1185_v53  ;;  %818 = vmatpush.bf16.msrb.mxu0 %v1173_v57  ;;  %v892_v0 = vperm.slane %v851_v58, 0 }
 0x149   : > { %831 = vmatpush.bf16.msrb.mxu1 %v1177_v59  ;;  %819 = vmatpush.bf16.msrb.mxu0 %v1165_v63  ;;  %v885_v59 = vperm.slane %v850_v55, 0 }
 0x14d   : > { %832 = vmatpush.bf16.msrb.mxu1 %v1169_v1  ;;  %v893_v1 = vperm.slane %v851_v58, 1 }
 0x1ad   : > { %v545_v2 = vpop.xlane.xlu1 %544 }
 0x1ae   : > { %1347 = vrcp.f32 %v545_v2 }
 0x1b4   : > { %v1348_v4 = vpop.eup %1347 }
 0x1b5   : > { %v542_v3 = vpop.xlane.xlu1 %541 }
 0x1b6   : > { %1349 = vrcp.f32 %v542_v3 }
 0x1b7   : > { %1351 = vrcp.f32 %v1506_v34 }
 0x1bc   : > { %v1350_v8 = vpop.eup %1349 }
 0x1bd   : > { %v1352_v35 = vpop.eup %1351 }
 0x1be   : > { %v583_v5 = vpop.f32.mrf.mxu3  ;;  %v856_v36 = vmul.f32 256.0, %v1352_v35  ;;  %vm860_vm2 = vweird.f32 %v1352_v35 }
 0x1bf   : > { %v590_v6 = vmul.f32 %v1348_v4, %v583_v5 }
 0x1c0   : > { %v857_v37 = vsub.f32 1.0, %v856_v36 }
 0x1c1   : > { %v608_v7 = vpack.c.bf16 %v590_v6, %v590_v6 }
 0x1c2   : > { %v858_v38 = vmul.f32 %v1352_v35, %v857_v37 }
 0x1c3   : > { %714 = vmatmul.bf16.vlgmr.msrb.gmra.mxu2 %v608_v7  ;;  %727 = vmatmul.bf16.vlgmr.msrb.gmra.mxu3 %v608_v7 }
 0x1c4   : > { %v859_v39 = vadd.f32 %v1352_v35, %v858_v38 }
 0x1c6   : > { %v564_v9 = vpop.f32.mrf.mxu2  ;;  %v585_v10 = vpop.f32.mrf.mxu3  ;;  %v861_v40 = vsel %vm860_vm2, %v1352_v35, %v859_v39 }
 0x1c7   : > { %v589_v11 = vmul.f32 %v1350_v8, %v564_v9 }
 0x1c9   : > { %v591_v12 = vpack.c.bf16 %v589_v11, %v589_v11 }
 0x1cb   : > { %820 = vmatmul.bf16.vlgmr.msrb.gmra.mxu0 %v591_v12  ;;  %833 = vmatmul.bf16.vlgmr.msrb.gmra.mxu1 %v591_v12 }
 0x1ce   : > { %v566_v13 = vpop.f32.mrf.mxu2 }
 0x246   : > { %v715_v15 = vpop.f32.mrf.mxu2  ;;  %v728_v16 = vpop.f32.mrf.mxu3 }
 0x248   : > { %v821_v19 = vpop.f32.mrf.mxu0  ;;  %v834_v20 = vpop.f32.mrf.mxu1 }
 0x249   : > { %v822_v21 = vadd.f32 %v821_v19, %v715_v15  ;;  %v835_v22 = vadd.f32 %v834_v20, %v728_v16 }
 0x24b   : > { %v844_v25 = vadd.f32 %v840_v17, %v822_v21  ;;  %v845_v26 = vadd.f32 %v841_v18, %v835_v22 }
 0x24d   : > { %v848_v27 = vadd.f32 %v846_v23, %v844_v25  ;;  %v849_v28 = vadd.f32 %v847_v24, %v845_v26 }
 0x24e   : > { %v717_v29 = vpop.f32.mrf.mxu2  ;;  %v730_v30 = vpop.f32.mrf.mxu3 }
 0x24f   : > { %v852_v31 = vadd.f32 %v849_v28, %v848_v27 }
 0x250   : > { %v823_v32 = vpop.f32.mrf.mxu0  ;;  %v836_v33 = vpop.f32.mrf.mxu1 }
 0x251   : > { %853 = vadd.xlane.f32.xlu2 %v852_v31 }
 0x2c4   : > { %v854_v41 = vpop.xlane.xlu2 %853 }
 0x2c5   : > { %v862_v42 = vmul.f32 %v861_v40, %v854_v41 }
 0x2c7   : > { %v863_v43 = vsub.f32 %v848_v27, %v862_v42  ;;  %v864_v44 = vsub.f32 %v849_v28, %v862_v42 }
 0x2c9   : > { %v865_v45 = vmul.f32 %v863_v43, %v863_v43  ;;  %v866_v46 = vmul.f32 %v864_v44, %v864_v44 }
 0x2cb   : > { %v867_v47 = vadd.f32 %v866_v46, %v865_v45 }
 0x2cd   : > { %868 = vadd.xlane.f32.xlu2 %v867_v47 }
 0x340   : > { %v869_v48 = vpop.xlane.xlu2 %868 }
 0x341   : > { %v870_v49 = vmul.f32 %v869_v48, %v861_v40 }
 0x343   : > { %v871_v50 = vadd.f32 1e-12, %v870_v49 }
 0x345   : > { %1353 = vrsqrt.f32 %v871_v50  ;;  %vm878_vm4 = vweird.f32 %v871_v50 }
 0x34b   : > { %v1354_v51 = vpop.eup %1353 }
 0x34c   : > { %v873_v52 = vmul.f32 %v1354_v51, %v871_v50  ;;  %vm879_vm3 = vweird.f32 %v1354_v51 }
 0x34d   : > { %vm880_vm5 = vmor %vm878_vm4, %vm879_vm3 }
 0x34e   : > { %v874_v53 = vmul.f32 %v1354_v51, %v873_v52 }
 0x350   : > { %v875_v54 = vmul.f32 0.5, %v874_v53 }
 0x352   : > { %v876_v56 = vsub.f32 1.5, %v875_v54 }
 0x354   : > { %v877_v57 = vmul.f32 %v1354_v51, %v876_v56 }
 0x356   : > { %v881_v61 = vsel %vm880_vm5, %v1354_v51, %v877_v57 }
 0x357   : > { %v882_v62 = vmul.f32 %v881_v61, %v863_v43  ;;  %v883_v63 = vmul.f32 %v881_v61, %v864_v44 }
 0x359   : > { %v889_v2 = vmul.f32 %v885_v59, %v882_v62  ;;  %v890_v3 = vmul.f32 %v886_v60, %v883_v63 }
 0x35b   : > { %v896_v4 = vadd.f32 %v892_v0, %v889_v2  ;;  %v897_v5 = vadd.f32 %v893_v1, %v890_v3 }
 0x35d   : > { %898 = vst [vmem:[%s455_s12] sm:$0xff] %v896_v4 }
 0x35e   : > { %899 = vst [vmem:[%s455_s12 + $0x8] sm:$0xff] %v897_v5 }
 0x35f   : > { %1442 = shalt.err (!%p1439_p0)
}
 0x360   : > { %1272 = dma.vmem_to_hbm [thread:$0]  (%p1628_p4), %s917_s26, 256, %s919_s30, %s901_s28  }
 0x361 PF: > { %s1765_s19 = sld [smem:[#allocation11_spill]]  ;;  %p1283_p2 = pnand %p1083_p6, %p1636_p7 }
 0x363   : > { %p1284_p5 = pneg %p1283_p2 }
 0x367   : > { %s930_s17 = sand.u32 1, %s1765_s19  }
 0x368   : > { %s931_s25 = scalar_lea.sflag [#allocation4], %s930_s17 }
 0x369   : > { %1476 = dma.done.wait (%p1284_p5), %s931_s25, 256  }
 0x36a   : > { %1478 = vsyncadd (%p1284_p5), %s931_s25, 4294967040  ;;  %s26_s14 = sadd.s32 1, %s1501_s14   ;;  %s1766_s27 = sld [smem:[#allocation13_spill]] }
 0x36b   : > { %p23_p8 = scmp.ge.s32.totalorder %s26_s14, 4   ;;  %s1767_s18 = sld [smem:[#allocation12_spill]] }
 0x36c   : > { %s1768_s30 = smov %s1485_s10  ;;  %s1769_s10 = smov %s1489_s11 }
 0x36d   : > { %s1771_s12 = smov %s1497_s13  ;;  %25 = sbr.rel (!%p23_p8) target bundleno = 9 (0x9), region = 118 }
 0x370   : > { %s1770_s11 = smov %s1766_s27 }
 0x371   : > { %s1772_s13 = smov %s1767_s18 }
 0x372   :  { %937 = vsyncpa [#allocation3], 1 }
 0x373   :  { %939 = vsyncpa [#allocation3 + $0x1], 1 }
 0x374   :  { %940 = vsyncpa [#allocation6], 1 }
 0x375   :  { %941 = vsyncpa [#allocation4], 1 }
 0x376   :  { %943 = vsyncpa [#allocation4 + $0x1], 1 }

// kernel: attention_forward.2
= control target key start
LH: loop header
LB: loop body
LE: loop exit
PB: predicated region body
PF: predicated region fallthrough
CT: control target
= control target key end

     0   :  { %8 = vsyncpa [#allocation3], 0  ;;  %s1946_s0 = inlined_call_operand.hbm [shape: f32[2,8,256], index: 0, kind: input, shape index: {}]   ;;  %s1947_s1 = inlined_call_operand.hbm [shape: bf16[256,768], index: 1, kind: input, shape index: {}]   ;;  %s1948_s2 = inlined_call_operand.vmem [shape: f32[1,768], index: 2, kind: input, shape index: {}]   ;;  %s1949_s3 = inlined_call_operand.vmem [shape: bf16[2,8,768], index: 3, kind: output, shape index: {}]  }
   0x1   :  { %10 = vsyncpa [#allocation3 + $0x1], 0 }
   0x2   :  { %11 = vsyncpa [#allocation5], 0  ;;  %s1801_s12 = smov 0   ;;  %s1803_s13 = smov 0  }
   0x3   :  { %s1805_s14 = smov 0   ;;  %s1807_s15 = smov 0  }
   0x4   :  { %s1809_s16 = smov 0   ;;  %s1811_s17 = smov 0  }
   0x5 LB: > { %s1098_s18 = sadd.s32 4294967295, %s1776_s17   ;;  %p1100_p0 = scmp.ge.s32.totalorder %s1776_s17, 1  ;;  %s1776_s17 = sphi %s1811_s17, %s17_s17   ;;  %s1772_s16 = sphi %s1809_s16, %s1958_s16   ;;  %s1768_s15 = sphi %s1807_s15, %s1957_s15   ;;  %s1764_s14 = sphi %s1805_s14, %s1956_s14   ;;  %s1760_s13 = sphi %s1803_s13, %s1955_s13   ;;  %s1756_s12 = sphi %s1801_s12, %s1954_s12  }
   0x6   : > { %p1833_p1 = scmp.eq.s32.totalorder %s1098_s18, 0  ;;  %p132_p2 = scmp.lt.s32.totalorder %s1776_s17, 3 }
   0x7   : > { %s143_s22 = sshll.u32 %s1947_s1, 4  ;;  %s1778_s24 = smov [#allocation4]   ;;  %s144_s22 = int_to_ptr.hbm [resolvable:$true] %s143_s22 }
   0x8   : > { %p1841_p3 = pnand %p1100_p0, %p132_p2  ;;  %s145_s25 = sshll.u32 %s1778_s24, 4  ;;  %s146_s25 = int_to_ptr.vmem [resolvable:$true] %s145_s25 }
   0x9   : > { %s1779_s26 = smov 384   ;;  %s1780_s27 = smov 24  }
   0xa   : > { %p1600_p4 = pneg %p1841_p3  ;;  %s29_s28 = sadd.s32 1, %s1772_s16 }
   0xb   : > { %p31_p6 = scmp.ge.s32.totalorder %s29_s28, 2  ;;  %p45_p7 = scmp.ne.s32.totalorder %s1764_s14, %s1760_s13 }
   0xc   : > { %p1601_p5 = pnand %p1600_p4, %p1833_p1  ;;  %p46_p8 = scmp.eq.s32.totalorder %s1776_s17, 0 }
   0xd   : > { %s1960_s28 = smov (%p31_p6, %s29_s28), 0  ;;  %s38_s29 = sadd.s32 1, %s1764_s14 }
   0xe   : > { %1603 = dma.hbm_to_vmem [thread:$0]  (!%p1601_p5), %s144_s22, 12288, %s146_s25, [#allocation5], %s1779_s26, %s1779_s26, %s1780_s27  }
   0xf   : > { %p51_p9 = scmp.ne.s32.totalorder %s1760_s13, %s1756_s12  ;;  %s33_s30 = ssub.s32 %s1772_s16, %s1960_s28 }
  0x10   : > { %p1860_p10 = por %p46_p8, %p45_p7  ;;  %p36_p11 = scmp.eq.s32.totalorder %s33_s30, 0 }
  0x11   : > { %p1866_p12 = por %p1833_p1, %p51_p9  ;;  %s162_s6 = sand.u32 1, %s1764_s14  }
  0x12   : > { %s1496_s7 = sshll.u32 %s1772_s16, 4  ;;  %p1609_p13 = scmp.lt.s32.totalorder %s1776_s17, 2 }
  0x13   : > { %s1873_s8 = scalar_select %p36_p11, %s1764_s14, %s38_s29  }
  0x14   : > { %s1103_s9 = sshll.u32 %s162_s6, 4  ;;  %s173_s12 = scalar_lea.hbm %s1946_s0, %s1496_s7 }
  0x15   : > { %s175_s18 = sshll.u32 %s173_s12, 4  ;;  %s166_s20 = scalar_lea.vmem [#allocation2], %s1103_s9  ;;  %s176_s18 = int_to_ptr.hbm [resolvable:$true] %s175_s18 }
  0x16   : > { %s177_s21 = sshll.u32 %s166_s20, 4  ;;  %p1605_p0 = pnand %p1609_p13, %p1860_p10  ;;  %s178_s21 = int_to_ptr.vmem [resolvable:$true] %s177_s21 }
  0x17   : > { %s163_s22 = scalar_lea.sflag [#allocation3], %s162_s6  ;;  %186 = sbr.rel (%p1841_p3) target bundleno = 272 (0x110), region = 32 }
  0x18   : > { %1607 = dma.hbm_to_vmem [thread:$0]  (!%p1605_p0), %s176_s18, 256, %s178_s21, %s163_s22  }
  0x19   : > { %s188_s24 = sand.u32 (!%p1841_p3), 1, %s1760_s13  }
  0x1a   : > { %s1884_s25 = sshll.u32 (!%p1841_p3), %s188_s24, 4  ;;  %s189_s26 = scalar_lea.sflag (!%p1841_p3), [#allocation3], %s188_s24 }
  0x1b   : > { %s192_s27 = scalar_lea.vmem (!%p1841_p3), [#allocation2], %s1884_s25 }
  0x1c   : > { %1747 = dma.done.wait (%p1866_p12), %s189_s26, 256  }
  0x1d   : > { %1749 = vsyncadd (%p1866_p12), %s189_s26, 4294967040 }
  0x1e   : > { %1751 = dma.done.wait (%p1833_p1), [#allocation5], 12288  }
  0x1f   : > { %1753 = vsyncadd (%p1833_p1), [#allocation5], 4294955008  ;;  %v1280_v0 = vld [vmem:[#allocation4 + $0x150] sm:$0xf]  ;;  %v1542_v1 = vld [vmem:[#allocation4 + $0x164] sm:$0xf0] }
  0x20   : > { %v1472_v2 = vld [vmem:[#allocation4 + $0x2d0] sm:$0xf]  ;;  %v1281_v3 = vor.u32 %v1542_v1, %v1280_v0  ;;  %v1590_v4 = vld [vmem:[#allocation4 + $0x2e4] sm:$0xf0]  ;;  %v1539_v5 = vld [vmem:[#allocation4 + $0x154] sm:$0xf] }
  0x21   : > { %v1282_v6 = vld [vmem:[#allocation4 + $0x168] sm:$0xf0]  ;;  %v1473_v7 = vor.u32 %v1590_v4, %v1472_v2  ;;  %v1587_v9 = vld [vmem:[#allocation4 + $0x2d4] sm:$0xf]  ;;  %v1256_v11 = vld [vmem:[#allocation4 + $0x120] sm:$0xf] }
  0x22   : > { %v1285_v8 = vor.u32 %v1539_v5, %v1282_v6  ;;  %v1474_v10 = vld [vmem:[#allocation4 + $0x2e8] sm:$0xf0]  ;;  %828 = vmatpush.bf16.msra.mxu0 %v1281_v3  ;;  %v1536_v13 = vld [vmem:[#allocation4 + $0x134] sm:$0xf0]  ;;  %v1448_v14 = vld [vmem:[#allocation4 + $0x2a0] sm:$0xf] }
  0x23   : > { %v1477_v12 = vor.u32 %v1587_v9, %v1474_v10  ;;  %v1584_v15 = vld [vmem:[#allocation4 + $0x2b4] sm:$0xf0]  ;;  %841 = vmatpush.bf16.msra.mxu1 %v1473_v7  ;;  %v1257_v16 = vor.u32 %v1536_v13, %v1256_v11  ;;  %v1533_v18 = vld [vmem:[#allocation4 + $0x124] sm:$0xf]  ;;  %v1258_v19 = vld [vmem:[#allocation4 + $0x138] sm:$0xf0] }
  0x24   : > { %854 = vmatpush.bf16.msra.mxu2 %v1285_v8  ;;  %v1449_v17 = vor.u32 %v1584_v15, %v1448_v14  ;;  %v1581_v20 = vld [vmem:[#allocation4 + $0x2a4] sm:$0xf]  ;;  %v1261_v21 = vor.u32 %v1533_v18, %v1258_v19  ;;  %v1450_v22 = vld [vmem:[#allocation4 + $0x2b8] sm:$0xf0]  ;;  %v1232_v23 = vld [vmem:[#allocation4 + $0xf0] sm:$0xf] }
  0x25   : > { %867 = vmatpush.bf16.msra.mxu3 %v1477_v12  ;;  %v1530_v24 = vld [vmem:[#allocation4 + $0x104] sm:$0xf0]  ;;  %v1453_v25 = vor.u32 %v1581_v20, %v1450_v22  ;;  %v1424_v26 = vld [vmem:[#allocation4 + $0x270] sm:$0xf]  ;;  %v1527_v28 = vld [vmem:[#allocation4 + $0xf4] sm:$0xf] }
  0x26   : > { %v1578_v27 = vld [vmem:[#allocation4 + $0x284] sm:$0xf0]  ;;  %829 = vmatpush.bf16.msra.mxu0 %v1257_v16  ;;  %v1233_v29 = vor.u32 %v1530_v24, %v1232_v23  ;;  %v1234_v30 = vld [vmem:[#allocation4 + $0x108] sm:$0xf0]  ;;  %v1575_v31 = vld [vmem:[#allocation4 + $0x274] sm:$0xf] }
  0x27   : > { %v1426_v32 = vld [vmem:[#allocation4 + $0x288] sm:$0xf0]  ;;  %842 = vmatpush.bf16.msra.mxu1 %v1449_v17  ;;  %v1425_v33 = vor.u32 %v1578_v27, %v1424_v26  ;;  %v1237_v34 = vor.u32 %v1527_v28, %v1234_v30  ;;  %v1208_v35 = vld [vmem:[#allocation4 + $0xc0] sm:$0xf]  ;;  %v1524_v36 = vld [vmem:[#allocation4 + $0xd4] sm:$0xf0] }
  0x28   : > { %855 = vmatpush.bf16.msra.mxu2 %v1261_v21  ;;  %v1400_v37 = vld [vmem:[#allocation4 + $0x240] sm:$0xf]  ;;  %v1429_v38 = vor.u32 %v1575_v31, %v1426_v32  ;;  %v1572_v39 = vld [vmem:[#allocation4 + $0x254] sm:$0xf0]  ;;  %v1521_v40 = vld [vmem:[#allocation4 + $0xc4] sm:$0xf]  ;;  %v1209_v44 = vor.u32 %v1524_v36, %v1208_v35 }
  0x29   : > { %868 = vmatpush.bf16.msra.mxu3 %v1453_v25  ;;  %v1210_v41 = vld [vmem:[#allocation4 + $0xd8] sm:$0xf0]  ;;  %v1569_v42 = vld [vmem:[#allocation4 + $0x244] sm:$0xf]  ;;  %v1401_v45 = vor.u32 %v1572_v39, %v1400_v37  ;;  %v1184_v47 = vld [vmem:[#allocation4 + $0x90] sm:$0xf] }
  0x2a   : > { %v1402_v43 = vld [vmem:[#allocation4 + $0x258] sm:$0xf0]  ;;  %830 = vmatpush.bf16.msra.mxu0 %v1233_v29  ;;  %v1213_v46 = vor.u32 %v1521_v40, %v1210_v41  ;;  %v1518_v48 = vld [vmem:[#allocation4 + $0xa4] sm:$0xf0]  ;;  %v1376_v49 = vld [vmem:[#allocation4 + $0x210] sm:$0xf] }
  0x2b   : > { %843 = vmatpush.bf16.msra.mxu1 %v1425_v33  ;;  %v1405_v50 = vor.u32 %v1569_v42, %v1402_v43  ;;  %v1566_v51 = vld [vmem:[#allocation4 + $0x224] sm:$0xf0]  ;;  %v1515_v52 = vld [vmem:[#allocation4 + $0x94] sm:$0xf]  ;;  %v1186_v53 = vld [vmem:[#allocation4 + $0xa8] sm:$0xf0]  ;;  %v1185_v56 = vor.u32 %v1518_v48, %v1184_v47 }
  0x2c   : > { %856 = vmatpush.bf16.msra.mxu2 %v1237_v34  ;;  %v1563_v54 = vld [vmem:[#allocation4 + $0x214] sm:$0xf]  ;;  %v1378_v55 = vld [vmem:[#allocation4 + $0x228] sm:$0xf0]  ;;  %v1377_v57 = vor.u32 %v1566_v51, %v1376_v49  ;;  %v1189_v58 = vor.u32 %v1515_v52, %v1186_v53  ;;  %v1160_v59 = vld [vmem:[#allocation4 + $0x60] sm:$0xf] }
  0x2d   : > { %869 = vmatpush.bf16.msra.mxu3 %v1429_v38  ;;  %v1512_v60 = vld [vmem:[#allocation4 + $0x74] sm:$0xf0]  ;;  %v1352_v61 = vld [vmem:[#allocation4 + $0x1e0] sm:$0xf]  ;;  %v1381_v62 = vor.u32 %v1563_v54, %v1378_v55  ;;  %v1509_v0 = vld [vmem:[#allocation4 + $0x64] sm:$0xf] }
  0x2e   : > { %831 = vmatpush.bf16.msra.mxu0 %v1209_v44  ;;  %v1560_v63 = vld [vmem:[#allocation4 + $0x1f4] sm:$0xf0]  ;;  %v1162_v1 = vld [vmem:[#allocation4 + $0x78] sm:$0xf0]  ;;  %v1557_v2 = vld [vmem:[#allocation4 + $0x1e4] sm:$0xf]  ;;  %v1161_v4 = vor.u32 %v1512_v60, %v1160_v59 }
  0x2f   : > { %844 = vmatpush.bf16.msra.mxu1 %v1401_v45  ;;  %v1354_v3 = vld [vmem:[#allocation4 + $0x1f8] sm:$0xf0]  ;;  %v1353_v5 = vor.u32 %v1560_v63, %v1352_v61  ;;  %v1165_v6 = vor.u32 %v1509_v0, %v1162_v1  ;;  %v1136_v7 = vld [vmem:[#allocation4 + $0x30] sm:$0xf]  ;;  %v1506_v8 = vld [vmem:[#allocation4 + $0x44] sm:$0xf0] }
  0x30   : > { %857 = vmatpush.bf16.msra.mxu2 %v1213_v46  ;;  %v1328_v9 = vld [vmem:[#allocation4 + $0x1b0] sm:$0xf]  ;;  %v1357_v10 = vor.u32 %v1557_v2, %v1354_v3  ;;  %v1554_v11 = vld [vmem:[#allocation4 + $0x1c4] sm:$0xf0]  ;;  %v1503_v12 = vld [vmem:[#allocation4 + $0x34] sm:$0xf]  ;;  %v1137_v16 = vor.u32 %v1506_v8, %v1136_v7 }
  0x31   : > { %870 = vmatpush.bf16.msra.mxu3 %v1405_v50  ;;  %v1138_v13 = vld [vmem:[#allocation4 + $0x48] sm:$0xf0]  ;;  %v1551_v14 = vld [vmem:[#allocation4 + $0x1b4] sm:$0xf]  ;;  %v1112_v17 = vld [vmem:[#allocation4] sm:$0xf]  ;;  %v1329_v19 = vor.u32 %v1554_v11, %v1328_v9 }
  0x32   : > { %832 = vmatpush.bf16.msra.mxu0 %v1185_v56  ;;  %v1330_v15 = vld [vmem:[#allocation4 + $0x1c8] sm:$0xf0]  ;;  %v1500_v18 = vld [vmem:[#allocation4 + $0x14] sm:$0xf0]  ;;  %v1141_v20 = vor.u32 %v1503_v12, %v1138_v13  ;;  %v1304_v21 = vld [vmem:[#allocation4 + $0x180] sm:$0xf] }
  0x33   : > { %845 = vmatpush.bf16.msra.mxu1 %v1377_v57  ;;  %v1548_v22 = vld [vmem:[#allocation4 + $0x194] sm:$0xf0]  ;;  %v1497_v23 = vld [vmem:[#allocation4 + $0x4] sm:$0xf]  ;;  %v1333_v24 = vor.u32 %v1551_v14, %v1330_v15  ;;  %v1114_v25 = vld [vmem:[#allocation4 + $0x18] sm:$0xf0]  ;;  %v1113_v31 = vor.u32 %v1500_v18, %v1112_v17 }
  0x34   : > { %858 = vmatpush.bf16.msra.mxu2 %v1189_v58  ;;  %v1545_v26 = vld [vmem:[#allocation4 + $0x184] sm:$0xf]  ;;  %v1306_v27 = vld [vmem:[#allocation4 + $0x198] sm:$0xf0]  ;;  %v1288_v28 = vld [vmem:[#allocation4 + $0x158] sm:$0xf]  ;;  %v1305_v35 = vor.u32 %v1548_v22, %v1304_v21  ;;  %v1117_v36 = vor.u32 %v1497_v23, %v1114_v25 }
  0x35   : > { %871 = vmatpush.bf16.msra.mxu3 %v1381_v62  ;;  %v1543_v29 = vld [vmem:[#allocation4 + $0x16c] sm:$0xf0]  ;;  %v1480_v30 = vld [vmem:[#allocation4 + $0x2d8] sm:$0xf]  ;;  %v1540_v33 = vld [vmem:[#allocation4 + $0x15c] sm:$0xf]  ;;  %v1309_v39 = vor.u32 %v1545_v26, %v1306_v27 }
  0x36   : > { %833 = vmatpush.bf16.msra.mxu0 %v1161_v4  ;;  %v1591_v32 = vld [vmem:[#allocation4 + $0x2ec] sm:$0xf0]  ;;  %v1290_v34 = vld [vmem:[#allocation4 + $0x170] sm:$0xf0]  ;;  %v1588_v37 = vld [vmem:[#allocation4 + $0x2dc] sm:$0xf]  ;;  %v1289_v40 = vor.u32 %v1543_v29, %v1288_v28 }
  0x37   : > { %846 = vmatpush.bf16.msra.mxu1 %v1353_v5  ;;  %v1482_v38 = vld [vmem:[#allocation4 + $0x2f0] sm:$0xf0]  ;;  %v1481_v41 = vor.u32 %v1591_v32, %v1480_v30  ;;  %v1293_v42 = vor.u32 %v1540_v33, %v1290_v34  ;;  %v1264_v43 = vld [vmem:[#allocation4 + $0x128] sm:$0xf]  ;;  %v1537_v44 = vld [vmem:[#allocation4 + $0x13c] sm:$0xf0] }
  0x38   : > { %859 = vmatpush.bf16.msra.mxu2 %v1165_v6  ;;  %v1456_v45 = vld [vmem:[#allocation4 + $0x2a8] sm:$0xf]  ;;  %v1485_v46 = vor.u32 %v1588_v37, %v1482_v38  ;;  %v1585_v47 = vld [vmem:[#allocation4 + $0x2bc] sm:$0xf0]  ;;  %v1534_v48 = vld [vmem:[#allocation4 + $0x12c] sm:$0xf]  ;;  %v1265_v52 = vor.u32 %v1537_v44, %v1264_v43 }
  0x39   : > { %872 = vmatpush.bf16.msra.mxu3 %v1357_v10  ;;  %v1266_v49 = vld [vmem:[#allocation4 + $0x140] sm:$0xf0]  ;;  %v1582_v50 = vld [vmem:[#allocation4 + $0x2ac] sm:$0xf]  ;;  %v1240_v53 = vld [vmem:[#allocation4 + $0xf8] sm:$0xf]  ;;  %v1457_v55 = vor.u32 %v1585_v47, %v1456_v45 }
  0x3a   : > { %834 = vmatpush.bf16.msra.mxu0 %v1137_v16  ;;  %v1458_v51 = vld [vmem:[#allocation4 + $0x2c0] sm:$0xf0]  ;;  %v1531_v54 = vld [vmem:[#allocation4 + $0x10c] sm:$0xf0]  ;;  %v1269_v56 = vor.u32 %v1534_v48, %v1266_v49  ;;  %v1432_v57 = vld [vmem:[#allocation4 + $0x278] sm:$0xf] }
  0x3b   : > { %847 = vmatpush.bf16.msra.mxu1 %v1329_v19  ;;  %v1579_v58 = vld [vmem:[#allocation4 + $0x28c] sm:$0xf0]  ;;  %v1461_v60 = vor.u32 %v1582_v50, %v1458_v51  ;;  %v1528_v61 = vld [vmem:[#allocation4 + $0xfc] sm:$0xf]  ;;  %v1242_v62 = vld [vmem:[#allocation4 + $0x110] sm:$0xf0]  ;;  %v1241_v4 = vor.u32 %v1531_v54, %v1240_v53 }
  0x3c   : > { %860 = vmatpush.bf16.msra.mxu2 %v1141_v20  ;;  %v234_v59 = vld [vmem:[%s192_s27] sm:$0xff]  ;;  %v235_v0 = vld [vmem:[%s192_s27 + $0x8] sm:$0xff]  ;;  %v1433_v5 = vor.u32 %v1579_v58, %v1432_v57  ;;  %v1245_v6 = vor.u32 %v1528_v61, %v1242_v62  ;;  %p225_p1 = scmp.lt.s32.totalorder %s1768_s15, 1 }
  0x3d   : > { %873 = vmatpush.bf16.msra.mxu3 %v1333_v24  ;;  %v1897_v63 = vpack.c.bf16 %v234_v59, %v234_v59  ;;  %v1576_v1 = vld [vmem:[#allocation4 + $0x27c] sm:$0xf]  ;;  %v1434_v2 = vld [vmem:[#allocation4 + $0x290] sm:$0xf0]  ;;  %v1901_v3 = vpack.c.bf16 %v235_v0, %v235_v0  ;;  %v1216_v7 = vld [vmem:[#allocation4 + $0xc8] sm:$0xf] }
  0x3e   : > { %835 = vmatpush.bf16.msra.mxu0 %v1113_v31  ;;  %v1525_v8 = vld [vmem:[#allocation4 + $0xdc] sm:$0xf0]  ;;  %v1408_v9 = vld [vmem:[#allocation4 + $0x248] sm:$0xf]  ;;  %v1437_v10 = vor.u32 %v1576_v1, %v1434_v2  ;;  %v1522_v12 = vld [vmem:[#allocation4 + $0xcc] sm:$0xf] }
  0x3f   : > { %848 = vmatpush.bf16.msra.mxu1 %v1305_v35  ;;  %v1573_v11 = vld [vmem:[#allocation4 + $0x25c] sm:$0xf0]  ;;  %v1218_v13 = vld [vmem:[#allocation4 + $0xe0] sm:$0xf0]  ;;  %v1570_v14 = vld [vmem:[#allocation4 + $0x24c] sm:$0xf]  ;;  %v1217_v16 = vor.u32 %v1525_v8, %v1216_v7 }
  0x40   : > { %861 = vmatpush.bf16.msra.mxu2 %v1117_v36  ;;  %v1410_v15 = vld [vmem:[#allocation4 + $0x260] sm:$0xf0]  ;;  %v1409_v17 = vor.u32 %v1573_v11, %v1408_v9  ;;  %v1221_v18 = vor.u32 %v1522_v12, %v1218_v13  ;;  %v1192_v19 = vld [vmem:[#allocation4 + $0x98] sm:$0xf]  ;;  %v1519_v20 = vld [vmem:[#allocation4 + $0xac] sm:$0xf0] }
  0x41   : > { %874 = vmatpush.bf16.msra.mxu3 %v1309_v39  ;;  %836 = vmatmul.bf16.vlgmr.msra.gmra.mxu0 %v1897_v63  ;;  %v1384_v21 = vld [vmem:[#allocation4 + $0x218] sm:$0xf]  ;;  %v1413_v22 = vor.u32 %v1570_v14, %v1410_v15  ;;  %v1567_v23 = vld [vmem:[#allocation4 + $0x22c] sm:$0xf0]  ;;  %v1516_v24 = vld [vmem:[#allocation4 + $0x9c] sm:$0xf]  ;;  %v1193_v28 = vor.u32 %v1519_v20, %v1192_v19 }
  0x42   : > { %880 = vmatpush.bf16.msrb.mxu0 %v1289_v40  ;;  %849 = vmatmul.bf16.vlgmr.msra.gmra.mxu1 %v1901_v3  ;;  %v1194_v25 = vld [vmem:[#allocation4 + $0xb0] sm:$0xf0]  ;;  %v1564_v26 = vld [vmem:[#allocation4 + $0x21c] sm:$0xf]  ;;  %v1385_v29 = vor.u32 %v1567_v23, %v1384_v21  ;;  %v1168_v31 = vld [vmem:[#allocation4 + $0x68] sm:$0xf] }
  0x43   : > { %893 = vmatpush.bf16.msrb.mxu1 %v1481_v41  ;;  %862 = vmatmul.bf16.vlgmr.msra.gmra.mxu2 %v1897_v63  ;;  %v1386_v27 = vld [vmem:[#allocation4 + $0x230] sm:$0xf0]  ;;  %v1197_v30 = vor.u32 %v1516_v24, %v1194_v25  ;;  %v1513_v32 = vld [vmem:[#allocation4 + $0x7c] sm:$0xf0]  ;;  %v1360_v33 = vld [vmem:[#allocation4 + $0x1e8] sm:$0xf] }
  0x44   : > { %906 = vmatpush.bf16.msrb.mxu2 %v1293_v42  ;;  %875 = vmatmul.bf16.vlgmr.msra.gmra.mxu3 %v1901_v3  ;;  %v1389_v34 = vor.u32 %v1564_v26, %v1386_v27  ;;  %v1561_v35 = vld [vmem:[#allocation4 + $0x1fc] sm:$0xf0]  ;;  %v1510_v36 = vld [vmem:[#allocation4 + $0x6c] sm:$0xf]  ;;  %v1170_v37 = vld [vmem:[#allocation4 + $0x80] sm:$0xf0]  ;;  %v1169_v40 = vor.u32 %v1513_v32, %v1168_v31 }
  0x45   : > { %919 = vmatpush.bf16.msrb.mxu3 %v1485_v46  ;;  %v1558_v38 = vld [vmem:[#allocation4 + $0x1ec] sm:$0xf]  ;;  %v1362_v39 = vld [vmem:[#allocation4 + $0x200] sm:$0xf0]  ;;  %v1361_v41 = vor.u32 %v1561_v35, %v1360_v33  ;;  %v1173_v42 = vor.u32 %v1510_v36, %v1170_v37  ;;  %v1144_v43 = vld [vmem:[#allocation4 + $0x38] sm:$0xf] }
  0x46   : > { %881 = vmatpush.bf16.msrb.mxu0 %v1265_v52  ;;  %v1507_v44 = vld [vmem:[#allocation4 + $0x4c] sm:$0xf0]  ;;  %v1336_v45 = vld [vmem:[#allocation4 + $0x1b8] sm:$0xf]  ;;  %v1365_v46 = vor.u32 %v1558_v38, %v1362_v39  ;;  %v1504_v48 = vld [vmem:[#allocation4 + $0x3c] sm:$0xf] }
  0x47   : > { %894 = vmatpush.bf16.msrb.mxu1 %v1457_v55  ;;  %v1555_v47 = vld [vmem:[#allocation4 + $0x1cc] sm:$0xf0]  ;;  %v1146_v49 = vld [vmem:[#allocation4 + $0x50] sm:$0xf0]  ;;  %v1552_v50 = vld [vmem:[#allocation4 + $0x1bc] sm:$0xf]  ;;  %v1145_v52 = vor.u32 %v1507_v44, %v1144_v43 }
  0x48   : > { %907 = vmatpush.bf16.msrb.mxu2 %v1269_v56  ;;  %v1338_v51 = vld [vmem:[#allocation4 + $0x1d0] sm:$0xf0]  ;;  %v1120_v53 = vld [vmem:[#allocation4 + $0x8] sm:$0xf]  ;;  %v1501_v54 = vld [vmem:[#allocation4 + $0x1c] sm:$0xf0]  ;;  %v1337_v55 = vor.u32 %v1555_v47, %v1336_v45  ;;  %v1149_v56 = vor.u32 %v1504_v48, %v1146_v49 }
  0x49   : > { %920 = vmatpush.bf16.msrb.mxu3 %v1461_v60  ;;  %v1312_v57 = vld [vmem:[#allocation4 + $0x188] sm:$0xf]  ;;  %v1549_v58 = vld [vmem:[#allocation4 + $0x19c] sm:$0xf0]  ;;  %v1498_v59 = vld [vmem:[#allocation4 + $0xc] sm:$0xf]  ;;  %v1341_v60 = vor.u32 %v1552_v50, %v1338_v51 }
  0x4a   : > { %882 = vmatpush.bf16.msrb.mxu0 %v1241_v4  ;;  %v1122_v61 = vld [vmem:[#allocation4 + $0x20] sm:$0xf0]  ;;  %v1546_v62 = vld [vmem:[#allocation4 + $0x18c] sm:$0xf]  ;;  %v1296_v1 = vld [vmem:[#allocation4 + $0x160] sm:$0xf]  ;;  %v1313_v9 = vor.u32 %v1549_v58, %v1312_v57 }
  0x4b   : > { %895 = vmatpush.bf16.msrb.mxu1 %v1433_v5  ;;  %v1314_v0 = vld [vmem:[#allocation4 + $0x1a0] sm:$0xf0]  ;;  %v1544_v2 = vld [vmem:[#allocation4 + $0x174] sm:$0xf0]  ;;  %v1488_v4 = vld [vmem:[#allocation4 + $0x2e0] sm:$0xf]  ;;  %v1121_v5 = vor.u32 %v1501_v54, %v1120_v53 }
  0x4c   : > { %908 = vmatpush.bf16.msrb.mxu2 %v1245_v6  ;;  %v1592_v6 = vld [vmem:[#allocation4 + $0x2f4] sm:$0xf0]  ;;  %v1541_v7 = vld [vmem:[#allocation4 + $0x164] sm:$0xf]  ;;  %v1298_v8 = vld [vmem:[#allocation4 + $0x178] sm:$0xf0]  ;;  %v1317_v13 = vor.u32 %v1546_v62, %v1314_v0  ;;  %v1297_v14 = vor.u32 %v1544_v2, %v1296_v1 }
  0x4d   : > { %921 = vmatpush.bf16.msrb.mxu3 %v1437_v10  ;;  %v1125_v10 = vor.u32 %v1498_v59, %v1122_v61  ;;  %v1589_v11 = vld [vmem:[#allocation4 + $0x2e4] sm:$0xf]  ;;  %v1490_v12 = vld [vmem:[#allocation4 + $0x2f8] sm:$0xf0]  ;;  %v1489_v15 = vor.u32 %v1592_v6, %v1488_v4  ;;  %v1464_v19 = vld [vmem:[#allocation4 + $0x2b0] sm:$0xf] }
  0x4e   : > { %883 = vmatpush.bf16.msrb.mxu0 %v1217_v16  ;;  %v1301_v16 = vor.u32 %v1541_v7, %v1298_v8  ;;  %v1493_v20 = vor.u32 %v1589_v11, %v1490_v12  ;;  %v1586_v21 = vld [vmem:[#allocation4 + $0x2c4] sm:$0xf0]  ;;  %v1274_v23 = vld [vmem:[#allocation4 + $0x148] sm:$0xf0]  ;;  %v1583_v24 = vld [vmem:[#allocation4 + $0x2b4] sm:$0xf] }
  0x4f   : > { %896 = vmatpush.bf16.msrb.mxu1 %v1409_v17  ;;  %v1272_v17 = vld [vmem:[#allocation4 + $0x130] sm:$0xf]  ;;  %v1466_v25 = vld [vmem:[#allocation4 + $0x2c8] sm:$0xf0]  ;;  %v1465_v27 = vor.u32 %v1586_v21, %v1464_v19  ;;  %v1440_v31 = vld [vmem:[#allocation4 + $0x280] sm:$0xf] }
  0x50   : > { %909 = vmatpush.bf16.msrb.mxu2 %v1221_v18  ;;  %v1538_v18 = vld [vmem:[#allocation4 + $0x144] sm:$0xf0]  ;;  %v1469_v32 = vor.u32 %v1583_v24, %v1466_v25  ;;  %v1580_v33 = vld [vmem:[#allocation4 + $0x294] sm:$0xf0]  ;;  %v1250_v35 = vld [vmem:[#allocation4 + $0x118] sm:$0xf0] }
  0x51   : > { %922 = vmatpush.bf16.msrb.mxu3 %v1413_v22  ;;  %v1535_v22 = vld [vmem:[#allocation4 + $0x134] sm:$0xf]  ;;  %v1273_v26 = vor.u32 %v1538_v18, %v1272_v17  ;;  %v1577_v36 = vld [vmem:[#allocation4 + $0x284] sm:$0xf]  ;;  %v1442_v37 = vld [vmem:[#allocation4 + $0x298] sm:$0xf0]  ;;  %v1441_v39 = vor.u32 %v1580_v33, %v1440_v31 }
  0x52   : > { %884 = vmatpush.bf16.msrb.mxu0 %v1193_v28  ;;  %v1277_v28 = vor.u32 %v1535_v22, %v1274_v23  ;;  %v1416_v43 = vld [vmem:[#allocation4 + $0x250] sm:$0xf]  ;;  %v1445_v44 = vor.u32 %v1577_v36, %v1442_v37  ;;  %v1574_v45 = vld [vmem:[#allocation4 + $0x264] sm:$0xf0]  ;;  %v1226_v47 = vld [vmem:[#allocation4 + $0xe8] sm:$0xf0] }
  0x53   : > { %897 = vmatpush.bf16.msrb.mxu1 %v1385_v29  ;;  %v1248_v29 = vld [vmem:[#allocation4 + $0x100] sm:$0xf]  ;;  %v1571_v48 = vld [vmem:[#allocation4 + $0x254] sm:$0xf]  ;;  %v1418_v49 = vld [vmem:[#allocation4 + $0x268] sm:$0xf0]  ;;  %v1417_v51 = vor.u32 %v1574_v45, %v1416_v43 }
  0x54   : > { %910 = vmatpush.bf16.msrb.mxu2 %v1197_v30  ;;  %v1532_v30 = vld [vmem:[#allocation4 + $0x114] sm:$0xf0]  ;;  %v1200_v53 = vld [vmem:[#allocation4 + $0xa0] sm:$0xf]  ;;  %v1517_v58 = vld [vmem:[#allocation4 + $0xa4] sm:$0xf] }
  0x55   : > { %923 = vmatpush.bf16.msrb.mxu3 %v1389_v34  ;;  %v1529_v34 = vld [vmem:[#allocation4 + $0x104] sm:$0xf]  ;;  %v1249_v38 = vor.u32 %v1532_v30, %v1248_v29  ;;  %v1520_v54 = vld [vmem:[#allocation4 + $0xb4] sm:$0xf0]  ;;  %v1202_v59 = vld [vmem:[#allocation4 + $0xb8] sm:$0xf0] }
  0x56   : > { %885 = vmatpush.bf16.msrb.mxu0 %v1169_v40  ;;  %v1253_v40 = vor.u32 %v1529_v34, %v1250_v35  ;;  %v1568_v57 = vld [vmem:[#allocation4 + $0x234] sm:$0xf0]  ;;  %v1394_v61 = vld [vmem:[#allocation4 + $0x238] sm:$0xf0]  ;;  %v1201_v62 = vor.u32 %v1520_v54, %v1200_v53  ;;  %v1205_v1 = vor.u32 %v1517_v58, %v1202_v59  ;;  %v1176_v2 = vld [vmem:[#allocation4 + $0x70] sm:$0xf] }
  0x57   : > { %898 = vmatpush.bf16.msrb.mxu1 %v1361_v41  ;;  %v1224_v41 = vld [vmem:[#allocation4 + $0xd0] sm:$0xf]  ;;  %v1514_v4 = vld [vmem:[#allocation4 + $0x84] sm:$0xf0]  ;;  %v1511_v8 = vld [vmem:[#allocation4 + $0x74] sm:$0xf] }
  0x58   : > { %911 = vmatpush.bf16.msrb.mxu2 %v1173_v42  ;;  %v1526_v42 = vld [vmem:[#allocation4 + $0xe4] sm:$0xf0]  ;;  %v1370_v11 = vld [vmem:[#allocation4 + $0x208] sm:$0xf0]  ;;  %v1177_v12 = vor.u32 %v1514_v4, %v1176_v2  ;;  %v1344_v17 = vld [vmem:[#allocation4 + $0x1c0] sm:$0xf] }
  0x59   : > { %924 = vmatpush.bf16.msrb.mxu3 %v1365_v46  ;;  %v1523_v46 = vld [vmem:[#allocation4 + $0xd4] sm:$0xf]  ;;  %v1225_v50 = vor.u32 %v1526_v42, %v1224_v41  ;;  %v1562_v7 = vld [vmem:[#allocation4 + $0x204] sm:$0xf0]  ;;  %v1556_v19 = vld [vmem:[#allocation4 + $0x1d4] sm:$0xf0] }
  0x5a   : > { %886 = vmatpush.bf16.msrb.mxu0 %v1145_v52  ;;  %v1229_v52 = vor.u32 %v1523_v46, %v1226_v47  ;;  %v1154_v21 = vld [vmem:[#allocation4 + $0x58] sm:$0xf0]  ;;  %v1553_v22 = vld [vmem:[#allocation4 + $0x1c4] sm:$0xf]  ;;  %v1345_v25 = vor.u32 %v1556_v19, %v1344_v17  ;;  %v1320_v29 = vld [vmem:[#allocation4 + $0x190] sm:$0xf] }
  0x5b   : > { %899 = vmatpush.bf16.msrb.mxu1 %v1337_v55  ;;  %v1392_v55 = vld [vmem:[#allocation4 + $0x220] sm:$0xf]  ;;  %v1346_v23 = vld [vmem:[#allocation4 + $0x1d8] sm:$0xf0]  ;;  %v1550_v31 = vld [vmem:[#allocation4 + $0x1a4] sm:$0xf0] }
  0x5c   : > { %912 = vmatpush.bf16.msrb.mxu2 %v1149_v56  ;;  %v1421_v56 = vor.u32 %v1571_v48, %v1418_v49  ;;  %v1393_v0 = vor.u32 %v1568_v57, %v1392_v55  ;;  %v1349_v30 = vor.u32 %v1553_v22, %v1346_v23  ;;  %v1130_v33 = vld [vmem:[#allocation4 + $0x28] sm:$0xf0]  ;;  %v1547_v34 = vld [vmem:[#allocation4 + $0x194] sm:$0xf]  ;;  %v1321_v37 = vor.u32 %v1550_v31, %v1320_v29  ;;  %s1962_s15 = smov (!%p225_p1, %s1768_s15), 1 }
  0x5d   : > { %925 = vmatpush.bf16.msrb.mxu3 %v1341_v60  ;;  %v1565_v60 = vld [vmem:[#allocation4 + $0x224] sm:$0xf]  ;;  %v1322_v35 = vld [vmem:[#allocation4 + $0x1a8] sm:$0xf0]  ;;  %s1593_s29 = smul.u32 24, %s1962_s15 }
  0x5e   : > { %887 = vmatpush.bf16.msrb.mxu0 %v1121_v5  ;;  %v1368_v5 = vld [vmem:[#allocation4 + $0x1f0] sm:$0xf]  ;;  %v1397_v6 = vor.u32 %v1565_v60, %v1394_v61 }
  0x5f   : > { %900 = vmatpush.bf16.msrb.mxu1 %v1313_v9  ;;  %v1178_v9 = vld [vmem:[#allocation4 + $0x88] sm:$0xf0]  ;;  %s1923_s5 = scalar_lea.vmem %s1949_s3, %s1593_s29 }
  0x60   : > { %913 = vmatpush.bf16.msrb.mxu2 %v1125_v10  ;;  %v1559_v10 = vld [vmem:[#allocation4 + $0x1f4] sm:$0xf] }
  0x61   : > { %926 = vmatpush.bf16.msrb.mxu3 %v1317_v13  ;;  %888 = vmatmul.bf16.vlgmr.msrb.gmra.mxu0 %v1897_v63  ;;  %v1369_v13 = vor.u32 %v1562_v7, %v1368_v5  ;;  %v1373_v18 = vor.u32 %v1559_v10, %v1370_v11 }
  0x62   : > { %932 = vmatpush.bf16.msra.mxu0 %v1297_v14  ;;  %901 = vmatmul.bf16.vlgmr.msrb.gmra.mxu1 %v1901_v3  ;;  %v1181_v14 = vor.u32 %v1511_v8, %v1178_v9 }
  0x63   : > { %945 = vmatpush.bf16.msra.mxu1 %v1489_v15  ;;  %914 = vmatmul.bf16.vlgmr.msrb.gmra.mxu2 %v1897_v63  ;;  %v1152_v15 = vld [vmem:[#allocation4 + $0x40] sm:$0xf] }
  0x64   : > { %958 = vmatpush.bf16.msra.mxu2 %v1301_v16  ;;  %927 = vmatmul.bf16.vlgmr.msrb.gmra.mxu3 %v1901_v3  ;;  %v1508_v16 = vld [vmem:[#allocation4 + $0x54] sm:$0xf0] }
  0x65   : > { %971 = vmatpush.bf16.msra.mxu3 %v1493_v20  ;;  %v1505_v20 = vld [vmem:[#allocation4 + $0x44] sm:$0xf]  ;;  %v1153_v24 = vor.u32 %v1508_v16, %v1152_v15 }
  0x66   : > { %933 = vmatpush.bf16.msra.mxu0 %v1273_v26  ;;  %v1157_v26 = vor.u32 %v1505_v20, %v1154_v21 }
  0x67   : > { %946 = vmatpush.bf16.msra.mxu1 %v1465_v27  ;;  %v1128_v27 = vld [vmem:[#allocation4 + $0x10] sm:$0xf] }
  0x68   : > { %959 = vmatpush.bf16.msra.mxu2 %v1277_v28  ;;  %v1502_v28 = vld [vmem:[#allocation4 + $0x24] sm:$0xf0] }
  0x69   : > { %972 = vmatpush.bf16.msra.mxu3 %v1469_v32  ;;  %v1499_v32 = vld [vmem:[#allocation4 + $0x14] sm:$0xf]  ;;  %v1129_v36 = vor.u32 %v1502_v28, %v1128_v27 }
  0x6a   : > { %934 = vmatpush.bf16.msra.mxu0 %v1249_v38  ;;  %v1133_v38 = vor.u32 %v1499_v32, %v1130_v33 }
  0x6b   : > { %947 = vmatpush.bf16.msra.mxu1 %v1441_v39  ;;  %v1325_v39 = vor.u32 %v1547_v34, %v1322_v35 }
  0x6c   : > { %960 = vmatpush.bf16.msra.mxu2 %v1253_v40  ;;  %v334_v40 = vld [vmem:[%s1948_s2] sm:$0x3f] }
  0x6d   : > { %973 = vmatpush.bf16.msra.mxu3 %v1445_v44  ;;  %v336_v41 = vperm.slane %v334_v40, 0  ;;  %v337_v44 = vperm.slane %v334_v40, 1  ;;  %v338_v54 = vperm.slane %v334_v40, 2  ;;  %v339_v58 = vperm.slane %v334_v40, 3 }
  0x6e   : > { %935 = vmatpush.bf16.msra.mxu0 %v1225_v50  ;;  %v340_v9 = vperm.slane %v334_v40, 4  ;;  %v341_v10 = vperm.slane %v334_v40, 5 }
  0x6f   : > { %948 = vmatpush.bf16.msra.mxu1 %v1417_v51 }
  0x70   : > { %961 = vmatpush.bf16.msra.mxu2 %v1229_v52 }
  0x71   : > { %974 = vmatpush.bf16.msra.mxu3 %v1421_v56 }
  0x72   : > { %936 = vmatpush.bf16.msra.mxu0 %v1201_v62 }
  0x73   : > { %949 = vmatpush.bf16.msra.mxu1 %v1393_v0 }
  0x74   : > { %962 = vmatpush.bf16.msra.mxu2 %v1205_v1 }
  0x75   : > { %975 = vmatpush.bf16.msra.mxu3 %v1397_v6 }
  0x76   : > { %937 = vmatpush.bf16.msra.mxu0 %v1177_v12 }
  0x77   : > { %950 = vmatpush.bf16.msra.mxu1 %v1369_v13 }
  0x78   : > { %963 = vmatpush.bf16.msra.mxu2 %v1181_v14 }
  0x79   : > { %976 = vmatpush.bf16.msra.mxu3 %v1373_v18 }
  0x7a   : > { %938 = vmatpush.bf16.msra.mxu0 %v1153_v24 }
  0x7b   : > { %951 = vmatpush.bf16.msra.mxu1 %v1345_v25 }
  0x7c   : > { %964 = vmatpush.bf16.msra.mxu2 %v1157_v26 }
  0x7d   : > { %977 = vmatpush.bf16.msra.mxu3 %v1349_v30 }
  0x7e   : > { %939 = vmatpush.bf16.msra.mxu0 %v1129_v36 }
  0x7f   : > { %952 = vmatpush.bf16.msra.mxu1 %v1321_v37 }
  0x80   : > { %965 = vmatpush.bf16.msra.mxu2 %v1133_v38 }
  0x81   : > { %978 = vmatpush.bf16.msra.mxu3 %v1325_v39  ;;  %940 = vmatmul.bf16.vlgmr.msra.gmra.mxu0 %v1897_v63 }
  0x82   : > { %953 = vmatmul.bf16.vlgmr.msra.gmra.mxu1 %v1901_v3 }
  0x83   : > { %966 = vmatmul.bf16.vlgmr.msra.gmra.mxu2 %v1897_v63 }
  0x84   : > { %979 = vmatmul.bf16.vlgmr.msra.gmra.mxu3 %v1901_v3 }
  0xbe   : > { %v837_v42 = vpop.f32.mrf.mxu0 }
  0xbf   : > { %v850_v43 = vpop.f32.mrf.mxu1  ;;  %v838_v45 = vadd.f32 %v837_v42, %v336_v41 }
  0xc1   : > { %v851_v48 = vadd.f32 %v850_v43, %v838_v45 }
  0xc6   : > { %v863_v46 = vpop.f32.mrf.mxu2  ;;  %v839_v63 = vpop.f32.mrf.mxu0 }
  0xc7   : > { %v864_v47 = vadd.f32 %v863_v46, %v337_v44  ;;  %v876_v49 = vpop.f32.mrf.mxu3  ;;  %v852_v3 = vpop.f32.mrf.mxu1 }
  0xc9   : > { %v877_v50 = vadd.f32 %v876_v49, %v864_v47 }
  0xcb   : > { %v984_v51 = vpack.c.bf16 %v877_v50, %v851_v48 }
  0xcd   : > { %987 = vst [vmem:[%s1923_s5] sm:$0xff] %v984_v51 }
  0xce   : > { %v865_v52 = vpop.f32.mrf.mxu2 }
  0xcf   : > { %v878_v53 = vpop.f32.mrf.mxu3 }
  0xde   : > { %v889_v55 = vpop.f32.mrf.mxu0 }
  0xdf   : > { %v902_v56 = vpop.f32.mrf.mxu1  ;;  %v890_v57 = vadd.f32 %v889_v55, %v338_v54 }
  0xe1   : > { %v903_v60 = vadd.f32 %v902_v56, %v890_v57 }
  0xe6   : > { %v915_v59 = vpop.f32.mrf.mxu2  ;;  %v891_v1 = vpop.f32.mrf.mxu0 }
  0xe7   : > { %v916_v61 = vadd.f32 %v915_v59, %v339_v58  ;;  %v928_v62 = vpop.f32.mrf.mxu3  ;;  %v904_v2 = vpop.f32.mrf.mxu1 }
  0xe9   : > { %v929_v0 = vadd.f32 %v928_v62, %v916_v61 }
  0xeb   : > { %v985_v4 = vpack.c.bf16 %v929_v0, %v903_v60 }
  0xed   : > { %988 = vst [vmem:[%s1923_s5 + $0x8] sm:$0xff] %v985_v4 }
  0xee   : > { %v917_v5 = vpop.f32.mrf.mxu2 }
  0xef   : > { %v930_v6 = vpop.f32.mrf.mxu3 }
  0xfe   : > { %v941_v7 = vpop.f32.mrf.mxu0 }
  0xff   : > { %v954_v8 = vpop.f32.mrf.mxu1  ;;  %v942_v11 = vadd.f32 %v941_v7, %v340_v9 }
 0x101   : > { %v955_v17 = vadd.f32 %v954_v8, %v942_v11 }
 0x106   : > { %v967_v12 = vpop.f32.mrf.mxu2  ;;  %v943_v15 = vpop.f32.mrf.mxu0 }
 0x107   : > { %v968_v13 = vadd.f32 %v967_v12, %v341_v10  ;;  %v980_v14 = vpop.f32.mrf.mxu3  ;;  %v956_v16 = vpop.f32.mrf.mxu1 }
 0x109   : > { %v981_v18 = vadd.f32 %v980_v14, %v968_v13 }
 0x10b   : > { %v986_v19 = vpack.c.bf16 %v981_v18, %v955_v17 }
 0x10d   : > { %989 = vst [vmem:[%s1923_s5 + $0x10] sm:$0xff] %v986_v19 }
 0x10e   : > { %v969_v20 = vpop.f32.mrf.mxu2 }
 0x10f   : > { %v982_v21 = vpop.f32.mrf.mxu3 }
 0x110 PF: > { %s17_s17 = sadd.s32 1, %s1776_s17   ;;  %s1954_s12 = smov %s1760_s13 }
 0x111   : > { %p14_p2 = scmp.ge.s32.totalorder %s17_s17, 4   ;;  %s1955_s13 = smov %s1764_s14 }
 0x112   : > { %s1956_s14 = smov %s1873_s8  ;;  %s1957_s15 = smov %s1772_s16 }
 0x113   : > { %s1958_s16 = smov %s1960_s28  ;;  %16 = sbr.rel (!%p14_p2) target bundleno = 5 (0x5), region = 76 }
 0x118   :  { %1019 = vsyncpa [#allocation3], 1 }
 0x119   :  { %1021 = vsyncpa [#allocation3 + $0x1], 1 }
 0x11a   :  { %1022 = vsyncpa [#allocation5], 1 }

</bundles_post_ra>
